<compile_context>
chip_gen: v5e
topology: v5e:2x2
jax: 0.10.0
libtpu: 0.0.40
codegen_flags: <defaults>
</compile_context>

<pallas_src>
import functools

import jax
import jax.numpy as jnp
from jax.experimental import pallas as pl
from jax.experimental.pallas import tpu as pltpu


def _round_up(v, m):
    return (v + m - 1) // m * m


def _default_m_blocks():
    """2 M-blocks (dual TensorCore) on v7x, 1 elsewhere (v5e/v6e single TC)."""
    try:
        kind = jax.devices()[0].device_kind.lower()
    except Exception:
        return 1
    return 2 if "7" in kind else 1


_M_BLOCKS = _default_m_blocks()


# ----------------------------------------------------------------------------
# Pallas kernel 1: single-K-tile  out = relu(x @ w + b)   (conv layers, im2col)
# ----------------------------------------------------------------------------
def _matmul_bias_relu_kernel(x_ref, w_ref, b_ref, o_ref):
    out = jnp.dot(x_ref[...], w_ref[...], preferred_element_type=jnp.float32)
    out = jnp.maximum(out + b_ref[...], 0.0)           # f32 epilogue, single cast
    o_ref[...] = out.astype(o_ref.dtype)


def conv_matmul(patches, w_kn, b_1n, *, m_blocks=_M_BLOCKS):
    """relu(patches @ w + b); patches:[M,K] bf16, w:[K,Np] bf16, b:[1,Np] f32.

    K and N are single full-extent blocks (N pre-padded to 128 lanes at
    prepare time).  M is a single full-extent block except on v7x for large M
    (conv1), where it is split into exactly 2 "parallel" blocks.
    """
    M, K = patches.shape
    _, Np = w_kn.shape

    if m_blocks > 1 and M >= 1024:
        tm = _round_up(pl.cdiv(M, m_blocks), 8)
        Mp = tm * m_blocks
        xp = jnp.pad(patches, ((0, Mp - M), (0, 0))) if Mp != M else patches
    else:
        tm, Mp, xp = M, M, patches                      # full-extent block, no pad

    out = pl.pallas_call(
        _matmul_bias_relu_kernel,
        out_shape=jax.ShapeDtypeStruct((Mp, Np), jnp.bfloat16),
        grid=(Mp // tm,),
        in_specs=[
            pl.BlockSpec((tm, K), lambda i: (i, 0)),
            pl.BlockSpec((K, Np), lambda i: (0, 0)),
            pl.BlockSpec((1, Np), lambda i: (0, 0)),
        ],
        out_specs=pl.BlockSpec((tm, Np), lambda i: (i, 0)),
        compiler_params=pltpu.CompilerParams(dimension_semantics=("parallel",)),
    )(xp, w_kn, b_1n)
    return out[:M] if Mp != M else out


# ----------------------------------------------------------------------------
# Pallas kernel 2: fused FC stack — all weights VMEM-resident, one launch
# ----------------------------------------------------------------------------
def _fc_stack_kernel(*refs, num_layers):
    x_ref, o_ref = refs[0], refs[-1]
    h = x_ref[...]
    for l in range(num_layers):
        w_ref = refs[1 + 2 * l]
        b_ref = refs[2 + 2 * l]
        h = jnp.dot(h, w_ref[...], preferred_element_type=jnp.float32) + b_ref[...]
        if l < num_layers - 1:
            h = jnp.maximum(h, 0.0).astype(jnp.bfloat16)
    o_ref[...] = h.astype(o_ref.dtype)


def fc_stack(x_bf16, fc_prepped):
    """Whole FC stack (hidden ReLU layers + final linear) in one pallas_call."""
    B = x_bf16.shape[0]
    n_out = fc_prepped[-1][0].shape[1]
    args = [x_bf16]
    for w, b in fc_prepped:
        args.append(w)
        args.append(b)
    vmem_spec = pl.BlockSpec(memory_space=pltpu.MemorySpace.VMEM)
    return pl.pallas_call(
        functools.partial(_fc_stack_kernel, num_layers=len(fc_prepped)),
        out_shape=jax.ShapeDtypeStruct((B, n_out), jnp.float32),
        in_specs=[vmem_spec] * len(args),
        out_specs=vmem_spec,
    )(*args)


# ----------------------------------------------------------------------------
# im2col glue (wrapper-side, fuses into one XLA op per conv layer)
# ----------------------------------------------------------------------------
def im2col(x_nhwc, kh, kw, stride):
    B, H, W, C = x_nhwc.shape
    oh = (H - kh) // stride + 1
    ow = (W - kw) // stride + 1
    patches = []
    for i in range(kh):
        for j in range(kw):
            patches.append(
                x_nhwc[:, i : i + stride * oh : stride, j : j + stride * ow : stride, :]
            )
    # [B, oh, ow, kh*kw, C] -> flatten patch dims with (kh, kw, c) ordering
    p = jnp.stack(patches, axis=3)
    return p.reshape(B * oh * ow, kh * kw * C), oh, ow


# ----------------------------------------------------------------------------
# Model: architecture, parameter init, one-time prep, forward
# ----------------------------------------------------------------------------
CNN_ARCH = [(5, 24, 2, 0), (5, 36, 2, 0), (5, 48, 2, 0), (3, 64, 1, 0), (3, 64, 1, 0)]
FC_SIZES = [1164, 100, 50, 10]


def cnn_output_size(input_dims, arch):
    c, h, w = input_dims
    for k, co, s, p in arch:
        h = (h + 2 * p - k) // s + 1
        w = (w + 2 * p - k) // s + 1
        c = co
    return c, h, w


def init_params(key, input_dims):
    params = {"conv": [], "fc": []}
    c_in = input_dims[0]
    for k, c_out, s, p in CNN_ARCH:
        key, k1, k2, k3, k4, k5, k6 = jax.random.split(key, 7)
        params["conv"].append(
            dict(
                w=jax.random.normal(k1, (c_out, c_in, k, k), jnp.float32) * 0.05,
                b=jax.random.normal(k2, (c_out,), jnp.float32) * 0.05,
                gamma=1.0 + 0.1 * jax.random.normal(k3, (c_out,), jnp.float32),
                beta=0.1 * jax.random.normal(k4, (c_out,), jnp.float32),
                rmean=0.1 * jax.random.normal(k5, (c_out,), jnp.float32),
                rvar=1.0 + 0.1 * jax.random.uniform(k6, (c_out,), jnp.float32),
            )
        )
        c_in = c_out

    co, ho, wo = cnn_output_size(input_dims, CNN_ARCH)
    in_dim = co * ho * wo
    for out_dim in FC_SIZES + [1]:
        key, k1, k2 = jax.random.split(key, 3)
        params["fc"].append(
            dict(
                w=jax.random.normal(k1, (in_dim, out_dim), jnp.float32)
                * (1.0 / jnp.sqrt(in_dim)),
                b=jax.random.normal(k2, (out_dim,), jnp.float32) * 0.05,
            )
        )
        in_dim = out_dim
    return params


def prepare_params(params, input_dims, eps=1e-5):
    """One-time, off-hot-path parameter preparation.

    * Folds eval-mode BatchNorm into each conv weight/bias.
    * Lays conv weights out as [kh*kw*C_in, Np] bf16 with N padded to 128 lanes
      (lane-dense, unmasked output stores) and biases as [1, Np] f32.
    * Folds torch's NCHW flatten ordering into the first FC weight so the
      forward can flatten the NHWC conv output directly (no transpose).
    * Casts FC weights to bf16 and reshapes biases to [1, n] f32.
    """
    conv_prepped = []
    c_in = input_dims[0]
    for p, (k, c_out, s, _) in zip(params["conv"], CNN_ARCH):
        scale = p["gamma"] / jnp.sqrt(p["rvar"] + eps)                  # [c_out]
        w_fold = p["w"] * scale[:, None, None, None]
        b_fold = (p["b"] - p["rmean"]) * scale + p["beta"]
        # weight -> [kh, kw, c_in, c_out] -> [kh*kw*c_in, c_out] (matches im2col order)
        w_mat = jnp.transpose(w_fold, (2, 3, 1, 0)).reshape(k * k * c_in, c_out)
        n_pad = _round_up(c_out, 128)          # 128 lanes; do NOT pad to 256
        w_mat = jnp.pad(w_mat, ((0, 0), (0, n_pad - c_out))).astype(jnp.bfloat16)
        b_row = jnp.pad(b_fold.reshape(1, c_out), ((0, 0), (0, n_pad - c_out)))
        conv_prepped.append((w_mat, b_row.astype(jnp.float32)))
        c_in = c_out

    co, oh, ow = cnn_output_size(input_dims, CNN_ARCH)
    fc_prepped = []
    for li, p in enumerate(params["fc"]):
        w = p["w"]
        if li == 0:
            # torch flatten index (c, h, w)  ->  our NHWC flatten index (h, w, c)
            n1 = w.shape[1]
            w = w.reshape(co, oh, ow, n1).transpose(1, 2, 0, 3).reshape(oh * ow * co, n1)
        fc_prepped.append(
            (w.astype(jnp.bfloat16), p["b"].astype(jnp.float32).reshape(1, -1))
        )
    return {"conv": conv_prepped, "fc": fc_prepped}


def cnn_driver_forward(prepped, x_nchw):
    # NCHW -> NHWC; bf16 activations through the conv stack.
    x = jnp.transpose(x_nchw, (0, 2, 3, 1)).astype(jnp.bfloat16)
    for (w_kn, b_1n), (k, c_out, stride, _) in zip(prepped["conv"], CNN_ARCH):
        B = x.shape[0]
        patches, oh, ow = im2col(x, k, k, stride)
        out = conv_matmul(patches, w_kn, b_1n)          # (M, 128) bf16
        x = out[:, :c_out].reshape(B, oh, ow, c_out)
    # NHWC flatten; torch's NCHW ordering was folded into fc weight 0 at prep time.
    x2 = x.reshape(x.shape[0], -1)
    out = fc_stack(x2, prepped["fc"])                   # (B, 1) float32
    # torch .squeeze() on (B, 1); squeeze only the trailing axis to keep (B,).
    return jnp.squeeze(out, axis=-1)


if __name__ == "__main__":
    # Small but architecture-valid input: (C, H, W) = (3, 66, 66), batch = 2.
    input_dims = (3, 66, 66)
    batch = 2

    key = jax.random.PRNGKey(0)
    key, pkey, xkey = jax.random.split(key, 3)
    params = init_params(pkey, input_dims)
    prepped = prepare_params(params, input_dims)        # one-time, off hot path
    x = jax.random.normal(xkey, (batch,) + input_dims, jnp.float32)

    fwd = jax.jit(cnn_driver_forward)
    out = jax.block_until_ready(fwd(prepped, x))
    assert out.shape == (batch,), out.shape
    print("KERNEL_OK")
</pallas_src>

<mosaic_0001>
module attributes {stable_mosaic.version = 11 : i64} {
  func.func @_matmul_bias_relu_kernel(%arg0: i32, %arg1: memref<1922x75xbf16, #tpu.memory_space<vmem>>, %arg2: memref<75x128xbf16, #tpu.memory_space<vmem>>, %arg3: memref<1x128xf32, #tpu.memory_space<vmem>>, %arg4: memref<1922x128xbf16, #tpu.memory_space<vmem>>) attributes {dimension_semantics = [#tpu.dimension_semantics<parallel>], iteration_bounds = array<i64: 1>, scalar_prefetch = 0 : i64, scratch_operands = 0 : i64, tpu.core_type = #tpu.core_type<tc>, window_params = [{transform_indices = @transform_0, window_bounds = array<i64: 1922, 75>}, {pipeline_mode = #tpu.pipeline_mode<synchronous>, transform_indices = @transform_1, window_bounds = array<i64: 75, 128>}, {pipeline_mode = #tpu.pipeline_mode<synchronous>, transform_indices = @transform_2, window_bounds = array<i64: 1, 128>}, {transform_indices = @transform_3, window_bounds = array<i64: 1922, 128>}]} {
    %c0 = arith.constant 0 : index
    %c0_0 = arith.constant 0 : index
    %0 = vector.load %arg1[%c0, %c0_0] : memref<1922x75xbf16, #tpu.memory_space<vmem>>, vector<1922x75xbf16>
    %c0_1 = arith.constant 0 : index
    %c0_2 = arith.constant 0 : index
    %1 = vector.load %arg2[%c0_1, %c0_2] : memref<75x128xbf16, #tpu.memory_space<vmem>>, vector<75x128xbf16>
    %cst = arith.constant dense<0.000000e+00> : vector<1922x128xf32>
    %2 = tpu.matmul %0, %1, %cst {dimension_numbers = #tpu.dot_dimension_numbers<[1], [0], [0], [1], [0, 0, 1, 1], [], []>} : vector<1922x75xbf16>, vector<75x128xbf16>, vector<1922x128xf32> -> vector<1922x128xf32>
    %c0_3 = arith.constant 0 : index
    %c0_4 = arith.constant 0 : index
    %3 = vector.load %arg3[%c0_3, %c0_4] : memref<1x128xf32, #tpu.memory_space<vmem>>, vector<1x128xf32>
    %4 = vector.broadcast %3 : vector<1x128xf32> to vector<1922x128xf32>
    %5 = arith.addf %2, %4 : vector<1922x128xf32>
    %cst_5 = arith.constant 0.000000e+00 : f32
    %6 = vector.broadcast %cst_5 : f32 to vector<1922x128xf32>
    %7 = arith.maximumf %5, %6 : vector<1922x128xf32>
    %8 = arith.truncf %7 : vector<1922x128xf32> to vector<1922x128xbf16>
    %c0_6 = arith.constant 0 : index
    %c0_7 = arith.constant 0 : index
    %9 = vector.load %arg4[%c0_6, %c0_7] : memref<1922x128xbf16, #tpu.memory_space<vmem>>, vector<1922x128xbf16>
    tpu.vector_store %arg4[%c0_6, %c0_7], %8 {strides = array<i32>} : memref<1922x128xbf16, #tpu.memory_space<vmem>>, vector<1922x128xbf16>,
    return
  }
  func.func @transform_0(%arg0: i32) -> (i32, i32) {
    %c0_i32 = arith.constant 0 : i32
    %c0_i32_0 = arith.constant 0 : i32
    return %arg0, %c0_i32 : i32, i32
  }
  func.func @transform_1(%arg0: i32) -> (i32, i32) {
    %c0_i32 = arith.constant 0 : i32
    %c0_i32_0 = arith.constant 0 : i32
    %c0_i32_1 = arith.constant 0 : i32
    return %c0_i32, %c0_i32_0 : i32, i32
  }
  func.func @transform_2(%arg0: i32) -> (i32, i32) {
    %c0_i32 = arith.constant 0 : i32
    %c0_i32_0 = arith.constant 0 : i32
    %c0_i32_1 = arith.constant 0 : i32
    return %c0_i32, %c0_i32_0 : i32, i32
  }
  func.func @transform_3(%arg0: i32) -> (i32, i32) {
    %c0_i32 = arith.constant 0 : i32
    %c0_i32_0 = arith.constant 0 : i32
    return %arg0, %c0_i32 : i32, i32
  }
}

module attributes {stable_mosaic.version = 11 : i64} {
  func.func @_matmul_bias_relu_kernel(%arg0: i32, %arg1: memref<392x600xbf16, #tpu.memory_space<vmem>>, %arg2: memref<600x128xbf16, #tpu.memory_space<vmem>>, %arg3: memref<1x128xf32, #tpu.memory_space<vmem>>, %arg4: memref<392x128xbf16, #tpu.memory_space<vmem>>) attributes {dimension_semantics = [#tpu.dimension_semantics<parallel>], iteration_bounds = array<i64: 1>, scalar_prefetch = 0 : i64, scratch_operands = 0 : i64, tpu.core_type = #tpu.core_type<tc>, window_params = [{transform_indices = @transform_0, window_bounds = array<i64: 392, 600>}, {pipeline_mode = #tpu.pipeline_mode<synchronous>, transform_indices = @transform_1, window_bounds = array<i64: 600, 128>}, {pipeline_mode = #tpu.pipeline_mode<synchronous>, transform_indices = @transform_2, window_bounds = array<i64: 1, 128>}, {transform_indices = @transform_3, window_bounds = array<i64: 392, 128>}]} {
    %c0 = arith.constant 0 : index
    %c0_0 = arith.constant 0 : index
    %0 = vector.load %arg1[%c0, %c0_0] : memref<392x600xbf16, #tpu.memory_space<vmem>>, vector<392x600xbf16>
    %c0_1 = arith.constant 0 : index
    %c0_2 = arith.constant 0 : index
    %1 = vector.load %arg2[%c0_1, %c0_2] : memref<600x128xbf16, #tpu.memory_space<vmem>>, vector<600x128xbf16>
    %cst = arith.constant dense<0.000000e+00> : vector<392x128xf32>
    %2 = tpu.matmul %0, %1, %cst {dimension_numbers = #tpu.dot_dimension_numbers<[1], [0], [0], [1], [0, 0, 1, 1], [], []>} : vector<392x600xbf16>, vector<600x128xbf16>, vector<392x128xf32> -> vector<392x128xf32>
    %c0_3 = arith.constant 0 : index
    %c0_4 = arith.constant 0 : index
    %3 = vector.load %arg3[%c0_3, %c0_4] : memref<1x128xf32, #tpu.memory_space<vmem>>, vector<1x128xf32>
    %4 = vector.broadcast %3 : vector<1x128xf32> to vector<392x128xf32>
    %5 = arith.addf %2, %4 : vector<392x128xf32>
    %cst_5 = arith.constant 0.000000e+00 : f32
    %6 = vector.broadcast %cst_5 : f32 to vector<392x128xf32>
    %7 = arith.maximumf %5, %6 : vector<392x128xf32>
    %8 = arith.truncf %7 : vector<392x128xf32> to vector<392x128xbf16>
    %c0_6 = arith.constant 0 : index
    %c0_7 = arith.constant 0 : index
    %9 = vector.load %arg4[%c0_6, %c0_7] : memref<392x128xbf16, #tpu.memory_space<vmem>>, vector<392x128xbf16>
    tpu.vector_store %arg4[%c0_6, %c0_7], %8 {strides = array<i32>} : memref<392x128xbf16, #tpu.memory_space<vmem>>, vector<392x128xbf16>,
    return
  }
  func.func @transform_0(%arg0: i32) -> (i32, i32) {
    %c0_i32 = arith.constant 0 : i32
    %c0_i32_0 = arith.constant 0 : i32
    return %arg0, %c0_i32 : i32, i32
  }
  func.func @transform_1(%arg0: i32) -> (i32, i32) {
    %c0_i32 = arith.constant 0 : i32
    %c0_i32_0 = arith.constant 0 : i32
    %c0_i32_1 = arith.constant 0 : i32
    return %c0_i32, %c0_i32_0 : i32, i32
  }
  func.func @transform_2(%arg0: i32) -> (i32, i32) {
    %c0_i32 = arith.constant 0 : i32
    %c0_i32_0 = arith.constant 0 : i32
    %c0_i32_1 = arith.constant 0 : i32
    return %c0_i32, %c0_i32_0 : i32, i32
  }
  func.func @transform_3(%arg0: i32) -> (i32, i32) {
    %c0_i32 = arith.constant 0 : i32
    %c0_i32_0 = arith.constant 0 : i32
    return %arg0, %c0_i32 : i32, i32
  }
}

module attributes {stable_mosaic.version = 11 : i64} {
  func.func @_matmul_bias_relu_kernel(%arg0: i32, %arg1: memref<50x900xbf16, #tpu.memory_space<vmem>>, %arg2: memref<900x128xbf16, #tpu.memory_space<vmem>>, %arg3: memref<1x128xf32, #tpu.memory_space<vmem>>, %arg4: memref<50x128xbf16, #tpu.memory_space<vmem>>) attributes {dimension_semantics = [#tpu.dimension_semantics<parallel>], iteration_bounds = array<i64: 1>, scalar_prefetch = 0 : i64, scratch_operands = 0 : i64, tpu.core_type = #tpu.core_type<tc>, window_params = [{transform_indices = @transform_0, window_bounds = array<i64: 50, 900>}, {pipeline_mode = #tpu.pipeline_mode<synchronous>, transform_indices = @transform_1, window_bounds = array<i64: 900, 128>}, {pipeline_mode = #tpu.pipeline_mode<synchronous>, transform_indices = @transform_2, window_bounds = array<i64: 1, 128>}, {transform_indices = @transform_3, window_bounds = array<i64: 50, 128>}]} {
    %c0 = arith.constant 0 : index
    %c0_0 = arith.constant 0 : index
    %0 = vector.load %arg1[%c0, %c0_0] : memref<50x900xbf16, #tpu.memory_space<vmem>>, vector<50x900xbf16>
    %c0_1 = arith.constant 0 : index
    %c0_2 = arith.constant 0 : index
    %1 = vector.load %arg2[%c0_1, %c0_2] : memref<900x128xbf16, #tpu.memory_space<vmem>>, vector<900x128xbf16>
    %cst = arith.constant dense<0.000000e+00> : vector<50x128xf32>
    %2 = tpu.matmul %0, %1, %cst {dimension_numbers = #tpu.dot_dimension_numbers<[1], [0], [0], [1], [0, 0, 1, 1], [], []>} : vector<50x900xbf16>, vector<900x128xbf16>, vector<50x128xf32> -> vector<50x128xf32>
    %c0_3 = arith.constant 0 : index
    %c0_4 = arith.constant 0 : index
    %3 = vector.load %arg3[%c0_3, %c0_4] : memref<1x128xf32, #tpu.memory_space<vmem>>, vector<1x128xf32>
    %4 = vector.broadcast %3 : vector<1x128xf32> to vector<50x128xf32>
    %5 = arith.addf %2, %4 : vector<50x128xf32>
    %cst_5 = arith.constant 0.000000e+00 : f32
    %6 = vector.broadcast %cst_5 : f32 to vector<50x128xf32>
    %7 = arith.maximumf %5, %6 : vector<50x128xf32>
    %8 = arith.truncf %7 : vector<50x128xf32> to vector<50x128xbf16>
    %c0_6 = arith.constant 0 : index
    %c0_7 = arith.constant 0 : index
    %9 = vector.load %arg4[%c0_6, %c0_7] : memref<50x128xbf16, #tpu.memory_space<vmem>>, vector<50x128xbf16>
    tpu.vector_store %arg4[%c0_6, %c0_7], %8 {strides = array<i32>} : memref<50x128xbf16, #tpu.memory_space<vmem>>, vector<50x128xbf16>,
    return
  }
  func.func @transform_0(%arg0: i32) -> (i32, i32) {
    %c0_i32 = arith.constant 0 : i32
    %c0_i32_0 = arith.constant 0 : i32
    return %arg0, %c0_i32 : i32, i32
  }
  func.func @transform_1(%arg0: i32) -> (i32, i32) {
    %c0_i32 = arith.constant 0 : i32
    %c0_i32_0 = arith.constant 0 : i32
    %c0_i32_1 = arith.constant 0 : i32
    return %c0_i32, %c0_i32_0 : i32, i32
  }
  func.func @transform_2(%arg0: i32) -> (i32, i32) {
    %c0_i32 = arith.constant 0 : i32
    %c0_i32_0 = arith.constant 0 : i32
    %c0_i32_1 = arith.constant 0 : i32
    return %c0_i32, %c0_i32_0 : i32, i32
  }
  func.func @transform_3(%arg0: i32) -> (i32, i32) {
    %c0_i32 = arith.constant 0 : i32
    %c0_i32_0 = arith.constant 0 : i32
    return %arg0, %c0_i32 : i32, i32
  }
}

module attributes {stable_mosaic.version = 11 : i64} {
  func.func @_matmul_bias_relu_kernel(%arg0: i32, %arg1: memref<18x432xbf16, #tpu.memory_space<vmem>>, %arg2: memref<432x128xbf16, #tpu.memory_space<vmem>>, %arg3: memref<1x128xf32, #tpu.memory_space<vmem>>, %arg4: memref<18x128xbf16, #tpu.memory_space<vmem>>) attributes {dimension_semantics = [#tpu.dimension_semantics<parallel>], iteration_bounds = array<i64: 1>, scalar_prefetch = 0 : i64, scratch_operands = 0 : i64, tpu.core_type = #tpu.core_type<tc>, window_params = [{transform_indices = @transform_0, window_bounds = array<i64: 18, 432>}, {pipeline_mode = #tpu.pipeline_mode<synchronous>, transform_indices = @transform_1, window_bounds = array<i64: 432, 128>}, {pipeline_mode = #tpu.pipeline_mode<synchronous>, transform_indices = @transform_2, window_bounds = array<i64: 1, 128>}, {transform_indices = @transform_3, window_bounds = array<i64: 18, 128>}]} {
    %c0 = arith.constant 0 : index
    %c0_0 = arith.constant 0 : index
    %0 = vector.load %arg1[%c0, %c0_0] : memref<18x432xbf16, #tpu.memory_space<vmem>>, vector<18x432xbf16>
    %c0_1 = arith.constant 0 : index
    %c0_2 = arith.constant 0 : index
    %1 = vector.load %arg2[%c0_1, %c0_2] : memref<432x128xbf16, #tpu.memory_space<vmem>>, vector<432x128xbf16>
    %cst = arith.constant dense<0.000000e+00> : vector<18x128xf32>
    %2 = tpu.matmul %0, %1, %cst {dimension_numbers = #tpu.dot_dimension_numbers<[1], [0], [0], [1], [0, 0, 1, 1], [], []>} : vector<18x432xbf16>, vector<432x128xbf16>, vector<18x128xf32> -> vector<18x128xf32>
    %c0_3 = arith.constant 0 : index
    %c0_4 = arith.constant 0 : index
    %3 = vector.load %arg3[%c0_3, %c0_4] : memref<1x128xf32, #tpu.memory_space<vmem>>, vector<1x128xf32>
    %4 = vector.broadcast %3 : vector<1x128xf32> to vector<18x128xf32>
    %5 = arith.addf %2, %4 : vector<18x128xf32>
    %cst_5 = arith.constant 0.000000e+00 : f32
    %6 = vector.broadcast %cst_5 : f32 to vector<18x128xf32>
    %7 = arith.maximumf %5, %6 : vector<18x128xf32>
    %8 = arith.truncf %7 : vector<18x128xf32> to vector<18x128xbf16>
    %c0_6 = arith.constant 0 : index
    %c0_7 = arith.constant 0 : index
    %9 = vector.load %arg4[%c0_6, %c0_7] : memref<18x128xbf16, #tpu.memory_space<vmem>>, vector<18x128xbf16>
    tpu.vector_store %arg4[%c0_6, %c0_7], %8 {strides = array<i32>} : memref<18x128xbf16, #tpu.memory_space<vmem>>, vector<18x128xbf16>,
    return
  }
  func.func @transform_0(%arg0: i32) -> (i32, i32) {
    %c0_i32 = arith.constant 0 : i32
    %c0_i32_0 = arith.constant 0 : i32
    return %arg0, %c0_i32 : i32, i32
  }
  func.func @transform_1(%arg0: i32) -> (i32, i32) {
    %c0_i32 = arith.constant 0 : i32
    %c0_i32_0 = arith.constant 0 : i32
    %c0_i32_1 = arith.constant 0 : i32
    return %c0_i32, %c0_i32_0 : i32, i32
  }
  func.func @transform_2(%arg0: i32) -> (i32, i32) {
    %c0_i32 = arith.constant 0 : i32
    %c0_i32_0 = arith.constant 0 : i32
    %c0_i32_1 = arith.constant 0 : i32
    return %c0_i32, %c0_i32_0 : i32, i32
  }
  func.func @transform_3(%arg0: i32) -> (i32, i32) {
    %c0_i32 = arith.constant 0 : i32
    %c0_i32_0 = arith.constant 0 : i32
    return %arg0, %c0_i32 : i32, i32
  }
}

module attributes {stable_mosaic.version = 11 : i64} {
  func.func @_matmul_bias_relu_kernel(%arg0: i32, %arg1: memref<2x576xbf16, #tpu.memory_space<vmem>>, %arg2: memref<576x128xbf16, #tpu.memory_space<vmem>>, %arg3: memref<1x128xf32, #tpu.memory_space<vmem>>, %arg4: memref<2x128xbf16, #tpu.memory_space<vmem>>) attributes {dimension_semantics = [#tpu.dimension_semantics<parallel>], iteration_bounds = array<i64: 1>, scalar_prefetch = 0 : i64, scratch_operands = 0 : i64, tpu.core_type = #tpu.core_type<tc>, window_params = [{transform_indices = @transform_0, window_bounds = array<i64: 2, 576>}, {pipeline_mode = #tpu.pipeline_mode<synchronous>, transform_indices = @transform_1, window_bounds = array<i64: 576, 128>}, {pipeline_mode = #tpu.pipeline_mode<synchronous>, transform_indices = @transform_2, window_bounds = array<i64: 1, 128>}, {transform_indices = @transform_3, window_bounds = array<i64: 2, 128>}]} {
    %c0 = arith.constant 0 : index
    %c0_0 = arith.constant 0 : index
    %0 = vector.load %arg1[%c0, %c0_0] : memref<2x576xbf16, #tpu.memory_space<vmem>>, vector<2x576xbf16>
    %c0_1 = arith.constant 0 : index
    %c0_2 = arith.constant 0 : index
    %1 = vector.load %arg2[%c0_1, %c0_2] : memref<576x128xbf16, #tpu.memory_space<vmem>>, vector<576x128xbf16>
    %cst = arith.constant dense<0.000000e+00> : vector<2x128xf32>
    %2 = tpu.matmul %0, %1, %cst {dimension_numbers = #tpu.dot_dimension_numbers<[1], [0], [0], [1], [0, 0, 1, 1], [], []>} : vector<2x576xbf16>, vector<576x128xbf16>, vector<2x128xf32> -> vector<2x128xf32>
    %c0_3 = arith.constant 0 : index
    %c0_4 = arith.constant 0 : index
    %3 = vector.load %arg3[%c0_3, %c0_4] : memref<1x128xf32, #tpu.memory_space<vmem>>, vector<1x128xf32>
    %4 = vector.broadcast %3 : vector<1x128xf32> to vector<2x128xf32>
    %5 = arith.addf %2, %4 : vector<2x128xf32>
    %cst_5 = arith.constant 0.000000e+00 : f32
    %6 = vector.broadcast %cst_5 : f32 to vector<2x128xf32>
    %7 = arith.maximumf %5, %6 : vector<2x128xf32>
    %8 = arith.truncf %7 : vector<2x128xf32> to vector<2x128xbf16>
    %c0_6 = arith.constant 0 : index
    %c0_7 = arith.constant 0 : index
    %9 = vector.load %arg4[%c0_6, %c0_7] : memref<2x128xbf16, #tpu.memory_space<vmem>>, vector<2x128xbf16>
    tpu.vector_store %arg4[%c0_6, %c0_7], %8 {strides = array<i32>} : memref<2x128xbf16, #tpu.memory_space<vmem>>, vector<2x128xbf16>,
    return
  }
  func.func @transform_0(%arg0: i32) -> (i32, i32) {
    %c0_i32 = arith.constant 0 : i32
    %c0_i32_0 = arith.constant 0 : i32
    return %arg0, %c0_i32 : i32, i32
  }
  func.func @transform_1(%arg0: i32) -> (i32, i32) {
    %c0_i32 = arith.constant 0 : i32
    %c0_i32_0 = arith.constant 0 : i32
    %c0_i32_1 = arith.constant 0 : i32
    return %c0_i32, %c0_i32_0 : i32, i32
  }
  func.func @transform_2(%arg0: i32) -> (i32, i32) {
    %c0_i32 = arith.constant 0 : i32
    %c0_i32_0 = arith.constant 0 : i32
    %c0_i32_1 = arith.constant 0 : i32
    return %c0_i32, %c0_i32_0 : i32, i32
  }
  func.func @transform_3(%arg0: i32) -> (i32, i32) {
    %c0_i32 = arith.constant 0 : i32
    %c0_i32_0 = arith.constant 0 : i32
    return %arg0, %c0_i32 : i32, i32
  }
}

module attributes {stable_mosaic.version = 11 : i64} {
  func.func @_fc_stack_kernel(%arg0: memref<2x64xbf16, #tpu.memory_space<vmem>>, %arg1: memref<64x1164xbf16, #tpu.memory_space<vmem>>, %arg2: memref<1x1164xf32, #tpu.memory_space<vmem>>, %arg3: memref<1164x100xbf16, #tpu.memory_space<vmem>>, %arg4: memref<1x100xf32, #tpu.memory_space<vmem>>, %arg5: memref<100x50xbf16, #tpu.memory_space<vmem>>, %arg6: memref<1x50xf32, #tpu.memory_space<vmem>>, %arg7: memref<50x10xbf16, #tpu.memory_space<vmem>>, %arg8: memref<1x10xf32, #tpu.memory_space<vmem>>, %arg9: memref<10x1xbf16, #tpu.memory_space<vmem>>, %arg10: memref<1x1xf32, #tpu.memory_space<vmem>>, %arg11: memref<2x1xf32, #tpu.memory_space<vmem>>) attributes {dimension_semantics = [], scalar_prefetch = 0 : i64, scratch_operands = 0 : i64, tpu.core_type = #tpu.core_type<tc>} {
    %c0 = arith.constant 0 : index
    %c0_0 = arith.constant 0 : index
    %0 = vector.load %arg0[%c0, %c0_0] : memref<2x64xbf16, #tpu.memory_space<vmem>>, vector<2x64xbf16>
    %c0_1 = arith.constant 0 : index
    %c0_2 = arith.constant 0 : index
    %1 = vector.load %arg1[%c0_1, %c0_2] : memref<64x1164xbf16, #tpu.memory_space<vmem>>, vector<64x1164xbf16>
    %cst = arith.constant dense<0.000000e+00> : vector<2x1164xf32>
    %2 = tpu.matmul %0, %1, %cst {dimension_numbers = #tpu.dot_dimension_numbers<[1], [0], [0], [1], [0, 0, 1, 1], [], []>} : vector<2x64xbf16>, vector<64x1164xbf16>, vector<2x1164xf32> -> vector<2x1164xf32>
    %c0_3 = arith.constant 0 : index
    %c0_4 = arith.constant 0 : index
    %3 = vector.load %arg2[%c0_3, %c0_4] : memref<1x1164xf32, #tpu.memory_space<vmem>>, vector<1x1164xf32>
    %4 = vector.broadcast %3 : vector<1x1164xf32> to vector<2x1164xf32>
    %5 = arith.addf %2, %4 : vector<2x1164xf32>
    %cst_5 = arith.constant 0.000000e+00 : f32
    %6 = vector.broadcast %cst_5 : f32 to vector<2x1164xf32>
    %7 = arith.maximumf %5, %6 : vector<2x1164xf32>
    %8 = arith.truncf %7 : vector<2x1164xf32> to vector<2x1164xbf16>
    %c0_6 = arith.constant 0 : index
    %c0_7 = arith.constant 0 : index
    %9 = vector.load %arg3[%c0_6, %c0_7] : memref<1164x100xbf16, #tpu.memory_space<vmem>>, vector<1164x100xbf16>
    %cst_8 = arith.constant dense<0.000000e+00> : vector<2x100xf32>
    %10 = tpu.matmul %8, %9, %cst_8 {dimension_numbers = #tpu.dot_dimension_numbers<[1], [0], [0], [1], [0, 0, 1, 1], [], []>} : vector<2x1164xbf16>, vector<1164x100xbf16>, vector<2x100xf32> -> vector<2x100xf32>
    %c0_9 = arith.constant 0 : index
    %c0_10 = arith.constant 0 : index
    %11 = vector.load %arg4[%c0_9, %c0_10] : memref<1x100xf32, #tpu.memory_space<vmem>>, vector<1x100xf32>
    %12 = vector.broadcast %11 : vector<1x100xf32> to vector<2x100xf32>
    %13 = arith.addf %10, %12 : vector<2x100xf32>
    %cst_11 = arith.constant 0.000000e+00 : f32
    %14 = vector.broadcast %cst_11 : f32 to vector<2x100xf32>
    %15 = arith.maximumf %13, %14 : vector<2x100xf32>
    %16 = arith.truncf %15 : vector<2x100xf32> to vector<2x100xbf16>
    %c0_12 = arith.constant 0 : index
    %c0_13 = arith.constant 0 : index
    %17 = vector.load %arg5[%c0_12, %c0_13] : memref<100x50xbf16, #tpu.memory_space<vmem>>, vector<100x50xbf16>
    %cst_14 = arith.constant dense<0.000000e+00> : vector<2x50xf32>
    %18 = tpu.matmul %16, %17, %cst_14 {dimension_numbers = #tpu.dot_dimension_numbers<[1], [0], [0], [1], [0, 0, 1, 1], [], []>} : vector<2x100xbf16>, vector<100x50xbf16>, vector<2x50xf32> -> vector<2x50xf32>
    %c0_15 = arith.constant 0 : index
    %c0_16 = arith.constant 0 : index
    %19 = vector.load %arg6[%c0_15, %c0_16] : memref<1x50xf32, #tpu.memory_space<vmem>>, vector<1x50xf32>
    %20 = vector.broadcast %19 : vector<1x50xf32> to vector<2x50xf32>
    %21 = arith.addf %18, %20 : vector<2x50xf32>
    %cst_17 = arith.constant 0.000000e+00 : f32
    %22 = vector.broadcast %cst_17 : f32 to vector<2x50xf32>
    %23 = arith.maximumf %21, %22 : vector<2x50xf32>
    %24 = arith.truncf %23 : vector<2x50xf32> to vector<2x50xbf16>
    %c0_18 = arith.constant 0 : index
    %c0_19 = arith.constant 0 : index
    %25 = vector.load %arg7[%c0_18, %c0_19] : memref<50x10xbf16, #tpu.memory_space<vmem>>, vector<50x10xbf16>
    %cst_20 = arith.constant dense<0.000000e+00> : vector<2x10xf32>
    %26 = tpu.matmul %24, %25, %cst_20 {dimension_numbers = #tpu.dot_dimension_numbers<[1], [0], [0], [1], [0, 0, 1, 1], [], []>} : vector<2x50xbf16>, vector<50x10xbf16>, vector<2x10xf32> -> vector<2x10xf32>
    %c0_21 = arith.constant 0 : index
    %c0_22 = arith.constant 0 : index
    %27 = vector.load %arg8[%c0_21, %c0_22] : memref<1x10xf32, #tpu.memory_space<vmem>>, vector<1x10xf32>
    %28 = vector.broadcast %27 : vector<1x10xf32> to vector<2x10xf32>
    %29 = arith.addf %26, %28 : vector<2x10xf32>
    %cst_23 = arith.constant 0.000000e+00 : f32
    %30 = vector.broadcast %cst_23 : f32 to vector<2x10xf32>
    %31 = arith.maximumf %29, %30 : vector<2x10xf32>
    %32 = arith.truncf %31 : vector<2x10xf32> to vector<2x10xbf16>
    %c0_24 = arith.constant 0 : index
    %c0_25 = arith.constant 0 : index
    %33 = vector.load %arg9[%c0_24, %c0_25] : memref<10x1xbf16, #tpu.memory_space<vmem>>, vector<10x1xbf16>
    %cst_26 = arith.constant dense<0.000000e+00> : vector<2x1xf32>
    %34 = tpu.matmul %32, %33, %cst_26 {dimension_numbers = #tpu.dot_dimension_numbers<[1], [0], [0], [1], [0, 0, 1, 1], [], []>} : vector<2x10xbf16>, vector<10x1xbf16>, vector<2x1xf32> -> vector<2x1xf32>
    %c0_27 = arith.constant 0 : index
    %c0_28 = arith.constant 0 : index
    %35 = vector.load %arg10[%c0_27, %c0_28] : memref<1x1xf32, #tpu.memory_space<vmem>>, vector<1x1xf32>
    %36 = vector.broadcast %35 : vector<1x1xf32> to vector<2x1xf32>
    %37 = arith.addf %34, %36 : vector<2x1xf32>
    %c0_29 = arith.constant 0 : index
    %c0_30 = arith.constant 0 : index
    %38 = vector.load %arg11[%c0_29, %c0_30] : memref<2x1xf32, #tpu.memory_space<vmem>>, vector<2x1xf32>
    tpu.vector_store %arg11[%c0_29, %c0_30], %37 {strides = array<i32>} : memref<2x1xf32, #tpu.memory_space<vmem>>, vector<2x1xf32>,
    return
  }
}

</mosaic_0001>

<bundles_post_ra>
// kernel: cnn_driver_forward.6
= control target key start
LH: loop header
LB: loop body
LE: loop exit
PB: predicated region body
PF: predicated region fallthrough
CT: control target
= control target key end

     0   :  { %vm1266_vm0 = vcmask 1044480   ;;  %vm1267_vm1 = vcmask 1045504   ;;  %v4097_v2 = vmov 65535   ;;  %vm902_vm2 = vcmask 613376   ;;  %s5239_s1 = inlined_call_operand.vmem [shape: bf16[75,128], index: 1, kind: input, shape index: {}]   ;;  %s5240_s0 = inlined_call_operand.vmem [shape: bf16[1922,75], index: 0, kind: input, shape index: {}]   ;;  %s5241_s2 = inlined_call_operand.vmem [shape: f32[1,128], index: 2, kind: input, shape index: {}]   ;;  %s5242_s3 = inlined_call_operand.vmem [shape: bf16[1922,128], index: 3, kind: output, shape index: {}]  }
   0x1   :  { %v3111_v0 = vld [vmem:[%s5239_s1 + $0x20] sm:$0xf]  ;;  %v3358_v1 = vld [vmem:[%s5239_s1 + $0x20] sm:$0x30]  ;;  %v1268_v3 = vsel %vm1266_vm0, 4294967295, %v4097_v2  ;;  %v3357_v7 = vld [vmem:[%s5239_s1 + $0x18] sm:$0xff] }
   0x2   :  { %v3112_v4 = vor.u32 %v3358_v1, %v3111_v0  ;;  %v1269_v5 = vsel %vm1267_vm1, %v1268_v3, 0  ;;  %v3356_v8 = vld [vmem:[%s5239_s1 + $0x10] sm:$0xff]  ;;  %v3355_v9 = vld [vmem:[%s5239_s1 + $0x8] sm:$0xff]  ;;  %v3354_v10 = vld [vmem:[%s5239_s1] sm:$0xff] }
   0x3   :  { %v3294_v11 = vld [vmem:[%s5240_s0 + $0x1e0] sm:$0xff]  ;;  %v3264_v13 = vld [vmem:[%s5240_s0 + $0xf0] sm:$0xff]  ;;  %v3325_v14 = vld [vmem:[%s5240_s0 + $0x2d8] sm:$0xff] }
   0x4   :  { %v1271_v6 = vand.u32 %v3112_v4, %v1269_v5  ;;  %v3234_v12 = vld [vmem:[%s5240_s0] sm:$0xff]  ;;  %v3295_v15 = vld [vmem:[%s5240_s0 + $0x1e8] sm:$0xff]  ;;  %v3265_v17 = vld [vmem:[%s5240_s0 + $0xf8] sm:$0xff] }
   0x5   :  { %v3235_v16 = vld [vmem:[%s5240_s0 + $0x8] sm:$0xff]  ;;  %v3326_v18 = vld [vmem:[%s5240_s0 + $0x2e0] sm:$0xff]  ;;  %v3296_v19 = vld [vmem:[%s5240_s0 + $0x1f0] sm:$0xff] }
   0x6   :  { %4079 = vmatpush.bf16.msra.mxu2 %v1271_v6  ;;  %1276 = vmatpush.bf16.msra.mxu0 %v1271_v6  ;;  %v3236_v20 = vld [vmem:[%s5240_s0 + $0x10] sm:$0xff]  ;;  %v3266_v21 = vld [vmem:[%s5240_s0 + $0x100] sm:$0xff]  ;;  %v3327_v22 = vld [vmem:[%s5240_s0 + $0x2e8] sm:$0xff] }
   0x7   :  { %4078 = vmatpush.bf16.msra.mxu1 %v1271_v6  ;;  %4080 = vmatpush.bf16.msra.mxu3 %v1271_v6  ;;  %v3297_v23 = vld [vmem:[%s5240_s0 + $0x1f8] sm:$0xff]  ;;  %v3267_v25 = vld [vmem:[%s5240_s0 + $0x108] sm:$0xff]  ;;  %v3328_v26 = vld [vmem:[%s5240_s0 + $0x2f0] sm:$0xff] }
   0x8   :  { %v3237_v24 = vld [vmem:[%s5240_s0 + $0x18] sm:$0xff]  ;;  %v3298_v27 = vld [vmem:[%s5240_s0 + $0x200] sm:$0xff]  ;;  %v3268_v29 = vld [vmem:[%s5240_s0 + $0x110] sm:$0xff] }
   0x9   :  { %v3238_v28 = vld [vmem:[%s5240_s0 + $0x20] sm:$0xff]  ;;  %v3329_v30 = vld [vmem:[%s5240_s0 + $0x2f8] sm:$0xff]  ;;  %v3299_v31 = vld [vmem:[%s5240_s0 + $0x208] sm:$0xff] }
   0xa   :  { %4082 = vmatpush.bf16.msra.mxu2 %v3357_v7  ;;  %1277 = vmatpush.bf16.msra.mxu0 %v3357_v7  ;;  %v3239_v32 = vld [vmem:[%s5240_s0 + $0x28] sm:$0xff]  ;;  %v3269_v33 = vld [vmem:[%s5240_s0 + $0x118] sm:$0xff]  ;;  %v3330_v34 = vld [vmem:[%s5240_s0 + $0x300] sm:$0xff] }
   0xb   :  { %4081 = vmatpush.bf16.msra.mxu1 %v3357_v7  ;;  %4083 = vmatpush.bf16.msra.mxu3 %v3357_v7  ;;  %v3300_v35 = vld [vmem:[%s5240_s0 + $0x210] sm:$0xff]  ;;  %v3270_v37 = vld [vmem:[%s5240_s0 + $0x120] sm:$0xff]  ;;  %v3331_v38 = vld [vmem:[%s5240_s0 + $0x308] sm:$0xff] }
   0xc   :  { %v3240_v36 = vld [vmem:[%s5240_s0 + $0x30] sm:$0xff]  ;;  %v3301_v39 = vld [vmem:[%s5240_s0 + $0x218] sm:$0xff]  ;;  %v3271_v41 = vld [vmem:[%s5240_s0 + $0x128] sm:$0xff] }
   0xd   :  { %v3241_v40 = vld [vmem:[%s5240_s0 + $0x38] sm:$0xff]  ;;  %v3332_v42 = vld [vmem:[%s5240_s0 + $0x310] sm:$0xff]  ;;  %v3302_v43 = vld [vmem:[%s5240_s0 + $0x220] sm:$0xff] }
   0xe   :  { %4085 = vmatpush.bf16.msra.mxu2 %v3356_v8  ;;  %1278 = vmatpush.bf16.msra.mxu0 %v3356_v8  ;;  %v3242_v44 = vld [vmem:[%s5240_s0 + $0x40] sm:$0xff]  ;;  %v3272_v46 = vld [vmem:[%s5240_s0 + $0x130] sm:$0xff]  ;;  %v3333_v47 = vld [vmem:[%s5240_s0 + $0x318] sm:$0xff] }
   0xf   :  { %4084 = vmatpush.bf16.msra.mxu1 %v3356_v8  ;;  %4086 = vmatpush.bf16.msra.mxu3 %v3356_v8  ;;  %v4280_v49 = vld [vmem:[%s5241_s2] ss:$0 sm:$0xff]  ;;  %v3303_v4 = vld [vmem:[%s5240_s0 + $0x228] sm:$0xff] }
  0x10   :  { %v3243_v6 = vld [vmem:[%s5240_s0 + $0x48] sm:$0xff] }
  0x12   :  { %4088 = vmatpush.bf16.msra.mxu2 %v3355_v9  ;;  %1279 = vmatpush.bf16.msra.mxu0 %v3355_v9 }
  0x13   :  { %4087 = vmatpush.bf16.msra.mxu1 %v3355_v9  ;;  %4089 = vmatpush.bf16.msra.mxu3 %v3355_v9 }
  0x16   :  { %4091 = vmatpush.bf16.msra.mxu2 %v3354_v10  ;;  %1280 = vmatpush.bf16.msra.mxu0 %v3354_v10 }
  0x17   :  { %4090 = vmatpush.bf16.msra.mxu1 %v3354_v10  ;;  %4092 = vmatpush.bf16.msra.mxu3 %v3354_v10  ;;  %v3273_v10 = vld [vmem:[%s5240_s0 + $0x138] sm:$0xff] }
  0x19   :  { %3173 = vmatmul.msk.bf16.vlgmr.msra.gmra.mxu2 %vm902_vm2, %v3294_v11  ;;  %3113 = vmatmul.msk.bf16.vlgmr.msra.gmra.mxu0 %vm902_vm2, %v3234_v12  ;;  %v3334_v11 = vld [vmem:[%s5240_s0 + $0x320] sm:$0xff] }
  0x1a   :  { %3143 = vmatmul.msk.bf16.vlgmr.msra.gmra.mxu1 %vm902_vm2, %v3264_v13  ;;  %3204 = vmatmul.msk.bf16.vlgmr.msra.gmra.mxu3 %vm902_vm2, %v3325_v14 }
  0x29   :  { %3174 = vmatmul.msk.bf16.gmra.mxu2 %vm902_vm2, %v3295_v15  ;;  %3114 = vmatmul.msk.bf16.gmra.mxu0 %vm902_vm2, %v3235_v16 }
  0x2a   :  { %3144 = vmatmul.msk.bf16.gmra.mxu1 %vm902_vm2, %v3265_v17  ;;  %3205 = vmatmul.msk.bf16.gmra.mxu3 %vm902_vm2, %v3326_v18 }
  0x39   :  { %3175 = vmatmul.msk.bf16.gmra.mxu2 %vm902_vm2, %v3296_v19  ;;  %3115 = vmatmul.msk.bf16.gmra.mxu0 %vm902_vm2, %v3236_v20 }
  0x3a   :  { %3145 = vmatmul.msk.bf16.gmra.mxu1 %vm902_vm2, %v3266_v21  ;;  %3206 = vmatmul.msk.bf16.gmra.mxu3 %vm902_vm2, %v3327_v22 }
  0x49   :  { %3176 = vmatmul.msk.bf16.gmra.mxu2 %vm902_vm2, %v3297_v23  ;;  %3116 = vmatmul.msk.bf16.gmra.mxu0 %vm902_vm2, %v3237_v24 }
  0x4a   :  { %3146 = vmatmul.msk.bf16.gmra.mxu1 %vm902_vm2, %v3267_v25  ;;  %3207 = vmatmul.msk.bf16.gmra.mxu3 %vm902_vm2, %v3328_v26 }
  0x59   :  { %3177 = vmatmul.msk.bf16.gmra.mxu2 %vm902_vm2, %v3298_v27  ;;  %3117 = vmatmul.msk.bf16.gmra.mxu0 %vm902_vm2, %v3238_v28 }
  0x5a   :  { %3147 = vmatmul.msk.bf16.gmra.mxu1 %vm902_vm2, %v3268_v29  ;;  %3208 = vmatmul.msk.bf16.gmra.mxu3 %vm902_vm2, %v3329_v30 }
  0x69   :  { %3178 = vmatmul.msk.bf16.gmra.mxu2 %vm902_vm2, %v3299_v31  ;;  %3118 = vmatmul.msk.bf16.gmra.mxu0 %vm902_vm2, %v3239_v32 }
  0x6a   :  { %3148 = vmatmul.msk.bf16.gmra.mxu1 %vm902_vm2, %v3269_v33  ;;  %3209 = vmatmul.msk.bf16.gmra.mxu3 %vm902_vm2, %v3330_v34 }
  0x79   :  { %3179 = vmatmul.msk.bf16.gmra.mxu2 %vm902_vm2, %v3300_v35  ;;  %3119 = vmatmul.msk.bf16.gmra.mxu0 %vm902_vm2, %v3240_v36  ;;  %v3304_v36 = vld [vmem:[%s5240_s0 + $0x230] sm:$0xff] }
  0x7a   :  { %3149 = vmatmul.msk.bf16.gmra.mxu1 %vm902_vm2, %v3270_v37  ;;  %3210 = vmatmul.msk.bf16.gmra.mxu3 %vm902_vm2, %v3331_v38  ;;  %v3244_v38 = vld [vmem:[%s5240_s0 + $0x50] sm:$0xff] }
  0x89   :  { %3180 = vmatmul.msk.bf16.gmra.mxu2 %vm902_vm2, %v3301_v39  ;;  %3120 = vmatmul.msk.bf16.gmra.mxu0 %vm902_vm2, %v3241_v40 }
  0x8a   :  { %3150 = vmatmul.msk.bf16.gmra.mxu1 %vm902_vm2, %v3271_v41  ;;  %3211 = vmatmul.msk.bf16.gmra.mxu3 %vm902_vm2, %v3332_v42  ;;  %v3274_v42 = vld [vmem:[%s5240_s0 + $0x140] sm:$0xff] }
  0x96   :  { %v1282_v45 = vpop.f32.mrf.mxu0 }
  0x97   :  { %v1432_v48 = vpop.f32.mrf.mxu1  ;;  %v1283_v50 = vadd.f32 %v4280_v49, %v1282_v45 }
  0x98   :  { %v1433_v52 = vadd.f32 %v4280_v49, %v1432_v48 }
  0x99   :  { %3181 = vmatmul.msk.bf16.gmra.mxu2 %vm902_vm2, %v3302_v43  ;;  %3121 = vmatmul.msk.bf16.gmra.mxu0 %vm902_vm2, %v3242_v44  ;;  %v1886_v55 = vmax.f32 %v1283_v50, 0.0  ;;  %v3335_v43 = vld [vmem:[%s5240_s0 + $0x328] sm:$0xff] }
  0x9a   :  { %3151 = vmatmul.msk.bf16.gmra.mxu1 %vm902_vm2, %v3272_v46  ;;  %3212 = vmatmul.msk.bf16.gmra.mxu3 %vm902_vm2, %v3333_v47  ;;  %v1946_v58 = vmax.f32 %v1433_v52, 0.0 }
  0x9c   :  { %v1582_v51 = vpop.f32.mrf.mxu2 }
  0x9d   :  { %v1737_v53 = vpop.f32.mrf.mxu3  ;;  %v1583_v63 = vadd.f32 %v4280_v49, %v1582_v51 }
  0x9e   :  { %v1284_v54 = vpop.f32.mrf.mxu0  ;;  %v1738_v61 = vadd.f32 %v4280_v49, %v1737_v53 }
  0x9f   :  { %v1285_v56 = vadd.f32 %v4280_v49, %v1284_v54  ;;  %v1434_v57 = vpop.f32.mrf.mxu1  ;;  %v2006_v12 = vmax.f32 %v1583_v63, 0.0 }
  0xa0   :  { %v1435_v59 = vadd.f32 %v4280_v49, %v1434_v57  ;;  %v2068_v7 = vmax.f32 %v1738_v61, 0.0 }
  0xa1   :  { %v1887_v60 = vmax.f32 %v1285_v56, 0.0 }
  0xa2   :  { %v1947_v62 = vmax.f32 %v1435_v59, 0.0 }
  0xa3   :  { %v3362_v0 = vpack.c.bf16 %v1887_v60, %v1886_v55 }
  0xa4   :  { %v1584_v1 = vpop.f32.mrf.mxu2  ;;  %v3512_v2 = vpack.c.bf16 %v1947_v62, %v1946_v58 }
  0xa5   :  { %v1585_v3 = vadd.f32 %v4280_v49, %v1584_v1  ;;  %3363 = vst [vmem:[%s5242_s3] sm:$0xff] %v3362_v0   ;;  %v1739_v5 = vpop.f32.mrf.mxu3 }
  0xa6   :  { %3988 = vst [vmem:[%s5242_s3 + $0xf0] sm:$0xff] %v3512_v2   ;;  %v1740_v8 = vadd.f32 %v4280_v49, %v1739_v5  ;;  %v1287_v9 = vpop.f32.mrf.mxu0  ;;  %v3305_v5 = vld [vmem:[%s5240_s0 + $0x238] sm:$0xff] }
  0xa7   :  { %v2007_v13 = vmax.f32 %v1585_v3, 0.0  ;;  %v1437_v14 = vpop.f32.mrf.mxu1  ;;  %v1288_v18 = vadd.f32 %v4280_v49, %v1287_v9 }
  0xa8   :  { %v2069_v15 = vmax.f32 %v1740_v8, 0.0  ;;  %v1438_v20 = vadd.f32 %v4280_v49, %v1437_v14 }
  0xa9   :  { %v3662_v16 = vpack.c.bf16 %v2007_v13, %v2006_v12  ;;  %3182 = vmatmul.msk.bf16.gmra.mxu2 %vm902_vm2, %v3303_v4  ;;  %3122 = vmatmul.msk.bf16.gmra.mxu0 %vm902_vm2, %v3243_v6  ;;  %v1888_v23 = vmax.f32 %v1288_v18, 0.0  ;;  %v3336_v12 = vld [vmem:[%s5240_s0 + $0x330] sm:$0xff] }
  0xaa   :  { %v3817_v17 = vpack.c.bf16 %v2069_v15, %v2068_v7  ;;  %3152 = vmatmul.msk.bf16.gmra.mxu1 %vm902_vm2, %v3273_v10  ;;  %3213 = vmatmul.msk.bf16.gmra.mxu3 %vm902_vm2, %v3334_v11  ;;  %v1948_v26 = vmax.f32 %v1438_v20, 0.0  ;;  %v3245_v7 = vld [vmem:[%s5240_s0 + $0x58] sm:$0xff]  ;;  %v3275_v11 = vld [vmem:[%s5240_s0 + $0x148] sm:$0xff] }
  0xab   :  { %4018 = vst [vmem:[%s5242_s3 + $0x1e0] sm:$0xff] %v3662_v16  }
  0xac   :  { %v1587_v19 = vpop.f32.mrf.mxu2  ;;  %4049 = vst [vmem:[%s5242_s3 + $0x2d8] sm:$0xff] %v3817_v17  }
  0xad   :  { %v1742_v21 = vpop.f32.mrf.mxu3  ;;  %v1588_v31 = vadd.f32 %v4280_v49, %v1587_v19 }
  0xae   :  { %v1289_v22 = vpop.f32.mrf.mxu0  ;;  %v1743_v29 = vadd.f32 %v4280_v49, %v1742_v21 }
  0xaf   :  { %v1290_v24 = vadd.f32 %v4280_v49, %v1289_v22  ;;  %v1439_v25 = vpop.f32.mrf.mxu1  ;;  %v2008_v44 = vmax.f32 %v1588_v31, 0.0 }
  0xb0   :  { %v1440_v27 = vadd.f32 %v4280_v49, %v1439_v25  ;;  %v2070_v39 = vmax.f32 %v1743_v29, 0.0 }
  0xb1   :  { %v1889_v28 = vmax.f32 %v1290_v24, 0.0 }
  0xb2   :  { %v1949_v30 = vmax.f32 %v1440_v27, 0.0 }
  0xb3   :  { %v3367_v32 = vpack.c.bf16 %v1889_v28, %v1888_v23 }
  0xb4   :  { %v1589_v33 = vpop.f32.mrf.mxu2  ;;  %v3517_v34 = vpack.c.bf16 %v1949_v30, %v1948_v26 }
  0xb5   :  { %v1590_v35 = vadd.f32 %v4280_v49, %v1589_v33  ;;  %3959 = vst [vmem:[%s5242_s3 + $0x8] sm:$0xff] %v3367_v32   ;;  %v1744_v37 = vpop.f32.mrf.mxu3 }
  0xb6   :  { %3989 = vst [vmem:[%s5242_s3 + $0xf8] sm:$0xff] %v3517_v34   ;;  %v1745_v40 = vadd.f32 %v4280_v49, %v1744_v37  ;;  %v1292_v41 = vpop.f32.mrf.mxu0  ;;  %v3306_v37 = vld [vmem:[%s5240_s0 + $0x240] sm:$0xff] }
  0xb7   :  { %v2009_v45 = vmax.f32 %v1590_v35, 0.0  ;;  %v1442_v46 = vpop.f32.mrf.mxu1  ;;  %v1293_v51 = vadd.f32 %v4280_v49, %v1292_v41 }
  0xb8   :  { %v2071_v47 = vmax.f32 %v1745_v40, 0.0  ;;  %v1443_v53 = vadd.f32 %v4280_v49, %v1442_v46 }
  0xb9   :  { %v3667_v48 = vpack.c.bf16 %v2009_v45, %v2008_v44  ;;  %3183 = vmatmul.msk.bf16.gmra.mxu2 %vm902_vm2, %v3304_v36  ;;  %3123 = vmatmul.msk.bf16.gmra.mxu0 %vm902_vm2, %v3244_v38  ;;  %v1890_v56 = vmax.f32 %v1293_v51, 0.0  ;;  %v3337_v44 = vld [vmem:[%s5240_s0 + $0x338] sm:$0xff] }
  0xba   :  { %v3822_v50 = vpack.c.bf16 %v2071_v47, %v2070_v39  ;;  %3153 = vmatmul.msk.bf16.gmra.mxu1 %vm902_vm2, %v3274_v42  ;;  %3214 = vmatmul.msk.bf16.gmra.mxu3 %vm902_vm2, %v3335_v43  ;;  %v1950_v59 = vmax.f32 %v1443_v53, 0.0  ;;  %v3246_v39 = vld [vmem:[%s5240_s0 + $0x60] sm:$0xff]  ;;  %v3276_v43 = vld [vmem:[%s5240_s0 + $0x150] sm:$0xff] }
  0xbb   :  { %4019 = vst [vmem:[%s5242_s3 + $0x1e8] sm:$0xff] %v3667_v48  }
  0xbc   :  { %v1592_v52 = vpop.f32.mrf.mxu2  ;;  %4050 = vst [vmem:[%s5242_s3 + $0x2e0] sm:$0xff] %v3822_v50  }
  0xbd   :  { %v1747_v54 = vpop.f32.mrf.mxu3  ;;  %v1593_v0 = vadd.f32 %v4280_v49, %v1592_v52 }
  0xbe   :  { %v1294_v55 = vpop.f32.mrf.mxu0  ;;  %v1748_v62 = vadd.f32 %v4280_v49, %v1747_v54 }
  0xbf   :  { %v1295_v57 = vadd.f32 %v4280_v49, %v1294_v55  ;;  %v1444_v58 = vpop.f32.mrf.mxu1  ;;  %v2010_v13 = vmax.f32 %v1593_v0, 0.0 }
  0xc0   :  { %v1445_v60 = vadd.f32 %v4280_v49, %v1444_v58  ;;  %v2072_v8 = vmax.f32 %v1748_v62, 0.0 }
  0xc1   :  { %v1891_v61 = vmax.f32 %v1295_v57, 0.0 }
  0xc2   :  { %v1951_v63 = vmax.f32 %v1445_v60, 0.0 }
  0xc3   :  { %v3372_v1 = vpack.c.bf16 %v1891_v61, %v1890_v56 }
  0xc4   :  { %v1594_v2 = vpop.f32.mrf.mxu2  ;;  %v3522_v3 = vpack.c.bf16 %v1951_v63, %v1950_v59 }
  0xc5   :  { %v1595_v4 = vadd.f32 %v4280_v49, %v1594_v2  ;;  %3960 = vst [vmem:[%s5242_s3 + $0x10] sm:$0xff] %v3372_v1   ;;  %v1749_v6 = vpop.f32.mrf.mxu3 }
  0xc6   :  { %3990 = vst [vmem:[%s5242_s3 + $0x100] sm:$0xff] %v3522_v3   ;;  %v1750_v9 = vadd.f32 %v4280_v49, %v1749_v6  ;;  %v1297_v10 = vpop.f32.mrf.mxu0  ;;  %v3307_v6 = vld [vmem:[%s5240_s0 + $0x248] sm:$0xff] }
  0xc7   :  { %v2011_v14 = vmax.f32 %v1595_v4, 0.0  ;;  %v1447_v15 = vpop.f32.mrf.mxu1  ;;  %v1298_v19 = vadd.f32 %v4280_v49, %v1297_v10 }
  0xc8   :  { %v2073_v16 = vmax.f32 %v1750_v9, 0.0  ;;  %v1448_v21 = vadd.f32 %v4280_v49, %v1447_v15 }
  0xc9   :  { %v3672_v17 = vpack.c.bf16 %v2011_v14, %v2010_v13  ;;  %3184 = vmatmul.msk.bf16.gmra.mxu2 %vm902_vm2, %v3305_v5  ;;  %3124 = vmatmul.msk.bf16.gmra.mxu0 %vm902_vm2, %v3245_v7  ;;  %v1892_v24 = vmax.f32 %v1298_v19, 0.0  ;;  %v3338_v13 = vld [vmem:[%s5240_s0 + $0x340] sm:$0xff] }
  0xca   :  { %v3827_v18 = vpack.c.bf16 %v2073_v16, %v2072_v8  ;;  %3154 = vmatmul.msk.bf16.gmra.mxu1 %vm902_vm2, %v3275_v11  ;;  %3215 = vmatmul.msk.bf16.gmra.mxu3 %vm902_vm2, %v3336_v12  ;;  %v1952_v27 = vmax.f32 %v1448_v21, 0.0  ;;  %v3247_v8 = vld [vmem:[%s5240_s0 + $0x68] sm:$0xff]  ;;  %v3277_v12 = vld [vmem:[%s5240_s0 + $0x158] sm:$0xff] }
  0xcb   :  { %4020 = vst [vmem:[%s5242_s3 + $0x1f0] sm:$0xff] %v3672_v17  }
  0xcc   :  { %v1597_v20 = vpop.f32.mrf.mxu2  ;;  %4051 = vst [vmem:[%s5242_s3 + $0x2e8] sm:$0xff] %v3827_v18  }
  0xcd   :  { %v1752_v22 = vpop.f32.mrf.mxu3  ;;  %v1598_v32 = vadd.f32 %v4280_v49, %v1597_v20 }
  0xce   :  { %v1299_v23 = vpop.f32.mrf.mxu0  ;;  %v1753_v30 = vadd.f32 %v4280_v49, %v1752_v22 }
  0xcf   :  { %v1300_v25 = vadd.f32 %v4280_v49, %v1299_v23  ;;  %v1449_v26 = vpop.f32.mrf.mxu1  ;;  %v2012_v45 = vmax.f32 %v1598_v32, 0.0 }
  0xd0   :  { %v1450_v28 = vadd.f32 %v4280_v49, %v1449_v26  ;;  %v2074_v40 = vmax.f32 %v1753_v30, 0.0 }
  0xd1   :  { %v1893_v29 = vmax.f32 %v1300_v25, 0.0 }
  0xd2   :  { %v1953_v31 = vmax.f32 %v1450_v28, 0.0 }
  0xd3   :  { %v3377_v33 = vpack.c.bf16 %v1893_v29, %v1892_v24 }
  0xd4   :  { %v1599_v34 = vpop.f32.mrf.mxu2  ;;  %v3527_v35 = vpack.c.bf16 %v1953_v31, %v1952_v27 }
  0xd5   :  { %v1600_v36 = vadd.f32 %v4280_v49, %v1599_v34  ;;  %3961 = vst [vmem:[%s5242_s3 + $0x18] sm:$0xff] %v3377_v33   ;;  %v1754_v38 = vpop.f32.mrf.mxu3 }
  0xd6   :  { %3991 = vst [vmem:[%s5242_s3 + $0x108] sm:$0xff] %v3527_v35   ;;  %v1755_v41 = vadd.f32 %v4280_v49, %v1754_v38  ;;  %v1302_v42 = vpop.f32.mrf.mxu0  ;;  %v3308_v38 = vld [vmem:[%s5240_s0 + $0x250] sm:$0xff] }
  0xd7   :  { %v2013_v46 = vmax.f32 %v1600_v36, 0.0  ;;  %v1452_v47 = vpop.f32.mrf.mxu1  ;;  %v1303_v52 = vadd.f32 %v4280_v49, %v1302_v42 }
  0xd8   :  { %v2075_v48 = vmax.f32 %v1755_v41, 0.0  ;;  %v1453_v54 = vadd.f32 %v4280_v49, %v1452_v47 }
  0xd9   :  { %v3677_v50 = vpack.c.bf16 %v2013_v46, %v2012_v45  ;;  %3185 = vmatmul.msk.bf16.gmra.mxu2 %vm902_vm2, %v3306_v37  ;;  %3125 = vmatmul.msk.bf16.gmra.mxu0 %vm902_vm2, %v3246_v39  ;;  %v1894_v57 = vmax.f32 %v1303_v52, 0.0  ;;  %v3339_v45 = vld [vmem:[%s5240_s0 + $0x348] sm:$0xff] }
  0xda   :  { %v3832_v51 = vpack.c.bf16 %v2075_v48, %v2074_v40  ;;  %3155 = vmatmul.msk.bf16.gmra.mxu1 %vm902_vm2, %v3276_v43  ;;  %3216 = vmatmul.msk.bf16.gmra.mxu3 %vm902_vm2, %v3337_v44  ;;  %v1954_v60 = vmax.f32 %v1453_v54, 0.0  ;;  %v3248_v40 = vld [vmem:[%s5240_s0 + $0x70] sm:$0xff]  ;;  %v3278_v44 = vld [vmem:[%s5240_s0 + $0x160] sm:$0xff] }
  0xdb   :  { %4021 = vst [vmem:[%s5242_s3 + $0x1f8] sm:$0xff] %v3677_v50  }
  0xdc   :  { %v1602_v53 = vpop.f32.mrf.mxu2  ;;  %4052 = vst [vmem:[%s5242_s3 + $0x2f0] sm:$0xff] %v3832_v51  }
  0xdd   :  { %v1757_v55 = vpop.f32.mrf.mxu3  ;;  %v1603_v1 = vadd.f32 %v4280_v49, %v1602_v53 }
  0xde   :  { %v1304_v56 = vpop.f32.mrf.mxu0  ;;  %v1758_v63 = vadd.f32 %v4280_v49, %v1757_v55 }
  0xdf   :  { %v1305_v58 = vadd.f32 %v4280_v49, %v1304_v56  ;;  %v1454_v59 = vpop.f32.mrf.mxu1  ;;  %v2014_v14 = vmax.f32 %v1603_v1, 0.0 }
  0xe0   :  { %v1455_v61 = vadd.f32 %v4280_v49, %v1454_v59  ;;  %v2076_v9 = vmax.f32 %v1758_v63, 0.0 }
  0xe1   :  { %v1895_v62 = vmax.f32 %v1305_v58, 0.0 }
  0xe2   :  { %v1955_v0 = vmax.f32 %v1455_v61, 0.0 }
  0xe3   :  { %v3382_v2 = vpack.c.bf16 %v1895_v62, %v1894_v57 }
  0xe4   :  { %v1604_v3 = vpop.f32.mrf.mxu2  ;;  %v3532_v4 = vpack.c.bf16 %v1955_v0, %v1954_v60 }
  0xe5   :  { %v1605_v5 = vadd.f32 %v4280_v49, %v1604_v3  ;;  %3962 = vst [vmem:[%s5242_s3 + $0x20] sm:$0xff] %v3382_v2   ;;  %v1759_v7 = vpop.f32.mrf.mxu3 }
  0xe6   :  { %3992 = vst [vmem:[%s5242_s3 + $0x110] sm:$0xff] %v3532_v4   ;;  %v1760_v10 = vadd.f32 %v4280_v49, %v1759_v7  ;;  %v1307_v11 = vpop.f32.mrf.mxu0  ;;  %v3309_v7 = vld [vmem:[%s5240_s0 + $0x258] sm:$0xff] }
  0xe7   :  { %v2015_v15 = vmax.f32 %v1605_v5, 0.0  ;;  %v1457_v16 = vpop.f32.mrf.mxu1  ;;  %v1308_v20 = vadd.f32 %v4280_v49, %v1307_v11 }
  0xe8   :  { %v2077_v17 = vmax.f32 %v1760_v10, 0.0  ;;  %v1458_v22 = vadd.f32 %v4280_v49, %v1457_v16 }
  0xe9   :  { %v3682_v18 = vpack.c.bf16 %v2015_v15, %v2014_v14  ;;  %3186 = vmatmul.msk.bf16.gmra.mxu2 %vm902_vm2, %v3307_v6  ;;  %3126 = vmatmul.msk.bf16.gmra.mxu0 %vm902_vm2, %v3247_v8  ;;  %v1896_v25 = vmax.f32 %v1308_v20, 0.0  ;;  %v3340_v14 = vld [vmem:[%s5240_s0 + $0x350] sm:$0xff] }
  0xea   :  { %v3837_v19 = vpack.c.bf16 %v2077_v17, %v2076_v9  ;;  %3156 = vmatmul.msk.bf16.gmra.mxu1 %vm902_vm2, %v3277_v12  ;;  %3217 = vmatmul.msk.bf16.gmra.mxu3 %vm902_vm2, %v3338_v13  ;;  %v1956_v28 = vmax.f32 %v1458_v22, 0.0  ;;  %v3249_v9 = vld [vmem:[%s5240_s0 + $0x78] sm:$0xff]  ;;  %v3279_v13 = vld [vmem:[%s5240_s0 + $0x168] sm:$0xff] }
  0xeb   :  { %4022 = vst [vmem:[%s5242_s3 + $0x200] sm:$0xff] %v3682_v18  }
  0xec   :  { %v1607_v21 = vpop.f32.mrf.mxu2  ;;  %4053 = vst [vmem:[%s5242_s3 + $0x2f8] sm:$0xff] %v3837_v19  }
  0xed   :  { %v1762_v23 = vpop.f32.mrf.mxu3  ;;  %v1608_v33 = vadd.f32 %v4280_v49, %v1607_v21 }
  0xee   :  { %v1309_v24 = vpop.f32.mrf.mxu0  ;;  %v1763_v31 = vadd.f32 %v4280_v49, %v1762_v23 }
  0xef   :  { %v1310_v26 = vadd.f32 %v4280_v49, %v1309_v24  ;;  %v1459_v27 = vpop.f32.mrf.mxu1  ;;  %v2016_v46 = vmax.f32 %v1608_v33, 0.0 }
  0xf0   :  { %v1460_v29 = vadd.f32 %v4280_v49, %v1459_v27  ;;  %v2078_v41 = vmax.f32 %v1763_v31, 0.0 }
  0xf1   :  { %v1897_v30 = vmax.f32 %v1310_v26, 0.0 }
  0xf2   :  { %v1957_v32 = vmax.f32 %v1460_v29, 0.0 }
  0xf3   :  { %v3387_v34 = vpack.c.bf16 %v1897_v30, %v1896_v25 }
  0xf4   :  { %v1609_v35 = vpop.f32.mrf.mxu2  ;;  %v3537_v36 = vpack.c.bf16 %v1957_v32, %v1956_v28 }
  0xf5   :  { %v1610_v37 = vadd.f32 %v4280_v49, %v1609_v35  ;;  %3963 = vst [vmem:[%s5242_s3 + $0x28] sm:$0xff] %v3387_v34   ;;  %v1764_v39 = vpop.f32.mrf.mxu3 }
  0xf6   :  { %3993 = vst [vmem:[%s5242_s3 + $0x118] sm:$0xff] %v3537_v36   ;;  %v1765_v42 = vadd.f32 %v4280_v49, %v1764_v39  ;;  %v1312_v43 = vpop.f32.mrf.mxu0  ;;  %v3310_v39 = vld [vmem:[%s5240_s0 + $0x260] sm:$0xff] }
  0xf7   :  { %v2017_v47 = vmax.f32 %v1610_v37, 0.0  ;;  %v1462_v48 = vpop.f32.mrf.mxu1  ;;  %v1313_v53 = vadd.f32 %v4280_v49, %v1312_v43 }
  0xf8   :  { %v2079_v50 = vmax.f32 %v1765_v42, 0.0  ;;  %v1463_v55 = vadd.f32 %v4280_v49, %v1462_v48 }
  0xf9   :  { %v3687_v51 = vpack.c.bf16 %v2017_v47, %v2016_v46  ;;  %3187 = vmatmul.msk.bf16.gmra.mxu2 %vm902_vm2, %v3308_v38  ;;  %3127 = vmatmul.msk.bf16.gmra.mxu0 %vm902_vm2, %v3248_v40  ;;  %v1898_v58 = vmax.f32 %v1313_v53, 0.0  ;;  %v3341_v46 = vld [vmem:[%s5240_s0 + $0x358] sm:$0xff] }
  0xfa   :  { %v3842_v52 = vpack.c.bf16 %v2079_v50, %v2078_v41  ;;  %3157 = vmatmul.msk.bf16.gmra.mxu1 %vm902_vm2, %v3278_v44  ;;  %3218 = vmatmul.msk.bf16.gmra.mxu3 %vm902_vm2, %v3339_v45  ;;  %v1958_v61 = vmax.f32 %v1463_v55, 0.0  ;;  %v3250_v41 = vld [vmem:[%s5240_s0 + $0x80] sm:$0xff]  ;;  %v3280_v45 = vld [vmem:[%s5240_s0 + $0x170] sm:$0xff] }
  0xfb   :  { %4023 = vst [vmem:[%s5242_s3 + $0x208] sm:$0xff] %v3687_v51  }
  0xfc   :  { %v1612_v54 = vpop.f32.mrf.mxu2  ;;  %4054 = vst [vmem:[%s5242_s3 + $0x300] sm:$0xff] %v3842_v52  }
  0xfd   :  { %v1767_v56 = vpop.f32.mrf.mxu3  ;;  %v1613_v2 = vadd.f32 %v4280_v49, %v1612_v54 }
  0xfe   :  { %v1314_v57 = vpop.f32.mrf.mxu0  ;;  %v1768_v0 = vadd.f32 %v4280_v49, %v1767_v56 }
  0xff   :  { %v1315_v59 = vadd.f32 %v4280_v49, %v1314_v57  ;;  %v1464_v60 = vpop.f32.mrf.mxu1  ;;  %v2018_v15 = vmax.f32 %v1613_v2, 0.0 }
 0x100   :  { %v1465_v62 = vadd.f32 %v4280_v49, %v1464_v60  ;;  %v2080_v10 = vmax.f32 %v1768_v0, 0.0 }
 0x101   :  { %v1899_v63 = vmax.f32 %v1315_v59, 0.0 }
 0x102   :  { %v1959_v1 = vmax.f32 %v1465_v62, 0.0 }
 0x103   :  { %v3392_v3 = vpack.c.bf16 %v1899_v63, %v1898_v58 }
 0x104   :  { %v1614_v4 = vpop.f32.mrf.mxu2  ;;  %v3542_v5 = vpack.c.bf16 %v1959_v1, %v1958_v61 }
 0x105   :  { %v1615_v6 = vadd.f32 %v4280_v49, %v1614_v4  ;;  %3964 = vst [vmem:[%s5242_s3 + $0x30] sm:$0xff] %v3392_v3   ;;  %v1769_v8 = vpop.f32.mrf.mxu3 }
 0x106   :  { %3994 = vst [vmem:[%s5242_s3 + $0x120] sm:$0xff] %v3542_v5   ;;  %v1770_v11 = vadd.f32 %v4280_v49, %v1769_v8  ;;  %v1317_v12 = vpop.f32.mrf.mxu0  ;;  %v3311_v8 = vld [vmem:[%s5240_s0 + $0x268] sm:$0xff] }
 0x107   :  { %v2019_v16 = vmax.f32 %v1615_v6, 0.0  ;;  %v1467_v17 = vpop.f32.mrf.mxu1  ;;  %v1318_v21 = vadd.f32 %v4280_v49, %v1317_v12 }
 0x108   :  { %v2081_v18 = vmax.f32 %v1770_v11, 0.0  ;;  %v1468_v23 = vadd.f32 %v4280_v49, %v1467_v17 }
 0x109   :  { %v3692_v19 = vpack.c.bf16 %v2019_v16, %v2018_v15  ;;  %3188 = vmatmul.msk.bf16.gmra.mxu2 %vm902_vm2, %v3309_v7  ;;  %3128 = vmatmul.msk.bf16.gmra.mxu0 %vm902_vm2, %v3249_v9  ;;  %v1900_v26 = vmax.f32 %v1318_v21, 0.0  ;;  %v3342_v15 = vld [vmem:[%s5240_s0 + $0x360] sm:$0xff] }
 0x10a   :  { %v3847_v20 = vpack.c.bf16 %v2081_v18, %v2080_v10  ;;  %3158 = vmatmul.msk.bf16.gmra.mxu1 %vm902_vm2, %v3279_v13  ;;  %3219 = vmatmul.msk.bf16.gmra.mxu3 %vm902_vm2, %v3340_v14  ;;  %v1960_v29 = vmax.f32 %v1468_v23, 0.0  ;;  %v3251_v10 = vld [vmem:[%s5240_s0 + $0x88] sm:$0xff]  ;;  %v3281_v14 = vld [vmem:[%s5240_s0 + $0x178] sm:$0xff] }
 0x10b   :  { %4024 = vst [vmem:[%s5242_s3 + $0x210] sm:$0xff] %v3692_v19  }
 0x10c   :  { %v1617_v22 = vpop.f32.mrf.mxu2  ;;  %4055 = vst [vmem:[%s5242_s3 + $0x308] sm:$0xff] %v3847_v20  }
 0x10d   :  { %v1772_v24 = vpop.f32.mrf.mxu3  ;;  %v1618_v34 = vadd.f32 %v4280_v49, %v1617_v22 }
 0x10e   :  { %v1319_v25 = vpop.f32.mrf.mxu0  ;;  %v1773_v32 = vadd.f32 %v4280_v49, %v1772_v24 }
 0x10f   :  { %v1320_v27 = vadd.f32 %v4280_v49, %v1319_v25  ;;  %v1469_v28 = vpop.f32.mrf.mxu1  ;;  %v2020_v47 = vmax.f32 %v1618_v34, 0.0 }
 0x110   :  { %v1470_v30 = vadd.f32 %v4280_v49, %v1469_v28  ;;  %v2082_v42 = vmax.f32 %v1773_v32, 0.0 }
 0x111   :  { %v1901_v31 = vmax.f32 %v1320_v27, 0.0 }
 0x112   :  { %v1961_v33 = vmax.f32 %v1470_v30, 0.0 }
 0x113   :  { %v3397_v35 = vpack.c.bf16 %v1901_v31, %v1900_v26 }
 0x114   :  { %v1619_v36 = vpop.f32.mrf.mxu2  ;;  %v3547_v37 = vpack.c.bf16 %v1961_v33, %v1960_v29 }
 0x115   :  { %v1620_v38 = vadd.f32 %v4280_v49, %v1619_v36  ;;  %3965 = vst [vmem:[%s5242_s3 + $0x38] sm:$0xff] %v3397_v35   ;;  %v1774_v40 = vpop.f32.mrf.mxu3 }
 0x116   :  { %3995 = vst [vmem:[%s5242_s3 + $0x128] sm:$0xff] %v3547_v37   ;;  %v1775_v43 = vadd.f32 %v4280_v49, %v1774_v40  ;;  %v1322_v44 = vpop.f32.mrf.mxu0  ;;  %v3312_v40 = vld [vmem:[%s5240_s0 + $0x270] sm:$0xff] }
 0x117   :  { %v2021_v48 = vmax.f32 %v1620_v38, 0.0  ;;  %v1472_v50 = vpop.f32.mrf.mxu1  ;;  %v1323_v54 = vadd.f32 %v4280_v49, %v1322_v44 }
 0x118   :  { %v2083_v51 = vmax.f32 %v1775_v43, 0.0  ;;  %v1473_v56 = vadd.f32 %v4280_v49, %v1472_v50 }
 0x119   :  { %v3697_v52 = vpack.c.bf16 %v2021_v48, %v2020_v47  ;;  %3189 = vmatmul.msk.bf16.gmra.mxu2 %vm902_vm2, %v3310_v39  ;;  %3129 = vmatmul.msk.bf16.gmra.mxu0 %vm902_vm2, %v3250_v41  ;;  %v1902_v59 = vmax.f32 %v1323_v54, 0.0  ;;  %v3343_v47 = vld [vmem:[%s5240_s0 + $0x368] sm:$0xff] }
 0x11a   :  { %v3852_v53 = vpack.c.bf16 %v2083_v51, %v2082_v42  ;;  %3159 = vmatmul.msk.bf16.gmra.mxu1 %vm902_vm2, %v3280_v45  ;;  %3220 = vmatmul.msk.bf16.gmra.mxu3 %vm902_vm2, %v3341_v46  ;;  %v1962_v62 = vmax.f32 %v1473_v56, 0.0  ;;  %v3252_v42 = vld [vmem:[%s5240_s0 + $0x90] sm:$0xff]  ;;  %v3282_v46 = vld [vmem:[%s5240_s0 + $0x180] sm:$0xff] }
 0x11b   :  { %4025 = vst [vmem:[%s5242_s3 + $0x218] sm:$0xff] %v3697_v52  }
 0x11c   :  { %v1622_v55 = vpop.f32.mrf.mxu2  ;;  %4056 = vst [vmem:[%s5242_s3 + $0x310] sm:$0xff] %v3852_v53  }
 0x11d   :  { %v1777_v57 = vpop.f32.mrf.mxu3  ;;  %v1623_v3 = vadd.f32 %v4280_v49, %v1622_v55 }
 0x11e   :  { %v1324_v58 = vpop.f32.mrf.mxu0  ;;  %v1778_v1 = vadd.f32 %v4280_v49, %v1777_v57 }
 0x11f   :  { %v1325_v60 = vadd.f32 %v4280_v49, %v1324_v58  ;;  %v1474_v61 = vpop.f32.mrf.mxu1  ;;  %v2022_v16 = vmax.f32 %v1623_v3, 0.0 }
 0x120   :  { %v1475_v63 = vadd.f32 %v4280_v49, %v1474_v61  ;;  %v2084_v11 = vmax.f32 %v1778_v1, 0.0 }
 0x121   :  { %v1903_v0 = vmax.f32 %v1325_v60, 0.0 }
 0x122   :  { %v1963_v2 = vmax.f32 %v1475_v63, 0.0 }
 0x123   :  { %v3402_v4 = vpack.c.bf16 %v1903_v0, %v1902_v59 }
 0x124   :  { %v1624_v5 = vpop.f32.mrf.mxu2  ;;  %v3552_v6 = vpack.c.bf16 %v1963_v2, %v1962_v62 }
 0x125   :  { %v1625_v7 = vadd.f32 %v4280_v49, %v1624_v5  ;;  %3966 = vst [vmem:[%s5242_s3 + $0x40] sm:$0xff] %v3402_v4   ;;  %v1779_v9 = vpop.f32.mrf.mxu3 }
 0x126   :  { %3996 = vst [vmem:[%s5242_s3 + $0x130] sm:$0xff] %v3552_v6   ;;  %v1780_v12 = vadd.f32 %v4280_v49, %v1779_v9  ;;  %v1327_v13 = vpop.f32.mrf.mxu0  ;;  %v3313_v9 = vld [vmem:[%s5240_s0 + $0x278] sm:$0xff] }
 0x127   :  { %v2023_v17 = vmax.f32 %v1625_v7, 0.0  ;;  %v1477_v18 = vpop.f32.mrf.mxu1  ;;  %v1328_v22 = vadd.f32 %v4280_v49, %v1327_v13 }
 0x128   :  { %v2085_v19 = vmax.f32 %v1780_v12, 0.0  ;;  %v1478_v24 = vadd.f32 %v4280_v49, %v1477_v18 }
 0x129   :  { %v3702_v20 = vpack.c.bf16 %v2023_v17, %v2022_v16  ;;  %3190 = vmatmul.msk.bf16.gmra.mxu2 %vm902_vm2, %v3311_v8  ;;  %3130 = vmatmul.msk.bf16.gmra.mxu0 %vm902_vm2, %v3251_v10  ;;  %v1904_v27 = vmax.f32 %v1328_v22, 0.0  ;;  %v3344_v16 = vld [vmem:[%s5240_s0 + $0x370] sm:$0xff] }
 0x12a   :  { %v3857_v21 = vpack.c.bf16 %v2085_v19, %v2084_v11  ;;  %3160 = vmatmul.msk.bf16.gmra.mxu1 %vm902_vm2, %v3281_v14  ;;  %3221 = vmatmul.msk.bf16.gmra.mxu3 %vm902_vm2, %v3342_v15  ;;  %v1964_v30 = vmax.f32 %v1478_v24, 0.0  ;;  %v3253_v11 = vld [vmem:[%s5240_s0 + $0x98] sm:$0xff]  ;;  %v3283_v15 = vld [vmem:[%s5240_s0 + $0x188] sm:$0xff] }
 0x12b   :  { %4026 = vst [vmem:[%s5242_s3 + $0x220] sm:$0xff] %v3702_v20  }
 0x12c   :  { %v1627_v23 = vpop.f32.mrf.mxu2  ;;  %4057 = vst [vmem:[%s5242_s3 + $0x318] sm:$0xff] %v3857_v21  }
 0x12d   :  { %v1782_v25 = vpop.f32.mrf.mxu3  ;;  %v1628_v35 = vadd.f32 %v4280_v49, %v1627_v23 }
 0x12e   :  { %v1329_v26 = vpop.f32.mrf.mxu0  ;;  %v1783_v33 = vadd.f32 %v4280_v49, %v1782_v25 }
 0x12f   :  { %v1330_v28 = vadd.f32 %v4280_v49, %v1329_v26  ;;  %v1479_v29 = vpop.f32.mrf.mxu1  ;;  %v2024_v48 = vmax.f32 %v1628_v35, 0.0 }
 0x130   :  { %v1480_v31 = vadd.f32 %v4280_v49, %v1479_v29  ;;  %v2086_v43 = vmax.f32 %v1783_v33, 0.0 }
 0x131   :  { %v1905_v32 = vmax.f32 %v1330_v28, 0.0 }
 0x132   :  { %v1965_v34 = vmax.f32 %v1480_v31, 0.0 }
 0x133   :  { %v3407_v36 = vpack.c.bf16 %v1905_v32, %v1904_v27 }
 0x134   :  { %v1629_v37 = vpop.f32.mrf.mxu2  ;;  %v3557_v38 = vpack.c.bf16 %v1965_v34, %v1964_v30 }
 0x135   :  { %v1630_v39 = vadd.f32 %v4280_v49, %v1629_v37  ;;  %3967 = vst [vmem:[%s5242_s3 + $0x48] sm:$0xff] %v3407_v36   ;;  %v1784_v41 = vpop.f32.mrf.mxu3 }
 0x136   :  { %3997 = vst [vmem:[%s5242_s3 + $0x138] sm:$0xff] %v3557_v38   ;;  %v1785_v44 = vadd.f32 %v4280_v49, %v1784_v41  ;;  %v1332_v45 = vpop.f32.mrf.mxu0  ;;  %v3314_v41 = vld [vmem:[%s5240_s0 + $0x280] sm:$0xff] }
 0x137   :  { %v2025_v50 = vmax.f32 %v1630_v39, 0.0  ;;  %v1482_v51 = vpop.f32.mrf.mxu1  ;;  %v1333_v55 = vadd.f32 %v4280_v49, %v1332_v45 }
 0x138   :  { %v2087_v52 = vmax.f32 %v1785_v44, 0.0  ;;  %v1483_v57 = vadd.f32 %v4280_v49, %v1482_v51 }
 0x139   :  { %v3707_v53 = vpack.c.bf16 %v2025_v50, %v2024_v48  ;;  %3191 = vmatmul.msk.bf16.gmra.mxu2 %vm902_vm2, %v3312_v40  ;;  %3131 = vmatmul.msk.bf16.gmra.mxu0 %vm902_vm2, %v3252_v42  ;;  %v1906_v60 = vmax.f32 %v1333_v55, 0.0  ;;  %v3345_v48 = vld [vmem:[%s5240_s0 + $0x378] sm:$0xff] }
 0x13a   :  { %v3862_v54 = vpack.c.bf16 %v2087_v52, %v2086_v43  ;;  %3161 = vmatmul.msk.bf16.gmra.mxu1 %vm902_vm2, %v3282_v46  ;;  %3222 = vmatmul.msk.bf16.gmra.mxu3 %vm902_vm2, %v3343_v47  ;;  %v1966_v63 = vmax.f32 %v1483_v57, 0.0  ;;  %v3254_v43 = vld [vmem:[%s5240_s0 + $0xa0] sm:$0xff]  ;;  %v3284_v47 = vld [vmem:[%s5240_s0 + $0x190] sm:$0xff] }
 0x13b   :  { %4027 = vst [vmem:[%s5242_s3 + $0x228] sm:$0xff] %v3707_v53  }
 0x13c   :  { %v1632_v56 = vpop.f32.mrf.mxu2  ;;  %4058 = vst [vmem:[%s5242_s3 + $0x320] sm:$0xff] %v3862_v54  }
 0x13d   :  { %v1787_v58 = vpop.f32.mrf.mxu3  ;;  %v1633_v4 = vadd.f32 %v4280_v49, %v1632_v56 }
 0x13e   :  { %v1334_v59 = vpop.f32.mrf.mxu0  ;;  %v1788_v2 = vadd.f32 %v4280_v49, %v1787_v58 }
 0x13f   :  { %v1335_v61 = vadd.f32 %v4280_v49, %v1334_v59  ;;  %v1484_v62 = vpop.f32.mrf.mxu1  ;;  %v2026_v17 = vmax.f32 %v1633_v4, 0.0 }
 0x140   :  { %v1485_v0 = vadd.f32 %v4280_v49, %v1484_v62  ;;  %v2088_v12 = vmax.f32 %v1788_v2, 0.0 }
 0x141   :  { %v1907_v1 = vmax.f32 %v1335_v61, 0.0 }
 0x142   :  { %v1967_v3 = vmax.f32 %v1485_v0, 0.0 }
 0x143   :  { %v3412_v5 = vpack.c.bf16 %v1907_v1, %v1906_v60 }
 0x144   :  { %v1634_v6 = vpop.f32.mrf.mxu2  ;;  %v3562_v7 = vpack.c.bf16 %v1967_v3, %v1966_v63 }
 0x145   :  { %v1635_v8 = vadd.f32 %v4280_v49, %v1634_v6  ;;  %3968 = vst [vmem:[%s5242_s3 + $0x50] sm:$0xff] %v3412_v5   ;;  %v1789_v10 = vpop.f32.mrf.mxu3 }
 0x146   :  { %3998 = vst [vmem:[%s5242_s3 + $0x140] sm:$0xff] %v3562_v7   ;;  %v1790_v13 = vadd.f32 %v4280_v49, %v1789_v10  ;;  %v1337_v14 = vpop.f32.mrf.mxu0  ;;  %v3315_v10 = vld [vmem:[%s5240_s0 + $0x288] sm:$0xff] }
 0x147   :  { %v2027_v18 = vmax.f32 %v1635_v8, 0.0  ;;  %v1487_v19 = vpop.f32.mrf.mxu1  ;;  %v1338_v23 = vadd.f32 %v4280_v49, %v1337_v14 }
 0x148   :  { %v2089_v20 = vmax.f32 %v1790_v13, 0.0  ;;  %v1488_v25 = vadd.f32 %v4280_v49, %v1487_v19 }
 0x149   :  { %v3712_v21 = vpack.c.bf16 %v2027_v18, %v2026_v17  ;;  %3192 = vmatmul.msk.bf16.gmra.mxu2 %vm902_vm2, %v3313_v9  ;;  %3132 = vmatmul.msk.bf16.gmra.mxu0 %vm902_vm2, %v3253_v11  ;;  %v1908_v28 = vmax.f32 %v1338_v23, 0.0  ;;  %v3346_v17 = vld [vmem:[%s5240_s0 + $0x380] sm:$0xff] }
 0x14a   :  { %v3867_v22 = vpack.c.bf16 %v2089_v20, %v2088_v12  ;;  %3162 = vmatmul.msk.bf16.gmra.mxu1 %vm902_vm2, %v3283_v15  ;;  %3223 = vmatmul.msk.bf16.gmra.mxu3 %vm902_vm2, %v3344_v16  ;;  %v1968_v31 = vmax.f32 %v1488_v25, 0.0  ;;  %v3255_v12 = vld [vmem:[%s5240_s0 + $0xa8] sm:$0xff]  ;;  %v3285_v16 = vld [vmem:[%s5240_s0 + $0x198] sm:$0xff] }
 0x14b   :  { %4028 = vst [vmem:[%s5242_s3 + $0x230] sm:$0xff] %v3712_v21  }
 0x14c   :  { %v1637_v24 = vpop.f32.mrf.mxu2  ;;  %4059 = vst [vmem:[%s5242_s3 + $0x328] sm:$0xff] %v3867_v22  }
 0x14d   :  { %v1792_v26 = vpop.f32.mrf.mxu3  ;;  %v1638_v36 = vadd.f32 %v4280_v49, %v1637_v24 }
 0x14e   :  { %v1339_v27 = vpop.f32.mrf.mxu0  ;;  %v1793_v34 = vadd.f32 %v4280_v49, %v1792_v26 }
 0x14f   :  { %v1340_v29 = vadd.f32 %v4280_v49, %v1339_v27  ;;  %v1489_v30 = vpop.f32.mrf.mxu1  ;;  %v2028_v50 = vmax.f32 %v1638_v36, 0.0 }
 0x150   :  { %v1490_v32 = vadd.f32 %v4280_v49, %v1489_v30  ;;  %v2090_v44 = vmax.f32 %v1793_v34, 0.0 }
 0x151   :  { %v1909_v33 = vmax.f32 %v1340_v29, 0.0 }
 0x152   :  { %v1969_v35 = vmax.f32 %v1490_v32, 0.0 }
 0x153   :  { %v3417_v37 = vpack.c.bf16 %v1909_v33, %v1908_v28 }
 0x154   :  { %v1639_v38 = vpop.f32.mrf.mxu2  ;;  %v3567_v39 = vpack.c.bf16 %v1969_v35, %v1968_v31 }
 0x155   :  { %v1640_v40 = vadd.f32 %v4280_v49, %v1639_v38  ;;  %3969 = vst [vmem:[%s5242_s3 + $0x58] sm:$0xff] %v3417_v37   ;;  %v1794_v42 = vpop.f32.mrf.mxu3 }
 0x156   :  { %3999 = vst [vmem:[%s5242_s3 + $0x148] sm:$0xff] %v3567_v39   ;;  %v1795_v45 = vadd.f32 %v4280_v49, %v1794_v42  ;;  %v1342_v46 = vpop.f32.mrf.mxu0  ;;  %v3316_v42 = vld [vmem:[%s5240_s0 + $0x290] sm:$0xff] }
 0x157   :  { %v2029_v51 = vmax.f32 %v1640_v40, 0.0  ;;  %v1492_v52 = vpop.f32.mrf.mxu1  ;;  %v1343_v56 = vadd.f32 %v4280_v49, %v1342_v46 }
 0x158   :  { %v2091_v53 = vmax.f32 %v1795_v45, 0.0  ;;  %v1493_v58 = vadd.f32 %v4280_v49, %v1492_v52 }
 0x159   :  { %v3717_v54 = vpack.c.bf16 %v2029_v51, %v2028_v50  ;;  %3193 = vmatmul.msk.bf16.gmra.mxu2 %vm902_vm2, %v3314_v41  ;;  %3133 = vmatmul.msk.bf16.gmra.mxu0 %vm902_vm2, %v3254_v43  ;;  %v1910_v61 = vmax.f32 %v1343_v56, 0.0  ;;  %v3347_v50 = vld [vmem:[%s5240_s0 + $0x388] sm:$0xff] }
 0x15a   :  { %v3872_v55 = vpack.c.bf16 %v2091_v53, %v2090_v44  ;;  %3163 = vmatmul.msk.bf16.gmra.mxu1 %vm902_vm2, %v3284_v47  ;;  %3224 = vmatmul.msk.bf16.gmra.mxu3 %vm902_vm2, %v3345_v48  ;;  %v1970_v0 = vmax.f32 %v1493_v58, 0.0  ;;  %v3256_v44 = vld [vmem:[%s5240_s0 + $0xb0] sm:$0xff]  ;;  %v3286_v48 = vld [vmem:[%s5240_s0 + $0x1a0] sm:$0xff] }
 0x15b   :  { %4029 = vst [vmem:[%s5242_s3 + $0x238] sm:$0xff] %v3717_v54  }
 0x15c   :  { %v1642_v57 = vpop.f32.mrf.mxu2  ;;  %4060 = vst [vmem:[%s5242_s3 + $0x330] sm:$0xff] %v3872_v55  }
 0x15d   :  { %v1797_v59 = vpop.f32.mrf.mxu3  ;;  %v1643_v5 = vadd.f32 %v4280_v49, %v1642_v57 }
 0x15e   :  { %v1344_v60 = vpop.f32.mrf.mxu0  ;;  %v1798_v3 = vadd.f32 %v4280_v49, %v1797_v59 }
 0x15f   :  { %v1345_v62 = vadd.f32 %v4280_v49, %v1344_v60  ;;  %v1494_v63 = vpop.f32.mrf.mxu1  ;;  %v2030_v18 = vmax.f32 %v1643_v5, 0.0 }
 0x160   :  { %v1495_v1 = vadd.f32 %v4280_v49, %v1494_v63  ;;  %v2092_v13 = vmax.f32 %v1798_v3, 0.0 }
 0x161   :  { %v1911_v2 = vmax.f32 %v1345_v62, 0.0 }
 0x162   :  { %v1971_v4 = vmax.f32 %v1495_v1, 0.0 }
 0x163   :  { %v3422_v6 = vpack.c.bf16 %v1911_v2, %v1910_v61 }
 0x164   :  { %v1644_v7 = vpop.f32.mrf.mxu2  ;;  %v3572_v8 = vpack.c.bf16 %v1971_v4, %v1970_v0 }
 0x165   :  { %v1645_v9 = vadd.f32 %v4280_v49, %v1644_v7  ;;  %3970 = vst [vmem:[%s5242_s3 + $0x60] sm:$0xff] %v3422_v6   ;;  %v1799_v11 = vpop.f32.mrf.mxu3 }
 0x166   :  { %4000 = vst [vmem:[%s5242_s3 + $0x150] sm:$0xff] %v3572_v8   ;;  %v1800_v14 = vadd.f32 %v4280_v49, %v1799_v11  ;;  %v1347_v15 = vpop.f32.mrf.mxu0  ;;  %v4753_v49 = vld [vmem:[%s5241_s2] ss:$0 sm:$0xff]  ;;  %v3317_v11 = vld [vmem:[%s5240_s0 + $0x298] sm:$0xff] }
 0x167   :  { %v2031_v19 = vmax.f32 %v1645_v9, 0.0  ;;  %v1497_v20 = vpop.f32.mrf.mxu1  ;;  %v1348_v24 = vadd.f32 %v4753_v49, %v1347_v15 }
 0x168   :  { %v2093_v21 = vmax.f32 %v1800_v14, 0.0  ;;  %v1498_v26 = vadd.f32 %v4753_v49, %v1497_v20 }
 0x169   :  { %v3722_v22 = vpack.c.bf16 %v2031_v19, %v2030_v18  ;;  %3194 = vmatmul.msk.bf16.gmra.mxu2 %vm902_vm2, %v3315_v10  ;;  %3134 = vmatmul.msk.bf16.gmra.mxu0 %vm902_vm2, %v3255_v12  ;;  %v1912_v29 = vmax.f32 %v1348_v24, 0.0  ;;  %v3348_v18 = vld [vmem:[%s5240_s0 + $0x390] sm:$0xff] }
 0x16a   :  { %v3877_v23 = vpack.c.bf16 %v2093_v21, %v2092_v13  ;;  %3164 = vmatmul.msk.bf16.gmra.mxu1 %vm902_vm2, %v3285_v16  ;;  %3225 = vmatmul.msk.bf16.gmra.mxu3 %vm902_vm2, %v3346_v17  ;;  %v1972_v32 = vmax.f32 %v1498_v26, 0.0  ;;  %v3257_v13 = vld [vmem:[%s5240_s0 + $0xb8] sm:$0xff]  ;;  %v3287_v17 = vld [vmem:[%s5240_s0 + $0x1a8] sm:$0xff] }
 0x16b   :  { %4030 = vst [vmem:[%s5242_s3 + $0x240] sm:$0xff] %v3722_v22  }
 0x16c   :  { %v1647_v25 = vpop.f32.mrf.mxu2  ;;  %4061 = vst [vmem:[%s5242_s3 + $0x338] sm:$0xff] %v3877_v23  }
 0x16d   :  { %v1802_v27 = vpop.f32.mrf.mxu3  ;;  %v1648_v37 = vadd.f32 %v4753_v49, %v1647_v25 }
 0x16e   :  { %v1349_v28 = vpop.f32.mrf.mxu0  ;;  %v1803_v35 = vadd.f32 %v4753_v49, %v1802_v27 }
 0x16f   :  { %v1350_v30 = vadd.f32 %v4753_v49, %v1349_v28  ;;  %v1499_v31 = vpop.f32.mrf.mxu1  ;;  %v2032_v51 = vmax.f32 %v1648_v37, 0.0 }
 0x170   :  { %v1500_v33 = vadd.f32 %v4753_v49, %v1499_v31  ;;  %v2094_v45 = vmax.f32 %v1803_v35, 0.0 }
 0x171   :  { %v1913_v34 = vmax.f32 %v1350_v30, 0.0 }
 0x172   :  { %v1973_v36 = vmax.f32 %v1500_v33, 0.0 }
 0x173   :  { %v3427_v38 = vpack.c.bf16 %v1913_v34, %v1912_v29 }
 0x174   :  { %v1649_v39 = vpop.f32.mrf.mxu2  ;;  %v3577_v40 = vpack.c.bf16 %v1973_v36, %v1972_v32 }
 0x175   :  { %v1650_v41 = vadd.f32 %v4753_v49, %v1649_v39  ;;  %3971 = vst [vmem:[%s5242_s3 + $0x68] sm:$0xff] %v3427_v38   ;;  %v1804_v43 = vpop.f32.mrf.mxu3 }
 0x176   :  { %4001 = vst [vmem:[%s5242_s3 + $0x158] sm:$0xff] %v3577_v40   ;;  %v1805_v46 = vadd.f32 %v4753_v49, %v1804_v43  ;;  %v1352_v47 = vpop.f32.mrf.mxu0  ;;  %v3318_v43 = vld [vmem:[%s5240_s0 + $0x2a0] sm:$0xff] }
 0x177   :  { %v2033_v52 = vmax.f32 %v1650_v41, 0.0  ;;  %v1502_v53 = vpop.f32.mrf.mxu1  ;;  %v1353_v57 = vadd.f32 %v4753_v49, %v1352_v47 }
 0x178   :  { %v2095_v54 = vmax.f32 %v1805_v46, 0.0  ;;  %v1503_v59 = vadd.f32 %v4753_v49, %v1502_v53 }
 0x179   :  { %v3727_v55 = vpack.c.bf16 %v2033_v52, %v2032_v51  ;;  %3195 = vmatmul.msk.bf16.gmra.mxu2 %vm902_vm2, %v3316_v42  ;;  %3135 = vmatmul.msk.bf16.gmra.mxu0 %vm902_vm2, %v3256_v44  ;;  %v1914_v62 = vmax.f32 %v1353_v57, 0.0  ;;  %v3349_v51 = vld [vmem:[%s5240_s0 + $0x398] sm:$0xff] }
 0x17a   :  { %v3882_v56 = vpack.c.bf16 %v2095_v54, %v2094_v45  ;;  %3165 = vmatmul.msk.bf16.gmra.mxu1 %vm902_vm2, %v3286_v48  ;;  %3226 = vmatmul.msk.bf16.gmra.mxu3 %vm902_vm2, %v3347_v50  ;;  %v1974_v1 = vmax.f32 %v1503_v59, 0.0  ;;  %v3258_v45 = vld [vmem:[%s5240_s0 + $0xc0] sm:$0xff]  ;;  %v3288_v50 = vld [vmem:[%s5240_s0 + $0x1b0] sm:$0xff] }
 0x17b   :  { %4031 = vst [vmem:[%s5242_s3 + $0x248] sm:$0xff] %v3727_v55  }
 0x17c   :  { %v1652_v58 = vpop.f32.mrf.mxu2  ;;  %4062 = vst [vmem:[%s5242_s3 + $0x340] sm:$0xff] %v3882_v56  }
 0x17d   :  { %v1807_v60 = vpop.f32.mrf.mxu3  ;;  %v1653_v6 = vadd.f32 %v4753_v49, %v1652_v58 }
 0x17e   :  { %v1354_v61 = vpop.f32.mrf.mxu0  ;;  %v1808_v4 = vadd.f32 %v4753_v49, %v1807_v60 }
 0x17f   :  { %v1355_v63 = vadd.f32 %v4753_v49, %v1354_v61  ;;  %v1504_v0 = vpop.f32.mrf.mxu1  ;;  %v2034_v19 = vmax.f32 %v1653_v6, 0.0 }
 0x180   :  { %v1505_v2 = vadd.f32 %v4753_v49, %v1504_v0  ;;  %v2096_v14 = vmax.f32 %v1808_v4, 0.0 }
 0x181   :  { %v1915_v3 = vmax.f32 %v1355_v63, 0.0 }
 0x182   :  { %v1975_v5 = vmax.f32 %v1505_v2, 0.0 }
 0x183   :  { %v3432_v7 = vpack.c.bf16 %v1915_v3, %v1914_v62 }
 0x184   :  { %v1654_v8 = vpop.f32.mrf.mxu2  ;;  %v3582_v9 = vpack.c.bf16 %v1975_v5, %v1974_v1 }
 0x185   :  { %v1655_v10 = vadd.f32 %v4753_v49, %v1654_v8  ;;  %3972 = vst [vmem:[%s5242_s3 + $0x70] sm:$0xff] %v3432_v7   ;;  %v1809_v12 = vpop.f32.mrf.mxu3 }
 0x186   :  { %4002 = vst [vmem:[%s5242_s3 + $0x160] sm:$0xff] %v3582_v9   ;;  %v1810_v15 = vadd.f32 %v4753_v49, %v1809_v12  ;;  %v1357_v16 = vpop.f32.mrf.mxu0  ;;  %v3319_v12 = vld [vmem:[%s5240_s0 + $0x2a8] sm:$0xff] }
 0x187   :  { %v2035_v20 = vmax.f32 %v1655_v10, 0.0  ;;  %v1507_v21 = vpop.f32.mrf.mxu1  ;;  %v1358_v25 = vadd.f32 %v4753_v49, %v1357_v16 }
 0x188   :  { %v2097_v22 = vmax.f32 %v1810_v15, 0.0  ;;  %v1508_v27 = vadd.f32 %v4753_v49, %v1507_v21 }
 0x189   :  { %v3732_v23 = vpack.c.bf16 %v2035_v20, %v2034_v19  ;;  %3196 = vmatmul.msk.bf16.gmra.mxu2 %vm902_vm2, %v3317_v11  ;;  %3136 = vmatmul.msk.bf16.gmra.mxu0 %vm902_vm2, %v3257_v13  ;;  %v1916_v30 = vmax.f32 %v1358_v25, 0.0  ;;  %v3350_v19 = vld [vmem:[%s5240_s0 + $0x3a0] sm:$0xff] }
 0x18a   :  { %v3887_v24 = vpack.c.bf16 %v2097_v22, %v2096_v14  ;;  %3166 = vmatmul.msk.bf16.gmra.mxu1 %vm902_vm2, %v3287_v17  ;;  %3227 = vmatmul.msk.bf16.gmra.mxu3 %vm902_vm2, %v3348_v18  ;;  %v1976_v33 = vmax.f32 %v1508_v27, 0.0  ;;  %v3259_v14 = vld [vmem:[%s5240_s0 + $0xc8] sm:$0xff]  ;;  %v3289_v18 = vld [vmem:[%s5240_s0 + $0x1b8] sm:$0xff] }
 0x18b   :  { %4032 = vst [vmem:[%s5242_s3 + $0x250] sm:$0xff] %v3732_v23  }
 0x18c   :  { %v1657_v26 = vpop.f32.mrf.mxu2  ;;  %4063 = vst [vmem:[%s5242_s3 + $0x348] sm:$0xff] %v3887_v24  }
 0x18d   :  { %v1812_v28 = vpop.f32.mrf.mxu3  ;;  %v1658_v38 = vadd.f32 %v4753_v49, %v1657_v26 }
 0x18e   :  { %v1359_v29 = vpop.f32.mrf.mxu0  ;;  %v1813_v36 = vadd.f32 %v4753_v49, %v1812_v28 }
 0x18f   :  { %v1360_v31 = vadd.f32 %v4753_v49, %v1359_v29  ;;  %v1509_v32 = vpop.f32.mrf.mxu1  ;;  %v2036_v52 = vmax.f32 %v1658_v38, 0.0 }
 0x190   :  { %v1510_v34 = vadd.f32 %v4753_v49, %v1509_v32  ;;  %v2098_v46 = vmax.f32 %v1813_v36, 0.0 }
 0x191   :  { %v1917_v35 = vmax.f32 %v1360_v31, 0.0 }
 0x192   :  { %v1977_v37 = vmax.f32 %v1510_v34, 0.0 }
 0x193   :  { %v3437_v39 = vpack.c.bf16 %v1917_v35, %v1916_v30 }
 0x194   :  { %v1659_v40 = vpop.f32.mrf.mxu2  ;;  %v3587_v41 = vpack.c.bf16 %v1977_v37, %v1976_v33 }
 0x195   :  { %v1660_v42 = vadd.f32 %v4753_v49, %v1659_v40  ;;  %3973 = vst [vmem:[%s5242_s3 + $0x78] sm:$0xff] %v3437_v39   ;;  %v1814_v44 = vpop.f32.mrf.mxu3 }
 0x196   :  { %4003 = vst [vmem:[%s5242_s3 + $0x168] sm:$0xff] %v3587_v41   ;;  %v1815_v47 = vadd.f32 %v4753_v49, %v1814_v44  ;;  %v1362_v48 = vpop.f32.mrf.mxu0  ;;  %v3320_v44 = vld [vmem:[%s5240_s0 + $0x2b0] sm:$0xff] }
 0x197   :  { %v2037_v53 = vmax.f32 %v1660_v42, 0.0  ;;  %v1512_v54 = vpop.f32.mrf.mxu1  ;;  %v1363_v58 = vadd.f32 %v4753_v49, %v1362_v48 }
 0x198   :  { %v2099_v55 = vmax.f32 %v1815_v47, 0.0  ;;  %v1513_v60 = vadd.f32 %v4753_v49, %v1512_v54 }
 0x199   :  { %v3737_v56 = vpack.c.bf16 %v2037_v53, %v2036_v52  ;;  %3197 = vmatmul.msk.bf16.gmra.mxu2 %vm902_vm2, %v3318_v43  ;;  %3137 = vmatmul.msk.bf16.gmra.mxu0 %vm902_vm2, %v3258_v45  ;;  %v1918_v63 = vmax.f32 %v1363_v58, 0.0  ;;  %v3351_v52 = vld [vmem:[%s5240_s0 + $0x3a8] sm:$0xff] }
 0x19a   :  { %v3892_v57 = vpack.c.bf16 %v2099_v55, %v2098_v46  ;;  %3167 = vmatmul.msk.bf16.gmra.mxu1 %vm902_vm2, %v3288_v50  ;;  %3228 = vmatmul.msk.bf16.gmra.mxu3 %vm902_vm2, %v3349_v51  ;;  %v1978_v2 = vmax.f32 %v1513_v60, 0.0  ;;  %v3260_v46 = vld [vmem:[%s5240_s0 + $0xd0] sm:$0xff]  ;;  %v3290_v51 = vld [vmem:[%s5240_s0 + $0x1c0] sm:$0xff] }
 0x19b   :  { %4033 = vst [vmem:[%s5242_s3 + $0x258] sm:$0xff] %v3737_v56  }
 0x19c   :  { %v1662_v59 = vpop.f32.mrf.mxu2  ;;  %4064 = vst [vmem:[%s5242_s3 + $0x350] sm:$0xff] %v3892_v57  }
 0x19d   :  { %v1817_v61 = vpop.f32.mrf.mxu3  ;;  %v1663_v7 = vadd.f32 %v4753_v49, %v1662_v59 }
 0x19e   :  { %v1364_v62 = vpop.f32.mrf.mxu0  ;;  %v1818_v5 = vadd.f32 %v4753_v49, %v1817_v61 }
 0x19f   :  { %v1365_v0 = vadd.f32 %v4753_v49, %v1364_v62  ;;  %v1514_v1 = vpop.f32.mrf.mxu1  ;;  %v2038_v20 = vmax.f32 %v1663_v7, 0.0 }
 0x1a0   :  { %v1515_v3 = vadd.f32 %v4753_v49, %v1514_v1  ;;  %v2100_v15 = vmax.f32 %v1818_v5, 0.0 }
 0x1a1   :  { %v1919_v4 = vmax.f32 %v1365_v0, 0.0 }
 0x1a2   :  { %v1979_v6 = vmax.f32 %v1515_v3, 0.0 }
 0x1a3   :  { %v3442_v8 = vpack.c.bf16 %v1919_v4, %v1918_v63 }
 0x1a4   :  { %v1664_v9 = vpop.f32.mrf.mxu2  ;;  %v3592_v10 = vpack.c.bf16 %v1979_v6, %v1978_v2 }
 0x1a5   :  { %v1665_v11 = vadd.f32 %v4753_v49, %v1664_v9  ;;  %3974 = vst [vmem:[%s5242_s3 + $0x80] sm:$0xff] %v3442_v8   ;;  %v1819_v13 = vpop.f32.mrf.mxu3 }
 0x1a6   :  { %4004 = vst [vmem:[%s5242_s3 + $0x170] sm:$0xff] %v3592_v10   ;;  %v1820_v16 = vadd.f32 %v4753_v49, %v1819_v13  ;;  %v1367_v17 = vpop.f32.mrf.mxu0  ;;  %v3321_v13 = vld [vmem:[%s5240_s0 + $0x2b8] sm:$0xff] }
 0x1a7   :  { %v2039_v21 = vmax.f32 %v1665_v11, 0.0  ;;  %v1517_v22 = vpop.f32.mrf.mxu1  ;;  %v1368_v26 = vadd.f32 %v4753_v49, %v1367_v17 }
 0x1a8   :  { %v2101_v23 = vmax.f32 %v1820_v16, 0.0  ;;  %v1518_v28 = vadd.f32 %v4753_v49, %v1517_v22 }
 0x1a9   :  { %v3742_v24 = vpack.c.bf16 %v2039_v21, %v2038_v20  ;;  %3198 = vmatmul.msk.bf16.gmra.mxu2 %vm902_vm2, %v3319_v12  ;;  %3138 = vmatmul.msk.bf16.gmra.mxu0 %vm902_vm2, %v3259_v14  ;;  %v1920_v31 = vmax.f32 %v1368_v26, 0.0  ;;  %v3352_v20 = vld [vmem:[%s5240_s0 + $0x3b0] sm:$0xff] }
 0x1aa   :  { %v3897_v25 = vpack.c.bf16 %v2101_v23, %v2100_v15  ;;  %3168 = vmatmul.msk.bf16.gmra.mxu1 %vm902_vm2, %v3289_v18  ;;  %3229 = vmatmul.msk.bf16.gmra.mxu3 %vm902_vm2, %v3350_v19  ;;  %v1980_v34 = vmax.f32 %v1518_v28, 0.0  ;;  %v3261_v15 = vld [vmem:[%s5240_s0 + $0xd8] sm:$0xff]  ;;  %v3291_v19 = vld [vmem:[%s5240_s0 + $0x1c8] sm:$0xff] }
 0x1ab   :  { %4034 = vst [vmem:[%s5242_s3 + $0x260] sm:$0xff] %v3742_v24  }
 0x1ac   :  { %v1667_v27 = vpop.f32.mrf.mxu2  ;;  %4065 = vst [vmem:[%s5242_s3 + $0x358] sm:$0xff] %v3897_v25  }
 0x1ad   :  { %v1822_v29 = vpop.f32.mrf.mxu3  ;;  %v1668_v39 = vadd.f32 %v4753_v49, %v1667_v27 }
 0x1ae   :  { %v1369_v30 = vpop.f32.mrf.mxu0  ;;  %v1823_v37 = vadd.f32 %v4753_v49, %v1822_v29 }
 0x1af   :  { %v1370_v32 = vadd.f32 %v4753_v49, %v1369_v30  ;;  %v1519_v33 = vpop.f32.mrf.mxu1  ;;  %v2040_v53 = vmax.f32 %v1668_v39, 0.0 }
 0x1b0   :  { %v1520_v35 = vadd.f32 %v4753_v49, %v1519_v33  ;;  %v2102_v47 = vmax.f32 %v1823_v37, 0.0 }
 0x1b1   :  { %v1921_v36 = vmax.f32 %v1370_v32, 0.0 }
 0x1b2   :  { %v1981_v38 = vmax.f32 %v1520_v35, 0.0 }
 0x1b3   :  { %v3447_v40 = vpack.c.bf16 %v1921_v36, %v1920_v31 }
 0x1b4   :  { %v1669_v41 = vpop.f32.mrf.mxu2  ;;  %v3597_v42 = vpack.c.bf16 %v1981_v38, %v1980_v34 }
 0x1b5   :  { %v1670_v43 = vadd.f32 %v4753_v49, %v1669_v41  ;;  %3975 = vst [vmem:[%s5242_s3 + $0x88] sm:$0xff] %v3447_v40   ;;  %v1824_v45 = vpop.f32.mrf.mxu3 }
 0x1b6   :  { %4005 = vst [vmem:[%s5242_s3 + $0x178] sm:$0xff] %v3597_v42   ;;  %v1825_v48 = vadd.f32 %v4753_v49, %v1824_v45  ;;  %v1372_v50 = vpop.f32.mrf.mxu0  ;;  %v3322_v45 = vld [vmem:[%s5240_s0 + $0x2c0] sm:$0xff] }
 0x1b7   :  { %v2041_v54 = vmax.f32 %v1670_v43, 0.0  ;;  %v1522_v55 = vpop.f32.mrf.mxu1  ;;  %v1373_v59 = vadd.f32 %v4753_v49, %v1372_v50 }
 0x1b8   :  { %v2103_v56 = vmax.f32 %v1825_v48, 0.0  ;;  %v1523_v61 = vadd.f32 %v4753_v49, %v1522_v55 }
 0x1b9   :  { %v3747_v57 = vpack.c.bf16 %v2041_v54, %v2040_v53  ;;  %3199 = vmatmul.msk.bf16.gmra.mxu2 %vm902_vm2, %v3320_v44  ;;  %3139 = vmatmul.msk.bf16.gmra.mxu0 %vm902_vm2, %v3260_v46  ;;  %v1922_v0 = vmax.f32 %v1373_v59, 0.0  ;;  %v3353_v53 = vld [vmem:[%s5240_s0 + $0x3b8] sm:$0xff] }
 0x1ba   :  { %v3902_v58 = vpack.c.bf16 %v2103_v56, %v2102_v47  ;;  %3169 = vmatmul.msk.bf16.gmra.mxu1 %vm902_vm2, %v3290_v51  ;;  %3230 = vmatmul.msk.bf16.gmra.mxu3 %vm902_vm2, %v3351_v52  ;;  %v1982_v3 = vmax.f32 %v1523_v61, 0.0  ;;  %v3262_v47 = vld [vmem:[%s5240_s0 + $0xe0] sm:$0xff]  ;;  %v3292_v52 = vld [vmem:[%s5240_s0 + $0x1d0] sm:$0xff] }
 0x1bb   :  { %4035 = vst [vmem:[%s5242_s3 + $0x268] sm:$0xff] %v3747_v57  }
 0x1bc   :  { %v1672_v60 = vpop.f32.mrf.mxu2  ;;  %4066 = vst [vmem:[%s5242_s3 + $0x360] sm:$0xff] %v3902_v58  }
 0x1bd   :  { %v1827_v62 = vpop.f32.mrf.mxu3  ;;  %v1673_v8 = vadd.f32 %v4753_v49, %v1672_v60 }
 0x1be   :  { %v1374_v63 = vpop.f32.mrf.mxu0  ;;  %v1828_v6 = vadd.f32 %v4753_v49, %v1827_v62 }
 0x1bf   :  { %v1375_v1 = vadd.f32 %v4753_v49, %v1374_v63  ;;  %v1524_v2 = vpop.f32.mrf.mxu1  ;;  %v2042_v21 = vmax.f32 %v1673_v8, 0.0 }
 0x1c0   :  { %v1525_v4 = vadd.f32 %v4753_v49, %v1524_v2  ;;  %v2104_v16 = vmax.f32 %v1828_v6, 0.0 }
 0x1c1   :  { %v1923_v5 = vmax.f32 %v1375_v1, 0.0 }
 0x1c2   :  { %v1983_v7 = vmax.f32 %v1525_v4, 0.0  ;;  %v255_v4 = vld [vmem:[%s5240_s0 + $0x3c0] sm:$0x1] }
 0x1c3   :  { %v3452_v9 = vpack.c.bf16 %v1923_v5, %v1922_v0 }
 0x1c4   :  { %v1674_v10 = vpop.f32.mrf.mxu2  ;;  %v3602_v11 = vpack.c.bf16 %v1983_v7, %v1982_v3 }
 0x1c5   :  { %v1675_v12 = vadd.f32 %v4753_v49, %v1674_v10  ;;  %3976 = vst [vmem:[%s5242_s3 + $0x90] sm:$0xff] %v3452_v9   ;;  %v1829_v14 = vpop.f32.mrf.mxu3  ;;  %v751_v10 = vunpack.c.l.b16 %v255_v4 }
 0x1c6   :  { %4006 = vst [vmem:[%s5242_s3 + $0x180] sm:$0xff] %v3602_v11   ;;  %v1830_v17 = vadd.f32 %v4753_v49, %v1829_v14  ;;  %v1377_v18 = vpop.f32.mrf.mxu0 }
 0x1c7   :  { %v2043_v22 = vmax.f32 %v1675_v12, 0.0  ;;  %v1527_v23 = vpop.f32.mrf.mxu1  ;;  %v1378_v27 = vadd.f32 %v4753_v49, %v1377_v18  ;;  %v3263_v18 = vld [vmem:[%s5240_s0 + $0xe8] sm:$0xff] }
 0x1c8   :  { %v2105_v24 = vmax.f32 %v1830_v17, 0.0  ;;  %v1528_v29 = vadd.f32 %v4753_v49, %v1527_v23  ;;  %v872_v23 = vpack.c.b16 %v751_v10, %v751_v10 }
 0x1c9   :  { %v3752_v25 = vpack.c.bf16 %v2043_v22, %v2042_v21  ;;  %3200 = vmatmul.msk.bf16.gmra.mxu2 %vm902_vm2, %v3321_v13  ;;  %3140 = vmatmul.msk.bf16.gmra.mxu0 %vm902_vm2, %v3261_v15  ;;  %v1924_v32 = vmax.f32 %v1378_v27, 0.0  ;;  %v3293_v22 = vld [vmem:[%s5240_s0 + $0x1d8] sm:$0xff] }
 0x1ca   :  { %v3907_v26 = vpack.c.bf16 %v2105_v24, %v2104_v16  ;;  %3170 = vmatmul.msk.bf16.gmra.mxu1 %vm902_vm2, %v3291_v19  ;;  %3231 = vmatmul.msk.bf16.gmra.mxu3 %vm902_vm2, %v3352_v20  ;;  %v1984_v35 = vmax.f32 %v1528_v29, 0.0  ;;  %v3323_v16 = vld [vmem:[%s5240_s0 + $0x2c8] sm:$0xff] }
 0x1cb   :  { %4036 = vst [vmem:[%s5242_s3 + $0x270] sm:$0xff] %v3752_v25  }
 0x1cc   :  { %v1677_v28 = vpop.f32.mrf.mxu2  ;;  %4067 = vst [vmem:[%s5242_s3 + $0x368] sm:$0xff] %v3907_v26  }
 0x1cd   :  { %v1832_v30 = vpop.f32.mrf.mxu3  ;;  %v1678_v40 = vadd.f32 %v4753_v49, %v1677_v28 }
 0x1ce   :  { %v1379_v31 = vpop.f32.mrf.mxu0  ;;  %v1833_v38 = vadd.f32 %v4753_v49, %v1832_v30 }
 0x1cf   :  { %v1380_v33 = vadd.f32 %v4753_v49, %v1379_v31  ;;  %v1529_v34 = vpop.f32.mrf.mxu1  ;;  %v2044_v54 = vmax.f32 %v1678_v40, 0.0 }
 0x1d0   :  { %v1530_v36 = vadd.f32 %v4753_v49, %v1529_v34  ;;  %v2106_v48 = vmax.f32 %v1833_v38, 0.0 }
 0x1d1   :  { %v1925_v37 = vmax.f32 %v1380_v33, 0.0 }
 0x1d2   :  { %v1985_v39 = vmax.f32 %v1530_v36, 0.0 }
 0x1d3   :  { %v3457_v41 = vpack.c.bf16 %v1925_v37, %v1924_v32 }
 0x1d4   :  { %v1679_v42 = vpop.f32.mrf.mxu2  ;;  %v3607_v43 = vpack.c.bf16 %v1985_v39, %v1984_v35 }
 0x1d5   :  { %v1680_v44 = vadd.f32 %v4753_v49, %v1679_v42  ;;  %3977 = vst [vmem:[%s5242_s3 + $0x98] sm:$0xff] %v3457_v41   ;;  %v1834_v46 = vpop.f32.mrf.mxu3 }
 0x1d6   :  { %4007 = vst [vmem:[%s5242_s3 + $0x188] sm:$0xff] %v3607_v43   ;;  %v1835_v50 = vadd.f32 %v4753_v49, %v1834_v46  ;;  %v1382_v51 = vpop.f32.mrf.mxu0 }
 0x1d7   :  { %v2045_v55 = vmax.f32 %v1680_v44, 0.0  ;;  %v1532_v56 = vpop.f32.mrf.mxu1  ;;  %v1383_v60 = vadd.f32 %v4753_v49, %v1382_v51 }
 0x1d8   :  { %v2107_v57 = vmax.f32 %v1835_v50, 0.0  ;;  %v1533_v62 = vadd.f32 %v4753_v49, %v1532_v56 }
 0x1d9   :  { %v3757_v58 = vpack.c.bf16 %v2045_v55, %v2044_v54  ;;  %3201 = vmatmul.msk.bf16.gmra.mxu2 %vm902_vm2, %v3322_v45  ;;  %3141 = vmatmul.msk.bf16.gmra.mxu0 %vm902_vm2, %v3262_v47  ;;  %v1926_v1 = vmax.f32 %v1383_v60, 0.0 }
 0x1da   :  { %v3912_v59 = vpack.c.bf16 %v2107_v57, %v2106_v48  ;;  %3171 = vmatmul.msk.bf16.gmra.mxu1 %vm902_vm2, %v3292_v52  ;;  %3232 = vmatmul.msk.bf16.gmra.mxu3 %vm902_vm2, %v3353_v53  ;;  %v1986_v5 = vmax.f32 %v1533_v62, 0.0  ;;  %v3324_v48 = vld [vmem:[%s5240_s0 + $0x2d0] sm:$0xff] }
 0x1db   :  { %4037 = vst [vmem:[%s5242_s3 + $0x278] sm:$0xff] %v3757_v58  }
 0x1dc   :  { %v1682_v61 = vpop.f32.mrf.mxu2  ;;  %4068 = vst [vmem:[%s5242_s3 + $0x370] sm:$0xff] %v3912_v59  }
 0x1dd   :  { %v1837_v63 = vpop.f32.mrf.mxu3  ;;  %v1683_v11 = vadd.f32 %v4753_v49, %v1682_v61 }
 0x1de   :  { %v1384_v0 = vpop.f32.mrf.mxu0  ;;  %v1838_v8 = vadd.f32 %v4753_v49, %v1837_v63 }
 0x1df   :  { %v1385_v2 = vadd.f32 %v4753_v49, %v1384_v0  ;;  %v1534_v3 = vpop.f32.mrf.mxu1  ;;  %v2046_v24 = vmax.f32 %v1683_v11, 0.0 }
 0x1e0   :  { %v1535_v6 = vadd.f32 %v4753_v49, %v1534_v3  ;;  %v2108_v19 = vmax.f32 %v1838_v8, 0.0 }
 0x1e1   :  { %v1927_v7 = vmax.f32 %v1385_v2, 0.0 }
 0x1e2   :  { %v1987_v9 = vmax.f32 %v1535_v6, 0.0 }
 0x1e3   :  { %v3462_v12 = vpack.c.bf16 %v1927_v7, %v1926_v1 }
 0x1e4   :  { %v1684_v13 = vpop.f32.mrf.mxu2  ;;  %v3612_v14 = vpack.c.bf16 %v1987_v9, %v1986_v5 }
 0x1e5   :  { %v1685_v15 = vadd.f32 %v4753_v49, %v1684_v13  ;;  %3978 = vst [vmem:[%s5242_s3 + $0xa0] sm:$0xff] %v3462_v12   ;;  %v1839_v17 = vpop.f32.mrf.mxu3 }
 0x1e6   :  { %4008 = vst [vmem:[%s5242_s3 + $0x190] sm:$0xff] %v3612_v14   ;;  %v1840_v20 = vadd.f32 %v4753_v49, %v1839_v17  ;;  %v1387_v21 = vpop.f32.mrf.mxu0 }
 0x1e7   :  { %v2047_v25 = vmax.f32 %v1685_v15, 0.0  ;;  %v1537_v26 = vpop.f32.mrf.mxu1  ;;  %v1388_v30 = vadd.f32 %v4753_v49, %v1387_v21 }
 0x1e8   :  { %v2109_v27 = vmax.f32 %v1840_v20, 0.0  ;;  %v1538_v32 = vadd.f32 %v4753_v49, %v1537_v26 }
 0x1e9   :  { %v3762_v28 = vpack.c.bf16 %v2047_v25, %v2046_v24  ;;  %3202 = vmatmul.msk.bf16.gmra.mxu2 %vm902_vm2, %v3323_v16  ;;  %3142 = vmatmul.msk.bf16.gmra.mxu0 %vm902_vm2, %v3263_v18  ;;  %v1928_v35 = vmax.f32 %v1388_v30, 0.0 }
 0x1ea   :  { %v3917_v29 = vpack.c.bf16 %v2109_v27, %v2108_v19  ;;  %3172 = vmatmul.msk.bf16.gmra.mxu1 %vm902_vm2, %v3293_v22  ;;  %3233 = vmatmul.msk.bf16.gmra.mxu3 %vm902_vm2, %v872_v23  ;;  %v1988_v38 = vmax.f32 %v1538_v32, 0.0 }
 0x1eb   :  { %4038 = vst [vmem:[%s5242_s3 + $0x280] sm:$0xff] %v3762_v28  }
 0x1ec   :  { %v1687_v31 = vpop.f32.mrf.mxu2  ;;  %4069 = vst [vmem:[%s5242_s3 + $0x378] sm:$0xff] %v3917_v29  }
 0x1ed   :  { %v1842_v33 = vpop.f32.mrf.mxu3  ;;  %v1688_v43 = vadd.f32 %v4753_v49, %v1687_v31 }
 0x1ee   :  { %v1389_v34 = vpop.f32.mrf.mxu0  ;;  %v1843_v41 = vadd.f32 %v4753_v49, %v1842_v33 }
 0x1ef   :  { %v1390_v36 = vadd.f32 %v4753_v49, %v1389_v34  ;;  %v1539_v37 = vpop.f32.mrf.mxu1  ;;  %v2048_v54 = vmax.f32 %v1688_v43, 0.0 }
 0x1f0   :  { %v1540_v39 = vadd.f32 %v4753_v49, %v1539_v37  ;;  %v2110_v51 = vmax.f32 %v1843_v41, 0.0 }
 0x1f1   :  { %v1929_v40 = vmax.f32 %v1390_v36, 0.0 }
 0x1f2   :  { %v1989_v42 = vmax.f32 %v1540_v39, 0.0 }
 0x1f3   :  { %v3467_v44 = vpack.c.bf16 %v1929_v40, %v1928_v35 }
 0x1f4   :  { %v1689_v45 = vpop.f32.mrf.mxu2  ;;  %v3617_v46 = vpack.c.bf16 %v1989_v42, %v1988_v38 }
 0x1f5   :  { %v1690_v47 = vadd.f32 %v4753_v49, %v1689_v45  ;;  %3979 = vst [vmem:[%s5242_s3 + $0xa8] sm:$0xff] %v3467_v44   ;;  %v1844_v50 = vpop.f32.mrf.mxu3 }
 0x1f6   :  { %4009 = vst [vmem:[%s5242_s3 + $0x198] sm:$0xff] %v3617_v46   ;;  %v1845_v52 = vadd.f32 %v4753_v49, %v1844_v50  ;;  %v1392_v53 = vpop.f32.mrf.mxu0 }
 0x1f7   :  { %v2049_v55 = vmax.f32 %v1690_v47, 0.0  ;;  %v1542_v56 = vpop.f32.mrf.mxu1  ;;  %v1393_v60 = vadd.f32 %v4753_v49, %v1392_v53 }
 0x1f8   :  { %v2111_v57 = vmax.f32 %v1845_v52, 0.0  ;;  %v1543_v62 = vadd.f32 %v4753_v49, %v1542_v56 }
 0x1f9   :  { %v3767_v58 = vpack.c.bf16 %v2049_v55, %v2048_v54  ;;  %3203 = vmatmul.msk.bf16.gmra.mxu2 %vm902_vm2, %v3324_v48  ;;  %v1930_v1 = vmax.f32 %v1393_v60, 0.0 }
 0x1fa   :  { %v3922_v59 = vpack.c.bf16 %v2111_v57, %v2110_v51  ;;  %v1990_v4 = vmax.f32 %v1543_v62, 0.0 }
 0x1fb   :  { %4039 = vst [vmem:[%s5242_s3 + $0x288] sm:$0xff] %v3767_v58  }
 0x1fc   :  { %v1692_v61 = vpop.f32.mrf.mxu2  ;;  %4070 = vst [vmem:[%s5242_s3 + $0x380] sm:$0xff] %v3922_v59  }
 0x1fd   :  { %v1847_v63 = vpop.f32.mrf.mxu3  ;;  %v1693_v9 = vadd.f32 %v4753_v49, %v1692_v61 }
 0x1fe   :  { %v1394_v0 = vpop.f32.mrf.mxu0  ;;  %v1848_v7 = vadd.f32 %v4753_v49, %v1847_v63 }
 0x1ff   :  { %v1395_v2 = vadd.f32 %v4753_v49, %v1394_v0  ;;  %v1544_v3 = vpop.f32.mrf.mxu1  ;;  %v2050_v18 = vmax.f32 %v1693_v9, 0.0 }
 0x200   :  { %v1545_v5 = vadd.f32 %v4753_v49, %v1544_v3  ;;  %v2112_v15 = vmax.f32 %v1848_v7, 0.0 }
 0x201   :  { %v1931_v6 = vmax.f32 %v1395_v2, 0.0 }
 0x202   :  { %v1991_v8 = vmax.f32 %v1545_v5, 0.0 }
 0x203   :  { %v3472_v10 = vpack.c.bf16 %v1931_v6, %v1930_v1 }
 0x204   :  { %v1694_v11 = vpop.f32.mrf.mxu2  ;;  %v3622_v12 = vpack.c.bf16 %v1991_v8, %v1990_v4 }
 0x205   :  { %v1695_v13 = vadd.f32 %v4753_v49, %v1694_v11  ;;  %3980 = vst [vmem:[%s5242_s3 + $0xb0] sm:$0xff] %v3472_v10   ;;  %v1849_v14 = vpop.f32.mrf.mxu3 }
 0x206   :  { %4010 = vst [vmem:[%s5242_s3 + $0x1a0] sm:$0xff] %v3622_v12   ;;  %v1850_v16 = vadd.f32 %v4753_v49, %v1849_v14  ;;  %v1397_v17 = vpop.f32.mrf.mxu0 }
 0x207   :  { %v2051_v19 = vmax.f32 %v1695_v13, 0.0  ;;  %v1547_v20 = vpop.f32.mrf.mxu1  ;;  %v1398_v24 = vadd.f32 %v4753_v49, %v1397_v17 }
 0x208   :  { %v2113_v21 = vmax.f32 %v1850_v16, 0.0  ;;  %v1548_v26 = vadd.f32 %v4753_v49, %v1547_v20 }
 0x209   :  { %v3772_v22 = vpack.c.bf16 %v2051_v19, %v2050_v18  ;;  %v1932_v29 = vmax.f32 %v1398_v24, 0.0 }
 0x20a   :  { %v3927_v23 = vpack.c.bf16 %v2113_v21, %v2112_v15  ;;  %v1992_v32 = vmax.f32 %v1548_v26, 0.0 }
 0x20b   :  { %4040 = vst [vmem:[%s5242_s3 + $0x290] sm:$0xff] %v3772_v22  }
 0x20c   :  { %v1697_v25 = vpop.f32.mrf.mxu2  ;;  %4071 = vst [vmem:[%s5242_s3 + $0x388] sm:$0xff] %v3927_v23  }
 0x20d   :  { %v1852_v27 = vpop.f32.mrf.mxu3  ;;  %v1698_v37 = vadd.f32 %v4753_v49, %v1697_v25 }
 0x20e   :  { %v1399_v28 = vpop.f32.mrf.mxu0  ;;  %v1853_v35 = vadd.f32 %v4753_v49, %v1852_v27 }
 0x20f   :  { %v1400_v30 = vadd.f32 %v4753_v49, %v1399_v28  ;;  %v1549_v31 = vpop.f32.mrf.mxu1  ;;  %v2052_v46 = vmax.f32 %v1698_v37, 0.0 }
 0x210   :  { %v1550_v33 = vadd.f32 %v4753_v49, %v1549_v31  ;;  %v2114_v43 = vmax.f32 %v1853_v35, 0.0 }
 0x211   :  { %v1933_v34 = vmax.f32 %v1400_v30, 0.0 }
 0x212   :  { %v1993_v36 = vmax.f32 %v1550_v33, 0.0 }
 0x213   :  { %v3477_v38 = vpack.c.bf16 %v1933_v34, %v1932_v29 }
 0x214   :  { %v1699_v39 = vpop.f32.mrf.mxu2  ;;  %v3627_v40 = vpack.c.bf16 %v1993_v36, %v1992_v32 }
 0x215   :  { %v1700_v41 = vadd.f32 %v4753_v49, %v1699_v39  ;;  %3981 = vst [vmem:[%s5242_s3 + $0xb8] sm:$0xff] %v3477_v38   ;;  %v1854_v42 = vpop.f32.mrf.mxu3 }
 0x216   :  { %4011 = vst [vmem:[%s5242_s3 + $0x1a8] sm:$0xff] %v3627_v40   ;;  %v1855_v44 = vadd.f32 %v4753_v49, %v1854_v42  ;;  %v1402_v45 = vpop.f32.mrf.mxu0 }
 0x217   :  { %v2053_v47 = vmax.f32 %v1700_v41, 0.0  ;;  %v1552_v48 = vpop.f32.mrf.mxu1  ;;  %v1403_v53 = vadd.f32 %v4753_v49, %v1402_v45 }
 0x218   :  { %v2115_v50 = vmax.f32 %v1855_v44, 0.0  ;;  %v1553_v55 = vadd.f32 %v4753_v49, %v1552_v48 }
 0x219   :  { %v3777_v51 = vpack.c.bf16 %v2053_v47, %v2052_v46  ;;  %v1934_v58 = vmax.f32 %v1403_v53, 0.0 }
 0x21a   :  { %v3932_v52 = vpack.c.bf16 %v2115_v50, %v2114_v43  ;;  %v1994_v61 = vmax.f32 %v1553_v55, 0.0 }
 0x21b   :  { %4041 = vst [vmem:[%s5242_s3 + $0x298] sm:$0xff] %v3777_v51  }
 0x21c   :  { %v1702_v54 = vpop.f32.mrf.mxu2  ;;  %4072 = vst [vmem:[%s5242_s3 + $0x390] sm:$0xff] %v3932_v52  }
 0x21d   :  { %v1857_v56 = vpop.f32.mrf.mxu3  ;;  %v1703_v2 = vadd.f32 %v4753_v49, %v1702_v54 }
 0x21e   :  { %v1404_v57 = vpop.f32.mrf.mxu0  ;;  %v1858_v0 = vadd.f32 %v4753_v49, %v1857_v56 }
 0x21f   :  { %v1405_v59 = vadd.f32 %v4753_v49, %v1404_v57  ;;  %v1554_v60 = vpop.f32.mrf.mxu1  ;;  %v2054_v11 = vmax.f32 %v1703_v2, 0.0 }
 0x220   :  { %v1555_v62 = vadd.f32 %v4753_v49, %v1554_v60  ;;  %v2116_v8 = vmax.f32 %v1858_v0, 0.0 }
 0x221   :  { %v1935_v63 = vmax.f32 %v1405_v59, 0.0 }
 0x222   :  { %v1995_v1 = vmax.f32 %v1555_v62, 0.0 }
 0x223   :  { %v3482_v3 = vpack.c.bf16 %v1935_v63, %v1934_v58 }
 0x224   :  { %v1704_v4 = vpop.f32.mrf.mxu2  ;;  %v3632_v5 = vpack.c.bf16 %v1995_v1, %v1994_v61 }
 0x225   :  { %v1705_v6 = vadd.f32 %v4753_v49, %v1704_v4  ;;  %3982 = vst [vmem:[%s5242_s3 + $0xc0] sm:$0xff] %v3482_v3   ;;  %v1859_v7 = vpop.f32.mrf.mxu3 }
 0x226   :  { %4012 = vst [vmem:[%s5242_s3 + $0x1b0] sm:$0xff] %v3632_v5   ;;  %v1860_v9 = vadd.f32 %v4753_v49, %v1859_v7  ;;  %v1407_v10 = vpop.f32.mrf.mxu0 }
 0x227   :  { %v2055_v12 = vmax.f32 %v1705_v6, 0.0  ;;  %v1557_v13 = vpop.f32.mrf.mxu1  ;;  %v1408_v17 = vadd.f32 %v4753_v49, %v1407_v10  ;;  %v5170_v10 = vld [vmem:[%s5241_s2] ss:$0 sm:$0xff] }
 0x228   :  { %v2117_v14 = vmax.f32 %v1860_v9, 0.0  ;;  %v1558_v19 = vadd.f32 %v4753_v49, %v1557_v13 }
 0x229   :  { %v3782_v15 = vpack.c.bf16 %v2055_v12, %v2054_v11  ;;  %v1936_v22 = vmax.f32 %v1408_v17, 0.0 }
 0x22a   :  { %v3937_v16 = vpack.c.bf16 %v2117_v14, %v2116_v8  ;;  %v1996_v25 = vmax.f32 %v1558_v19, 0.0 }
 0x22b   :  { %4042 = vst [vmem:[%s5242_s3 + $0x2a0] sm:$0xff] %v3782_v15  }
 0x22c   :  { %v1707_v18 = vpop.f32.mrf.mxu2  ;;  %4073 = vst [vmem:[%s5242_s3 + $0x398] sm:$0xff] %v3937_v16  }
 0x22d   :  { %v1862_v20 = vpop.f32.mrf.mxu3  ;;  %v1708_v30 = vadd.f32 %v4753_v49, %v1707_v18 }
 0x22e   :  { %v1409_v21 = vpop.f32.mrf.mxu0  ;;  %v1863_v28 = vadd.f32 %v4753_v49, %v1862_v20 }
 0x22f   :  { %v1410_v23 = vadd.f32 %v4753_v49, %v1409_v21  ;;  %v1559_v24 = vpop.f32.mrf.mxu1  ;;  %v2056_v39 = vmax.f32 %v1708_v30, 0.0 }
 0x230   :  { %v1560_v26 = vadd.f32 %v4753_v49, %v1559_v24  ;;  %v2118_v36 = vmax.f32 %v1863_v28, 0.0 }
 0x231   :  { %v1937_v27 = vmax.f32 %v1410_v23, 0.0 }
 0x232   :  { %v1997_v29 = vmax.f32 %v1560_v26, 0.0 }
 0x233   :  { %v3487_v31 = vpack.c.bf16 %v1937_v27, %v1936_v22 }
 0x234   :  { %v1709_v32 = vpop.f32.mrf.mxu2  ;;  %v3637_v33 = vpack.c.bf16 %v1997_v29, %v1996_v25 }
 0x235   :  { %v1710_v34 = vadd.f32 %v4753_v49, %v1709_v32  ;;  %3983 = vst [vmem:[%s5242_s3 + $0xc8] sm:$0xff] %v3487_v31   ;;  %v1864_v35 = vpop.f32.mrf.mxu3 }
 0x236   :  { %4013 = vst [vmem:[%s5242_s3 + $0x1b8] sm:$0xff] %v3637_v33   ;;  %v1865_v37 = vadd.f32 %v4753_v49, %v1864_v35  ;;  %v1412_v38 = vpop.f32.mrf.mxu0 }
 0x237   :  { %v2057_v40 = vmax.f32 %v1710_v34, 0.0  ;;  %v1562_v41 = vpop.f32.mrf.mxu1  ;;  %v1413_v45 = vadd.f32 %v4753_v49, %v1412_v38 }
 0x238   :  { %v2119_v42 = vmax.f32 %v1865_v37, 0.0  ;;  %v1563_v47 = vadd.f32 %v4753_v49, %v1562_v41 }
 0x239   :  { %v3787_v43 = vpack.c.bf16 %v2057_v40, %v2056_v39  ;;  %v1938_v51 = vmax.f32 %v1413_v45, 0.0 }
 0x23a   :  { %v3942_v44 = vpack.c.bf16 %v2119_v42, %v2118_v36  ;;  %v1998_v54 = vmax.f32 %v1563_v47, 0.0 }
 0x23b   :  { %4043 = vst [vmem:[%s5242_s3 + $0x2a8] sm:$0xff] %v3787_v43  }
 0x23c   :  { %v1712_v46 = vpop.f32.mrf.mxu2  ;;  %4074 = vst [vmem:[%s5242_s3 + $0x3a0] sm:$0xff] %v3942_v44  }
 0x23d   :  { %v1867_v48 = vpop.f32.mrf.mxu3  ;;  %v1713_v59 = vadd.f32 %v4753_v49, %v1712_v46 }
 0x23e   :  { %v1414_v50 = vpop.f32.mrf.mxu0  ;;  %v1868_v57 = vadd.f32 %v4753_v49, %v1867_v48 }
 0x23f   :  { %v1415_v52 = vadd.f32 %v4753_v49, %v1414_v50  ;;  %v1564_v53 = vpop.f32.mrf.mxu1  ;;  %v2058_v4 = vmax.f32 %v1713_v59, 0.0 }
 0x240   :  { %v1565_v55 = vadd.f32 %v4753_v49, %v1564_v53  ;;  %v2120_v1 = vmax.f32 %v1868_v57, 0.0 }
 0x241   :  { %v1939_v56 = vmax.f32 %v1415_v52, 0.0 }
 0x242   :  { %v1999_v58 = vmax.f32 %v1565_v55, 0.0 }
 0x243   :  { %v3492_v60 = vpack.c.bf16 %v1939_v56, %v1938_v51 }
 0x244   :  { %v1714_v61 = vpop.f32.mrf.mxu2  ;;  %v3642_v62 = vpack.c.bf16 %v1999_v58, %v1998_v54 }
 0x245   :  { %v1715_v63 = vadd.f32 %v4753_v49, %v1714_v61  ;;  %3984 = vst [vmem:[%s5242_s3 + $0xd0] sm:$0xff] %v3492_v60   ;;  %v1869_v0 = vpop.f32.mrf.mxu3 }
 0x246   :  { %4014 = vst [vmem:[%s5242_s3 + $0x1c0] sm:$0xff] %v3642_v62   ;;  %v1870_v2 = vadd.f32 %v4753_v49, %v1869_v0  ;;  %v1417_v3 = vpop.f32.mrf.mxu0 }
 0x247   :  { %v2059_v5 = vmax.f32 %v1715_v63, 0.0  ;;  %v1567_v6 = vpop.f32.mrf.mxu1  ;;  %v1418_v11 = vadd.f32 %v5170_v10, %v1417_v3 }
 0x248   :  { %v2121_v7 = vmax.f32 %v1870_v2, 0.0  ;;  %v1568_v49 = vadd.f32 %v5170_v10, %v1567_v6 }
 0x249   :  { %v3792_v8 = vpack.c.bf16 %v2059_v5, %v2058_v4  ;;  %v1940_v15 = vmax.f32 %v1418_v11, 0.0 }
 0x24a   :  { %v3947_v9 = vpack.c.bf16 %v2121_v7, %v2120_v1  ;;  %v2000_v18 = vmax.f32 %v1568_v49, 0.0 }
 0x24b   :  { %4044 = vst [vmem:[%s5242_s3 + $0x2b0] sm:$0xff] %v3792_v8  }
 0x24c   :  { %v1717_v12 = vpop.f32.mrf.mxu2  ;;  %4075 = vst [vmem:[%s5242_s3 + $0x3a8] sm:$0xff] %v3947_v9  }
 0x24d   :  { %v1872_v13 = vpop.f32.mrf.mxu3  ;;  %v1718_v23 = vadd.f32 %v5170_v10, %v1717_v12 }
 0x24e   :  { %v1419_v14 = vpop.f32.mrf.mxu0  ;;  %v1873_v21 = vadd.f32 %v5170_v10, %v1872_v13 }
 0x24f   :  { %v1420_v16 = vadd.f32 %v5170_v10, %v1419_v14  ;;  %v1569_v17 = vpop.f32.mrf.mxu1  ;;  %v2060_v32 = vmax.f32 %v1718_v23, 0.0 }
 0x250   :  { %v1570_v19 = vadd.f32 %v5170_v10, %v1569_v17  ;;  %v2122_v29 = vmax.f32 %v1873_v21, 0.0 }
 0x251   :  { %v1941_v20 = vmax.f32 %v1420_v16, 0.0 }
 0x252   :  { %v2001_v22 = vmax.f32 %v1570_v19, 0.0 }
 0x253   :  { %v3497_v24 = vpack.c.bf16 %v1941_v20, %v1940_v15 }
 0x254   :  { %v1719_v25 = vpop.f32.mrf.mxu2  ;;  %v3647_v26 = vpack.c.bf16 %v2001_v22, %v2000_v18 }
 0x255   :  { %v1720_v27 = vadd.f32 %v5170_v10, %v1719_v25  ;;  %3985 = vst [vmem:[%s5242_s3 + $0xd8] sm:$0xff] %v3497_v24   ;;  %v1874_v28 = vpop.f32.mrf.mxu3 }
 0x256   :  { %4015 = vst [vmem:[%s5242_s3 + $0x1c8] sm:$0xff] %v3647_v26   ;;  %v1875_v30 = vadd.f32 %v5170_v10, %v1874_v28  ;;  %v1422_v31 = vpop.f32.mrf.mxu0 }
 0x257   :  { %v2061_v33 = vmax.f32 %v1720_v27, 0.0  ;;  %v1572_v34 = vpop.f32.mrf.mxu1  ;;  %v1423_v38 = vadd.f32 %v5170_v10, %v1422_v31 }
 0x258   :  { %v2123_v35 = vmax.f32 %v1875_v30, 0.0  ;;  %v1573_v40 = vadd.f32 %v5170_v10, %v1572_v34 }
 0x259   :  { %v3797_v36 = vpack.c.bf16 %v2061_v33, %v2060_v32  ;;  %v1942_v43 = vmax.f32 %v1423_v38, 0.0 }
 0x25a   :  { %v3952_v37 = vpack.c.bf16 %v2123_v35, %v2122_v29  ;;  %v2002_v46 = vmax.f32 %v1573_v40, 0.0 }
 0x25b   :  { %4045 = vst [vmem:[%s5242_s3 + $0x2b8] sm:$0xff] %v3797_v36  }
 0x25c   :  { %v1722_v39 = vpop.f32.mrf.mxu2  ;;  %4076 = vst [vmem:[%s5242_s3 + $0x3b0] sm:$0xff] %v3952_v37  }
 0x25d   :  { %v1877_v41 = vpop.f32.mrf.mxu3  ;;  %v1723_v52 = vadd.f32 %v5170_v10, %v1722_v39 }
 0x25e   :  { %v1424_v42 = vpop.f32.mrf.mxu0  ;;  %v1878_v50 = vadd.f32 %v5170_v10, %v1877_v41 }
 0x25f   :  { %v1425_v44 = vadd.f32 %v5170_v10, %v1424_v42  ;;  %v1574_v45 = vpop.f32.mrf.mxu1  ;;  %v2062_v61 = vmax.f32 %v1723_v52, 0.0 }
 0x260   :  { %v1575_v47 = vadd.f32 %v5170_v10, %v1574_v45  ;;  %v2124_v58 = vmax.f32 %v1878_v50, 0.0 }
 0x261   :  { %v1943_v48 = vmax.f32 %v1425_v44, 0.0 }
 0x262   :  { %v2003_v51 = vmax.f32 %v1575_v47, 0.0 }
 0x263   :  { %v3502_v53 = vpack.c.bf16 %v1943_v48, %v1942_v43 }
 0x264   :  { %v1724_v54 = vpop.f32.mrf.mxu2  ;;  %v3652_v55 = vpack.c.bf16 %v2003_v51, %v2002_v46 }
 0x265   :  { %v1725_v56 = vadd.f32 %v5170_v10, %v1724_v54  ;;  %3986 = vst [vmem:[%s5242_s3 + $0xe0] sm:$0xff] %v3502_v53   ;;  %v1879_v57 = vpop.f32.mrf.mxu3 }
 0x266   :  { %4016 = vst [vmem:[%s5242_s3 + $0x1d0] sm:$0xff] %v3652_v55   ;;  %v1880_v59 = vadd.f32 %v5170_v10, %v1879_v57  ;;  %v1427_v60 = vpop.f32.mrf.mxu0 }
 0x267   :  { %v2063_v62 = vmax.f32 %v1725_v56, 0.0  ;;  %v1577_v63 = vpop.f32.mrf.mxu1  ;;  %v1428_v3 = vadd.f32 %v5170_v10, %v1427_v60 }
 0x268   :  { %v2125_v0 = vmax.f32 %v1880_v59, 0.0  ;;  %v1578_v5 = vadd.f32 %v5170_v10, %v1577_v63 }
 0x269   :  { %v3802_v1 = vpack.c.bf16 %v2063_v62, %v2062_v61  ;;  %v1944_v9 = vmax.f32 %v1428_v3, 0.0 }
 0x26a   :  { %v3957_v2 = vpack.c.bf16 %v2125_v0, %v2124_v58  ;;  %v2004_v49 = vmax.f32 %v1578_v5, 0.0 }
 0x26b   :  { %4046 = vst [vmem:[%s5242_s3 + $0x2c0] sm:$0xff] %v3802_v1  }
 0x26c   :  { %v1727_v4 = vpop.f32.mrf.mxu2  ;;  %4077 = vst [vmem:[%s5242_s3 + $0x3b8] sm:$0xff] %v3957_v2  }
 0x26d   :  { %v1882_v6 = vpop.f32.mrf.mxu3  ;;  %v1728_v18 = vadd.f32 %v5170_v10, %v1727_v4 }
 0x26e   :  { %v1883_v7 = vadd.f32 %v5170_v10, %v1882_v6  ;;  %v1429_v8 = vpop.f32.mrf.mxu0 }
 0x26f   :  { %v1430_v11 = vadd.f32 %v5170_v10, %v1429_v8  ;;  %v1579_v12 = vpop.f32.mrf.mxu1  ;;  %v2064_v24 = vmax.f32 %v1728_v18, 0.0 }
 0x270   :  { %v2126_v13 = vmax.f32 %v1883_v7, 0.0  ;;  %v1580_v14 = vadd.f32 %v5170_v10, %v1579_v12 }
 0x271   :  { %v1945_v15 = vmax.f32 %v1430_v11, 0.0 }
 0x272   :  { %v2367_v16 = vpack.c.bf16 %v2126_v13, %v2126_v13  ;;  %v2005_v17 = vmax.f32 %v1580_v14, 0.0 }
 0x273   :  { %v3507_v19 = vpack.c.bf16 %v1945_v15, %v1944_v9 }
 0x274   :  { %v1729_v20 = vpop.f32.mrf.mxu2  ;;  %2608 = vst [vmem:[%s5242_s3 + $0x3c0] sm:$0x1] %v2367_v16  ;;  %v3657_v21 = vpack.c.bf16 %v2005_v17, %v2004_v49 }
 0x275   :  { %v1730_v22 = vadd.f32 %v5170_v10, %v1729_v20  ;;  %3987 = vst [vmem:[%s5242_s3 + $0xe8] sm:$0xff] %v3507_v19   ;;  %v1884_v23 = vpop.f32.mrf.mxu3 }
 0x276   :  { %4017 = vst [vmem:[%s5242_s3 + $0x1d8] sm:$0xff] %v3657_v21  }
 0x277   :  { %v2065_v25 = vmax.f32 %v1730_v22, 0.0 }
 0x279   :  { %v3807_v26 = vpack.c.bf16 %v2065_v25, %v2064_v24 }
 0x27b   :  { %4047 = vst [vmem:[%s5242_s3 + $0x2c8] sm:$0xff] %v3807_v26  }
 0x27c   :  { %v1732_v27 = vpop.f32.mrf.mxu2 }
 0x27d   :  { %v1733_v28 = vadd.f32 %v5170_v10, %v1732_v27 }
 0x27f   :  { %v2066_v31 = vmax.f32 %v1733_v28, 0.0 }
 0x284   :  { %v1734_v29 = vpop.f32.mrf.mxu2 }
 0x285   :  { %v1735_v30 = vadd.f32 %v5170_v10, %v1734_v29 }
 0x287   :  { %v2067_v32 = vmax.f32 %v1735_v30, 0.0 }
 0x289   :  { %v3812_v33 = vpack.c.bf16 %v2067_v32, %v2066_v31 }
 0x28b   :  { %4048 = vst [vmem:[%s5242_s3 + $0x2d0] sm:$0xff] %v3812_v33  }

// kernel: cnn_driver_forward.7
= control target key start
LH: loop header
LB: loop body
LE: loop exit
PB: predicated region body
PF: predicated region fallthrough
CT: control target
= control target key end

     0   :  { %vm1159_vm0 = vcmask 1043456   ;;  %vm1083_vm1 = vcmask 719872   ;;  %s4246_s1 = inlined_call_operand.vmem [shape: bf16[600,128], index: 1, kind: input, shape index: {}]   ;;  %s4247_s2 = inlined_call_operand.vmem [shape: f32[1,128], index: 2, kind: input, shape index: {}]   ;;  %s4248_s0 = inlined_call_operand.vmem [shape: bf16[392,600], index: 0, kind: input, shape index: {}]   ;;  %s4249_s3 = inlined_call_operand.vmem [shape: bf16[392,128], index: 3, kind: output, shape index: {}]  }
   0x1   :  { %v2759_v0 = vld [vmem:[%s4246_s1 + $0x38] sm:$0xff]  ;;  %v2758_v1 = vld [vmem:[%s4246_s1 + $0x30] sm:$0xff]  ;;  %v2757_v2 = vld [vmem:[%s4246_s1 + $0x28] sm:$0xff] }
   0x2   :  { %2932 = vmatpush.bf16.msra.mxu1 %v2759_v0  ;;  %2933 = vmatpush.bf16.msra.mxu2 %v2759_v0  ;;  %v2756_v3 = vld [vmem:[%s4246_s1 + $0x20] sm:$0xff]  ;;  %v2755_v4 = vld [vmem:[%s4246_s1 + $0x18] sm:$0xff]  ;;  %v2754_v5 = vld [vmem:[%s4246_s1 + $0x10] sm:$0xff] }
   0x3   :  { %1163 = vmatpush.bf16.msra.mxu0 %v2759_v0  ;;  %2934 = vmatpush.bf16.msra.mxu3 %v2759_v0  ;;  %v236_v6 = vld [vmem:[%s4246_s1 + $0x128] sm:$0xf]  ;;  %v2752_v9 = vld [vmem:[%s4246_s1] sm:$0xff]  ;;  %v2121_v10 = vld [vmem:[%s4248_s0 + $0x118] sm:$0xf] }
   0x4   :  { %v1007_v7 = vunpack.c.l.b16 %v236_v6  ;;  %v2753_v8 = vld [vmem:[%s4246_s1 + $0x8] sm:$0xff]  ;;  %v2261_v13 = vld [vmem:[%s4248_s0 + $0x230] sm:$0xf]  ;;  %v2704_v14 = vld [vmem:[%s4248_s0 + $0x240] sm:$0xf0] }
   0x5   :  { %v2669_v12 = vld [vmem:[%s4248_s0 + $0x128] sm:$0xf0]  ;;  %v2775_v15 = vld [vmem:[%s4246_s1 + $0xb8] sm:$0xff]  ;;  %v1981_v16 = vld [vmem:[%s4248_s0] sm:$0xf]  ;;  %v2262_v20 = vor.u32 %v2704_v14, %v2261_v13 }
   0x6   :  { %2935 = vmatpush.bf16.msra.mxu1 %v2758_v1  ;;  %2936 = vmatpush.bf16.msra.mxu2 %v2758_v1  ;;  %v1045_v11 = vpack.c.b16 %v1007_v7, %v1007_v7  ;;  %v2634_v17 = vld [vmem:[%s4248_s0 + $0x10] sm:$0xf0]  ;;  %v2767_v18 = vld [vmem:[%s4246_s1 + $0x78] sm:$0xff]  ;;  %v2122_v19 = vor.u32 %v2669_v12, %v2121_v10  ;;  %v2788_v25 = vld [vmem:[%s4246_s1 + $0x120] sm:$0xff] }
   0x7   :  { %1164 = vmatpush.bf16.msra.mxu0 %v2758_v1  ;;  %2937 = vmatpush.bf16.msra.mxu3 %v2758_v1  ;;  %v1982_v22 = vor.u32 %v2634_v17, %v1981_v16  ;;  %v2774_v23 = vld [vmem:[%s4246_s1 + $0xb0] sm:$0xff]  ;;  %v2401_v26 = vld [vmem:[%s4248_s0 + $0x348] sm:$0xf]  ;;  %v2739_v27 = vld [vmem:[%s4248_s0 + $0x358] sm:$0xf0] }
   0x8   :  { %v1161_v21 = vsel %vm1159_vm0, %v1045_v11, 0  ;;  %v2766_v24 = vld [vmem:[%s4246_s1 + $0x70] sm:$0xff]  ;;  %v2773_v28 = vld [vmem:[%s4246_s1 + $0xa8] sm:$0xff]  ;;  %v2402_v29 = vor.u32 %v2739_v27, %v2401_v26  ;;  %v2787_v31 = vld [vmem:[%s4246_s1 + $0x118] sm:$0xff] }
   0x9   :  { %v2765_v30 = vld [vmem:[%s4246_s1 + $0x68] sm:$0xff]  ;;  %v2772_v32 = vld [vmem:[%s4246_s1 + $0xa0] sm:$0xff]  ;;  %v2674_v35 = vld [vmem:[%s4248_s0 + $0x150] sm:$0xf0] }
   0xa   :  { %2938 = vmatpush.bf16.msra.mxu1 %v2757_v2  ;;  %2939 = vmatpush.bf16.msra.mxu2 %v2757_v2  ;;  %v2764_v33 = vld [vmem:[%s4246_s1 + $0x60] sm:$0xff]  ;;  %v2281_v36 = vld [vmem:[%s4248_s0 + $0x258] sm:$0xf]  ;;  %v2709_v37 = vld [vmem:[%s4248_s0 + $0x268] sm:$0xf0] }
   0xb   :  { %1165 = vmatpush.bf16.msra.mxu0 %v2757_v2  ;;  %2940 = vmatpush.bf16.msra.mxu3 %v2757_v2  ;;  %v2141_v34 = vld [vmem:[%s4248_s0 + $0x140] sm:$0xf]  ;;  %v2001_v38 = vld [vmem:[%s4248_s0 + $0x28] sm:$0xf]  ;;  %v2639_v39 = vld [vmem:[%s4248_s0 + $0x38] sm:$0xf0]  ;;  %v2282_v41 = vor.u32 %v2709_v37, %v2281_v36 }
   0xc   :  { %v2142_v40 = vor.u32 %v2674_v35, %v2141_v34  ;;  %v2002_v42 = vor.u32 %v2639_v39, %v2001_v38  ;;  %v2783_v43 = vld [vmem:[%s4246_s1 + $0xf8] sm:$0xff]  ;;  %v2421_v45 = vld [vmem:[%s4248_s0 + $0x370] sm:$0xf]  ;;  %v2744_v46 = vld [vmem:[%s4248_s0 + $0x380] sm:$0xf0] }
   0xd   :  { %v2771_v44 = vld [vmem:[%s4246_s1 + $0x98] sm:$0xff]  ;;  %v2422_v48 = vor.u32 %v2744_v46, %v2421_v45  ;;  %v2782_v49 = vld [vmem:[%s4246_s1 + $0xf0] sm:$0xff]  ;;  %v2161_v50 = vld [vmem:[%s4248_s0 + $0x168] sm:$0xf] }
   0xe   :  { %2941 = vmatpush.bf16.msra.mxu1 %v2756_v3  ;;  %2942 = vmatpush.bf16.msra.mxu2 %v2756_v3  ;;  %v2763_v47 = vld [vmem:[%s4246_s1 + $0x58] sm:$0xff]  ;;  %v2301_v52 = vld [vmem:[%s4248_s0 + $0x280] sm:$0xf]  ;;  %v2714_v53 = vld [vmem:[%s4248_s0 + $0x290] sm:$0xf0] }
   0xf   :  { %1166 = vmatpush.bf16.msra.mxu0 %v2756_v3  ;;  %2943 = vmatpush.bf16.msra.mxu3 %v2756_v3  ;;  %v2679_v51 = vld [vmem:[%s4248_s0 + $0x178] sm:$0xf0]  ;;  %v2021_v54 = vld [vmem:[%s4248_s0 + $0x50] sm:$0xf]  ;;  %v2644_v55 = vld [vmem:[%s4248_s0 + $0x60] sm:$0xf0]  ;;  %v2302_v57 = vor.u32 %v2714_v53, %v2301_v52 }
  0x10   :  { %v2162_v56 = vor.u32 %v2679_v51, %v2161_v50  ;;  %v2022_v58 = vor.u32 %v2644_v55, %v2021_v54  ;;  %v2786_v59 = vld [vmem:[%s4246_s1 + $0x110] sm:$0xff]  ;;  %v2781_v60 = vld [vmem:[%s4246_s1 + $0xe8] sm:$0xff]  ;;  %v2441_v62 = vld [vmem:[%s4248_s0 + $0x398] sm:$0xf] }
  0x11   :  { %v2770_v61 = vld [vmem:[%s4246_s1 + $0x90] sm:$0xff]  ;;  %v2749_v63 = vld [vmem:[%s4248_s0 + $0x3a8] sm:$0xf0]  ;;  %v2780_v2 = vld [vmem:[%s4246_s1 + $0xe0] sm:$0xff] }
  0x12   :  { %2944 = vmatpush.bf16.msra.mxu1 %v2755_v4  ;;  %2945 = vmatpush.bf16.msra.mxu2 %v2755_v4  ;;  %v2762_v0 = vld [vmem:[%s4246_s1 + $0x50] sm:$0xff]  ;;  %v2442_v1 = vor.u32 %v2749_v63, %v2441_v62  ;;  %v2719_v6 = vld [vmem:[%s4248_s0 + $0x2b8] sm:$0xf0]  ;;  %v2041_v7 = vld [vmem:[%s4248_s0 + $0x78] sm:$0xf] }
  0x13   :  { %1167 = vmatpush.bf16.msra.mxu0 %v2755_v4  ;;  %2946 = vmatpush.bf16.msra.mxu3 %v2755_v4  ;;  %v2181_v3 = vld [vmem:[%s4248_s0 + $0x190] sm:$0xf]  ;;  %v2684_v4 = vld [vmem:[%s4248_s0 + $0x1a0] sm:$0xf0]  ;;  %v2779_v12 = vld [vmem:[%s4246_s1 + $0xd8] sm:$0xff] }
  0x14   :  { %v2769_v13 = vld [vmem:[%s4246_s1 + $0x88] sm:$0xff]  ;;  %v159_v16 = vld [vmem:[%s4248_s0 + $0x3c0] sm:$0xff]  ;;  %v2694_v38 = vld [vmem:[%s4248_s0 + $0x1f0] sm:$0xf0] }
  0x15   :  { %v2785_v14 = vld [vmem:[%s4246_s1 + $0x108] sm:$0xff]  ;;  %v628_v17 = vunpack.c.l.b16 %v159_v16  ;;  %v1991_v35 = vld [vmem:[%s4248_s0 + $0x1c] sm:$0xf0]  ;;  %v2361_v39 = vld [vmem:[%s4248_s0 + $0x2f8] sm:$0xf] }
  0x16   :  { %2947 = vmatpush.bf16.msra.mxu1 %v2754_v5  ;;  %2948 = vmatpush.bf16.msra.mxu2 %v2754_v5  ;;  %v2633_v34 = vld [vmem:[%s4248_s0 + $0xc] sm:$0xf]  ;;  %v2221_v37 = vld [vmem:[%s4248_s0 + $0x1e0] sm:$0xf]  ;;  %v2638_v46 = vld [vmem:[%s4248_s0 + $0x34] sm:$0xf] }
  0x17   :  { %1168 = vmatpush.bf16.msra.mxu0 %v2754_v5  ;;  %2949 = vmatpush.bf16.msra.mxu3 %v2754_v5  ;;  %v2321_v5 = vld [vmem:[%s4248_s0 + $0x2a8] sm:$0xf]  ;;  %v1994_v36 = vor.u32 %v2633_v34, %v1991_v35  ;;  %v2699_v50 = vld [vmem:[%s4248_s0 + $0x218] sm:$0xf0]  ;;  %v2381_v51 = vld [vmem:[%s4248_s0 + $0x320] sm:$0xf] }
  0x18   :  { %v2322_v10 = vor.u32 %v2719_v6, %v2321_v5  ;;  %v2734_v52 = vld [vmem:[%s4248_s0 + $0x330] sm:$0xf0]  ;;  %v2101_v53 = vld [vmem:[%s4248_s0 + $0xf0] sm:$0xf]  ;;  %v2664_v54 = vld [vmem:[%s4248_s0 + $0x100] sm:$0xf0] }
  0x19   :  { %v1983_v62 = vld [vmem:[%s4248_s0 + $0x14] sm:$0xf0]  ;;  %v1989_v63 = vld [vmem:[%s4248_s0 + $0x8] sm:$0xf]  ;;  %v2648_v6 = vld [vmem:[%s4248_s0 + $0x84] sm:$0xf] }
  0x1a   :  { %2950 = vmatpush.bf16.msra.mxu1 %v2753_v8  ;;  %2951 = vmatpush.bf16.msra.mxu2 %v2753_v8 }
  0x1b   :  { %1169 = vmatpush.bf16.msra.mxu0 %v2753_v8  ;;  %2952 = vmatpush.bf16.msra.mxu3 %v2753_v8  ;;  %v2649_v8 = vld [vmem:[%s4248_s0 + $0x88] sm:$0xf0] }
  0x1c   :  { %v2042_v11 = vor.u32 %v2649_v8, %v2041_v7  ;;  %v2051_v7 = vld [vmem:[%s4248_s0 + $0x94] sm:$0xf0]  ;;  %v2637_v8 = vld [vmem:[%s4248_s0 + $0x2c] sm:$0xf] }
  0x1e   :  { %2953 = vmatpush.bf16.msra.mxu1 %v2752_v9  ;;  %2954 = vmatpush.bf16.msra.mxu2 %v2752_v9 }
  0x1f   :  { %1170 = vmatpush.bf16.msra.mxu0 %v2752_v9  ;;  %2955 = vmatpush.bf16.msra.mxu3 %v2752_v9  ;;  %v2182_v9 = vor.u32 %v2684_v4, %v2181_v3 }
  0x21   :  { %1206 = vmatmul.bf16.vlgmr.msra.gmra.mxu1 %v2122_v19  ;;  %1241 = vmatmul.bf16.vlgmr.msra.gmra.mxu2 %v2262_v20  ;;  %v753_v19 = vpack.c.b16 %v628_v17, %v628_v17  ;;  %v2201_v20 = vld [vmem:[%s4248_s0 + $0x1b8] sm:$0xf] }
  0x22   :  { %1429 = vmatpush.bf16.msrb.mxu2 %v2775_v15  ;;  %1296 = vmatpush.bf16.msrb.mxu1 %v2767_v18  ;;  %v2761_v15 = vld [vmem:[%s4246_s1 + $0x48] sm:$0xff]  ;;  %v2778_v18 = vld [vmem:[%s4246_s1 + $0xd0] sm:$0xff] }
  0x23   :  { %1697 = vmatpush.bf16.msrb.mxu0 %v1161_v21  ;;  %1276 = vmatmul.bf16.vlgmr.msra.gmra.mxu3 %v2402_v29  ;;  %v2689_v21 = vld [vmem:[%s4248_s0 + $0x1c8] sm:$0xf0]  ;;  %v2768_v29 = vld [vmem:[%s4246_s1 + $0x80] sm:$0xff] }
  0x24   :  { %1171 = vmatmul.bf16.vlgmr.msra.gmra.mxu0 %v1982_v22  ;;  %1562 = vmatpush.bf16.msrb.mxu3 %v2783_v43  ;;  %v2341_v22 = vld [vmem:[%s4248_s0 + $0x2d0] sm:$0xf]  ;;  %v2202_v26 = vor.u32 %v2689_v21, %v2201_v20  ;;  %v2222_v43 = vor.u32 %v2694_v38, %v2221_v37 }
  0x26   :  { %1430 = vmatpush.bf16.msrb.mxu2 %v2774_v23  ;;  %1297 = vmatpush.bf16.msrb.mxu1 %v2766_v24  ;;  %v2724_v23 = vld [vmem:[%s4248_s0 + $0x2e0] sm:$0xf0]  ;;  %v2061_v24 = vld [vmem:[%s4248_s0 + $0xa0] sm:$0xf] }
  0x27   :  { %1698 = vmatpush.bf16.msrb.mxu0 %v2788_v25  ;;  %v2654_v25 = vld [vmem:[%s4248_s0 + $0xb0] sm:$0xf0]  ;;  %v2342_v27 = vor.u32 %v2724_v23, %v2341_v22  ;;  %v2653_v23 = vld [vmem:[%s4248_s0 + $0xac] sm:$0xf] }
  0x28   :  { %1563 = vmatpush.bf16.msrb.mxu3 %v2782_v49  ;;  %v2241_v49 = vld [vmem:[%s4248_s0 + $0x208] sm:$0xf] }
  0x29   :  { %v2242_v55 = vor.u32 %v2699_v50, %v2241_v49  ;;  %v2650_v49 = vld [vmem:[%s4248_s0 + $0x90] sm:$0xf0]  ;;  %v2057_v50 = vld [vmem:[%s4248_s0 + $0x88] sm:$0xf] }
  0x2a   :  { %1431 = vmatpush.bf16.msrb.mxu2 %v2773_v28  ;;  %1298 = vmatpush.bf16.msrb.mxu1 %v2765_v30  ;;  %v2062_v28 = vor.u32 %v2654_v25, %v2061_v24  ;;  %v2777_v30 = vld [vmem:[%s4246_s1 + $0xc8] sm:$0xff]  ;;  %v2071_v24 = vld [vmem:[%s4248_s0 + $0xbc] sm:$0xf0]  ;;  %v2642_v25 = vld [vmem:[%s4248_s0 + $0x54] sm:$0xf] }
  0x2b   :  { %1699 = vmatpush.bf16.msrb.mxu0 %v2787_v31  ;;  %v2760_v31 = vld [vmem:[%s4246_s1 + $0x40] sm:$0xff] }
  0x2c   :  { %1564 = vmatpush.bf16.msrb.mxu3 %v2781_v60  ;;  %v2632_v60 = vld [vmem:[%s4248_s0 + $0x4] sm:$0xf] }
  0x2d   :  { %v1986_v3 = vor.u32 %v2632_v60, %v1983_v62 }
  0x2e   :  { %1432 = vmatpush.bf16.msrb.mxu2 %v2772_v32  ;;  %1299 = vmatpush.bf16.msrb.mxu1 %v2764_v33  ;;  %v2784_v32 = vld [vmem:[%s4246_s1 + $0x100] sm:$0xff] }
  0x2f   :  { %1700 = vmatpush.bf16.msrb.mxu0 %v2786_v59  ;;  %v2776_v33 = vld [vmem:[%s4246_s1 + $0xc0] sm:$0xff]  ;;  %v2031_v59 = vld [vmem:[%s4248_s0 + $0x6c] sm:$0xf0] }
  0x30   :  { %1565 = vmatpush.bf16.msrb.mxu3 %v2780_v2  ;;  %v2636_v2 = vld [vmem:[%s4248_s0 + $0x20] sm:$0xf0] }
  0x31   :  { %1211 = vmatmul.bf16.gmra.mxu1 %v2142_v40  ;;  %1246 = vmatmul.bf16.gmra.mxu2 %v2282_v41  ;;  %v2729_v40 = vld [vmem:[%s4248_s0 + $0x308] sm:$0xf0]  ;;  %v2081_v41 = vld [vmem:[%s4248_s0 + $0xc8] sm:$0xf] }
  0x32   :  { %1433 = vmatpush.bf16.msrb.mxu2 %v2771_v44  ;;  %1300 = vmatpush.bf16.msrb.mxu1 %v2763_v47  ;;  %v2362_v44 = vor.u32 %v2729_v40, %v2361_v39  ;;  %v2011_v47 = vld [vmem:[%s4248_s0 + $0x44] sm:$0xf0] }
  0x33   :  { %1281 = vmatmul.bf16.gmra.mxu3 %v2422_v48  ;;  %1701 = vmatpush.bf16.msrb.mxu0 %v2785_v14  ;;  %v2014_v48 = vor.u32 %v2638_v46, %v2011_v47  ;;  %v2641_v14 = vld [vmem:[%s4248_s0 + $0x48] sm:$0xf0]  ;;  %v2043_v47 = vld [vmem:[%s4248_s0 + $0x8c] sm:$0xf0] }
  0x34   :  { %1176 = vmatmul.bf16.gmra.mxu0 %v2002_v42  ;;  %1566 = vmatpush.bf16.msrb.mxu3 %v2779_v12  ;;  %v2659_v42 = vld [vmem:[%s4248_s0 + $0xd8] sm:$0xf0]  ;;  %v2640_v12 = vld [vmem:[%s4248_s0 + $0x40] sm:$0xf0] }
  0x35   :  { %v2082_v45 = vor.u32 %v2659_v42, %v2081_v41 }
  0x36   :  { %1434 = vmatpush.bf16.msrb.mxu2 %v2770_v61  ;;  %1301 = vmatpush.bf16.msrb.mxu1 %v2762_v0  ;;  %v2635_v0 = vld [vmem:[%s4248_s0 + $0x18] sm:$0xf0] }
  0x37   :  { %1702 = vmatpush.bf16.msrb.mxu0 %v2784_v32  ;;  %v1990_v4 = vor.u32 %v2635_v0, %v1989_v63  ;;  %v2663_v63 = vld [vmem:[%s4248_s0 + $0xfc] sm:$0xf]  ;;  %v2111_v0 = vld [vmem:[%s4248_s0 + $0x10c] sm:$0xf0] }
  0x38   :  { %1567 = vmatpush.bf16.msrb.mxu3 %v2778_v18 }
  0x3a   :  { %1435 = vmatpush.bf16.msrb.mxu2 %v2769_v13  ;;  %1302 = vmatpush.bf16.msrb.mxu1 %v2761_v15  ;;  %v2017_v13 = vld [vmem:[%s4248_s0 + $0x38] sm:$0xf] }
  0x3b   :  { %v2018_v18 = vor.u32 %v2641_v14, %v2017_v13 }
  0x3c   :  { %1568 = vmatpush.bf16.msrb.mxu3 %v2777_v30  ;;  %v2037_v30 = vld [vmem:[%s4248_s0 + $0x60] sm:$0xf] }
  0x3e   :  { %1436 = vmatpush.bf16.msrb.mxu2 %v2768_v29  ;;  %1303 = vmatpush.bf16.msrb.mxu1 %v2760_v31  ;;  %v2645_v29 = vld [vmem:[%s4248_s0 + $0x68] sm:$0xf0]  ;;  %v2646_v31 = vld [vmem:[%s4248_s0 + $0x70] sm:$0xf0] }
  0x40   :  { %1569 = vmatpush.bf16.msrb.mxu3 %v2776_v33 }
  0x41   :  { %1216 = vmatmul.bf16.gmra.mxu1 %v2162_v56  ;;  %1251 = vmatmul.bf16.gmra.mxu2 %v2302_v57  ;;  %v2382_v56 = vor.u32 %v2734_v52, %v2381_v51  ;;  %v2102_v57 = vor.u32 %v2664_v54, %v2101_v53  ;;  %v2651_v51 = vld [vmem:[%s4248_s0 + $0x98] sm:$0xf0] }
  0x43   :  { %1286 = vmatmul.bf16.gmra.mxu3 %v2442_v1  ;;  %v1997_v1 = vld [vmem:[%s4248_s0 + $0x10] sm:$0xf] }
  0x44   :  { %1181 = vmatmul.bf16.gmra.mxu0 %v2022_v58  ;;  %v2643_v58 = vld [vmem:[%s4248_s0 + $0x5c] sm:$0xf]  ;;  %v1998_v5 = vor.u32 %v2636_v2, %v1997_v1  ;;  %v2652_v1 = vld [vmem:[%s4248_s0 + $0xa4] sm:$0xf]  ;;  %v2114_v2 = vor.u32 %v2663_v63, %v2111_v0  ;;  %v2103_v0 = vld [vmem:[%s4248_s0 + $0x104] sm:$0xf0] }
  0x45   :  { %v2034_v61 = vor.u32 %v2643_v58, %v2031_v59 }
  0x51   :  { %1221 = vmatmul.bf16.gmra.mxu1 %v2182_v9  ;;  %1256 = vmatmul.bf16.gmra.mxu2 %v2322_v10  ;;  %v2054_v9 = vor.u32 %v2648_v6, %v2051_v7  ;;  %v2003_v10 = vld [vmem:[%s4248_s0 + $0x3c] sm:$0xf0]  ;;  %v2077_v6 = vld [vmem:[%s4248_s0 + $0xb0] sm:$0xf]  ;;  %v2656_v7 = vld [vmem:[%s4248_s0 + $0xc0] sm:$0xf0] }
  0x52   :  { %v2006_v15 = vor.u32 %v2637_v8, %v2003_v10 }
  0x53   :  { %1291 = vmatmul.bf16.gmra.mxu3 %v753_v19 }
  0x54   :  { %1186 = vmatmul.bf16.gmra.mxu0 %v2042_v11  ;;  %v2009_v11 = vld [vmem:[%s4248_s0 + $0x30] sm:$0xf] }
  0x55   :  { %v2010_v16 = vor.u32 %v2640_v12, %v2009_v11  ;;  %v2078_v12 = vor.u32 %v2656_v7, %v2077_v6 }
  0x61   :  { %1226 = vmatmul.bf16.gmra.mxu1 %v2202_v26  ;;  %1261 = vmatmul.bf16.gmra.mxu2 %v2342_v27  ;;  %v2074_v26 = vor.u32 %v2653_v23, %v2071_v24  ;;  %v2023_v27 = vld [vmem:[%s4248_s0 + $0x64] sm:$0xf0]  ;;  %v2668_v24 = vld [vmem:[%s4248_s0 + $0x124] sm:$0xf] }
  0x62   :  { %v2026_v33 = vor.u32 %v2642_v25, %v2023_v27  ;;  %v2131_v25 = vld [vmem:[%s4248_s0 + $0x134] sm:$0xf0] }
  0x63   :  { %1570 = vmatmul.bf16.vlgmr.msrb.gmra.mxu3 %v1994_v36  ;;  %v2038_v36 = vor.u32 %v2646_v31, %v2037_v30  ;;  %v2134_v27 = vor.u32 %v2668_v24, %v2131_v25  ;;  %v2660_v30 = vld [vmem:[%s4248_s0 + $0xe0] sm:$0xf0]  ;;  %v2097_v31 = vld [vmem:[%s4248_s0 + $0xd8] sm:$0xf] }
  0x64   :  { %1191 = vmatmul.bf16.gmra.mxu0 %v2062_v28  ;;  %v2029_v28 = vld [vmem:[%s4248_s0 + $0x58] sm:$0xf] }
  0x65   :  { %v2030_v34 = vor.u32 %v2645_v29, %v2029_v28  ;;  %v2083_v28 = vld [vmem:[%s4248_s0 + $0xdc] sm:$0xf0]  ;;  %v2089_v29 = vld [vmem:[%s4248_s0 + $0xd0] sm:$0xf] }
  0x71   :  { %1231 = vmatmul.bf16.gmra.mxu1 %v2222_v43  ;;  %1266 = vmatmul.bf16.gmra.mxu2 %v2362_v44  ;;  %v2658_v43 = vld [vmem:[%s4248_s0 + $0xd4] sm:$0xf]  ;;  %v2091_v44 = vld [vmem:[%s4248_s0 + $0xe4] sm:$0xf0] }
  0x72   :  { %v2094_v46 = vor.u32 %v2658_v43, %v2091_v44  ;;  %v2090_v43 = vor.u32 %v2660_v30, %v2089_v29  ;;  %v2678_v29 = vld [vmem:[%s4248_s0 + $0x174] sm:$0xf]  ;;  %v2171_v30 = vld [vmem:[%s4248_s0 + $0x184] sm:$0xf0] }
  0x73   :  { %1575 = vmatmul.bf16.gmra.mxu3 %v2014_v48  ;;  %v2049_v48 = vld [vmem:[%s4248_s0 + $0x80] sm:$0xf] }
  0x74   :  { %1196 = vmatmul.bf16.gmra.mxu0 %v2082_v45  ;;  %v2647_v45 = vld [vmem:[%s4248_s0 + $0x7c] sm:$0xf]  ;;  %v2050_v54 = vor.u32 %v2650_v49, %v2049_v48 }
  0x75   :  { %v2046_v53 = vor.u32 %v2647_v45, %v2043_v47 }
  0x81   :  { %1236 = vmatmul.bf16.gmra.mxu1 %v2242_v55  ;;  %1271 = vmatmul.bf16.gmra.mxu2 %v2382_v56  ;;  %v2058_v56 = vor.u32 %v2651_v51, %v2057_v50 }
  0x83   :  { %1580 = vmatmul.bf16.gmra.mxu3 %v2034_v61 }
  0x84   :  { %1201 = vmatmul.bf16.gmra.mxu0 %v2102_v57 }
  0x91   :  { %1304 = vmatmul.bf16.vlgmr.msrb.gmra.mxu1 %v1986_v3  ;;  %1437 = vmatmul.bf16.vlgmr.msrb.gmra.mxu2 %v1990_v4  ;;  %v2063_v3 = vld [vmem:[%s4248_s0 + $0xb4] sm:$0xf0]  ;;  %v2069_v4 = vld [vmem:[%s4248_s0 + $0xa8] sm:$0xf] }
  0x93   :  { %1585 = vmatmul.bf16.gmra.mxu3 %v2054_v9  ;;  %v2066_v9 = vor.u32 %v2652_v1, %v2063_v3  ;;  %v2109_v1 = vld [vmem:[%s4248_s0 + $0xf8] sm:$0xf]  ;;  %v2117_v3 = vld [vmem:[%s4248_s0 + $0x100] sm:$0xf] }
  0x94   :  { %2607 = vmatmul.msk.bf16.vlgmr.msrb.gmra.mxu0 %vm1083_vm1, %v1998_v5  ;;  %v2655_v5 = vld [vmem:[%s4248_s0 + $0xb8] sm:$0xf0] }
  0x95   :  { %v2070_v10 = vor.u32 %v2655_v5, %v2069_v4  ;;  %v2666_v4 = vld [vmem:[%s4248_s0 + $0x110] sm:$0xf0] }
  0x9e   :  { %v3301_v17 = vpop.f32.mrf.mxu1 }
  0xa1   :  { %v3303_v19 = vpop.f32.mrf.mxu0  ;;  %1309 = vmatmul.bf16.gmra.mxu1 %v2006_v15  ;;  %1442 = vmatmul.bf16.gmra.mxu2 %v2010_v16 }
  0xa3   :  { %1590 = vmatmul.bf16.gmra.mxu3 %v2074_v26  ;;  %v2657_v26 = vld [vmem:[%s4248_s0 + $0xcc] sm:$0xf] }
  0xa4   :  { %2608 = vmatmul.msk.bf16.gmra.mxu0 %vm1083_vm1, %v2018_v18  ;;  %v3306_v20 = vpop.f32.mrf.mxu2 }
  0xa6   :  { %v3308_v21 = vpop.f32.mrf.mxu1  ;;  %v3340_v37 = vpop.f32.mrf.mxu3 }
  0xa7   :  { %4250 = vst [vmem:[#allocation2_spill] sm:$0xff] %v3340_v37 }
  0xa9   :  { %v3310_v22 = vpop.f32.mrf.mxu0 }
  0xac   :  { %v3336_v32 = vpop.f32.mrf.mxu2 }
  0xae   :  { %v3338_v35 = vpop.f32.mrf.mxu1  ;;  %v3349_v41 = vpop.f32.mrf.mxu3 }
  0xaf   :  { %4251 = vst [vmem:[#allocation3_spill] sm:$0xff] %v3349_v41 }
  0xb1   :  { %v3342_v38 = vpop.f32.mrf.mxu0  ;;  %1314 = vmatmul.bf16.gmra.mxu1 %v2026_v33  ;;  %1447 = vmatmul.bf16.gmra.mxu2 %v2030_v34  ;;  %v2661_v33 = vld [vmem:[%s4248_s0 + $0xe8] sm:$0xf0] }
  0xb2   :  { %v2098_v45 = vor.u32 %v2661_v33, %v2097_v31  ;;  %v2667_v31 = vld [vmem:[%s4248_s0 + $0x11c] sm:$0xf]  ;;  %v2174_v33 = vor.u32 %v2678_v29, %v2171_v30  ;;  %v2191_v30 = vld [vmem:[%s4248_s0 + $0x1ac] sm:$0xf0] }
  0xb3   :  { %1595 = vmatmul.bf16.gmra.mxu3 %v2094_v46  ;;  %v2683_v29 = vld [vmem:[%s4248_s0 + $0x19c] sm:$0xf] }
  0xb4   :  { %2609 = vmatmul.msk.bf16.gmra.mxu0 %vm1083_vm1, %v2038_v36  ;;  %v3345_v39 = vpop.f32.mrf.mxu2  ;;  %v2086_v36 = vor.u32 %v2657_v26, %v2083_v28 }
  0xb6   :  { %v3347_v40 = vpop.f32.mrf.mxu1  ;;  %v3381_v57 = vpop.f32.mrf.mxu3 }
  0xb7   :  { %4252 = vst [vmem:[#allocation4_spill] sm:$0xff] %v3381_v57  ;;  %v2177_v57 = vld [vmem:[%s4248_s0 + $0x178] sm:$0xf] }
  0xb9   :  { %v3351_v42 = vpop.f32.mrf.mxu0 }
  0xbc   :  { %v3377_v52 = vpop.f32.mrf.mxu2 }
  0xbe   :  { %v3379_v55 = vpop.f32.mrf.mxu1  ;;  %v3390_v61 = vpop.f32.mrf.mxu3 }
  0xbf   :  { %4253 = vst [vmem:[#allocation5_spill] sm:$0xff] %v3390_v61 }
  0xc1   :  { %v3383_v58 = vpop.f32.mrf.mxu0  ;;  %1319 = vmatmul.bf16.gmra.mxu1 %v2046_v53  ;;  %1452 = vmatmul.bf16.gmra.mxu2 %v2050_v54  ;;  %v2673_v53 = vld [vmem:[%s4248_s0 + $0x14c] sm:$0xf]  ;;  %v2151_v54 = vld [vmem:[%s4248_s0 + $0x15c] sm:$0xf0] }
  0xc2   :  { %v2154_v63 = vor.u32 %v2673_v53, %v2151_v54  ;;  %v2671_v53 = vld [vmem:[%s4248_s0 + $0x138] sm:$0xf0] }
  0xc3   :  { %1600 = vmatmul.bf16.gmra.mxu3 %v2114_v2  ;;  %v2665_v2 = vld [vmem:[%s4248_s0 + $0x108] sm:$0xf0] }
  0xc4   :  { %2610 = vmatmul.msk.bf16.gmra.mxu0 %vm1083_vm1, %v2058_v56  ;;  %v3386_v59 = vpop.f32.mrf.mxu2  ;;  %v2662_v56 = vld [vmem:[%s4248_s0 + $0xf4] sm:$0xf]  ;;  %v2110_v7 = vor.u32 %v2665_v2, %v2109_v1 }
  0xc5   :  { %v2106_v6 = vor.u32 %v2662_v56, %v2103_v0 }
  0xc6   :  { %v3388_v60 = vpop.f32.mrf.mxu1  ;;  %v3422_v13 = vpop.f32.mrf.mxu3 }
  0xc7   :  { %4254 = vst [vmem:[#allocation6_spill] sm:$0xff] %v3422_v13  ;;  %v3587_v13 = vld [vmem:[%s4247_s2] ss:$0 sm:$0xff] }
  0xc9   :  { %v3392_v62 = vpop.f32.mrf.mxu0 }
  0xcc   :  { %v3418_v8 = vpop.f32.mrf.mxu2 }
  0xce   :  { %v3420_v11 = vpop.f32.mrf.mxu1  ;;  %v3431_v18 = vpop.f32.mrf.mxu3 }
  0xcf   :  { %4255 = vst [vmem:[#allocation7_spill] sm:$0xff] %v3431_v18 }
  0xd1   :  { %v3424_v14 = vpop.f32.mrf.mxu0  ;;  %1324 = vmatmul.bf16.gmra.mxu1 %v2066_v9  ;;  %1457 = vmatmul.bf16.gmra.mxu2 %v2070_v10  ;;  %v2118_v10 = vor.u32 %v2666_v4, %v2117_v3 }
  0xd3   :  { %1605 = vmatmul.bf16.gmra.mxu3 %v2134_v27 }
  0xd4   :  { %2611 = vmatmul.msk.bf16.gmra.mxu0 %vm1083_vm1, %v2078_v12  ;;  %v3427_v15 = vpop.f32.mrf.mxu2 }
  0xd6   :  { %v3429_v16 = vpop.f32.mrf.mxu1  ;;  %v3463_v46 = vpop.f32.mrf.mxu3 }
  0xd7   :  { %4256 = vst [vmem:[#allocation8_spill] sm:$0xff] %v3463_v46 }
  0xd9   :  { %v3433_v23 = vpop.f32.mrf.mxu0 }
  0xdc   :  { %v3459_v34 = vpop.f32.mrf.mxu2 }
  0xde   :  { %v3461_v44 = vpop.f32.mrf.mxu1  ;;  %v1294_v50 = vpop.f32.mrf.mxu3 }
  0xdf   :  { %v2137_v50 = vld [vmem:[%s4248_s0 + $0x128] sm:$0xf] }
  0xe0   :  { %v2138_v1 = vor.u32 %v2671_v53, %v2137_v50  ;;  %v2157_v50 = vld [vmem:[%s4248_s0 + $0x150] sm:$0xf]  ;;  %v2676_v53 = vld [vmem:[%s4248_s0 + $0x160] sm:$0xf0] }
  0xe1   :  { %v3465_v47 = vpop.f32.mrf.mxu0  ;;  %1329 = vmatmul.bf16.gmra.mxu1 %v2086_v36  ;;  %1462 = vmatmul.bf16.gmra.mxu2 %v2090_v43  ;;  %v2123_v36 = vld [vmem:[%s4248_s0 + $0x12c] sm:$0xf0]  ;;  %v2129_v43 = vld [vmem:[%s4248_s0 + $0x120] sm:$0xf] }
  0xe2   :  { %v2126_v56 = vor.u32 %v2667_v31, %v2123_v36  ;;  %v2672_v31 = vld [vmem:[%s4248_s0 + $0x144] sm:$0xf]  ;;  %v2143_v36 = vld [vmem:[%s4248_s0 + $0x154] sm:$0xf0] }
  0xe3   :  { %1610 = vmatmul.bf16.gmra.mxu3 %v2154_v63 }
  0xe4   :  { %2612 = vmatmul.msk.bf16.gmra.mxu0 %vm1083_vm1, %v2098_v45  ;;  %v3468_v48 = vpop.f32.mrf.mxu2  ;;  %v2670_v45 = vld [vmem:[%s4248_s0 + $0x130] sm:$0xf0] }
  0xe5   :  { %v2130_v63 = vor.u32 %v2670_v45, %v2129_v43  ;;  %v2149_v43 = vld [vmem:[%s4248_s0 + $0x148] sm:$0xf]  ;;  %v2675_v45 = vld [vmem:[%s4248_s0 + $0x158] sm:$0xf0] }
  0xe6   :  { %v3470_v49 = vpop.f32.mrf.mxu1  ;;  %v3502_v12 = vpop.f32.mrf.mxu3 }
  0xe9   :  { %v3472_v51 = vpop.f32.mrf.mxu0 }
  0xec   :  { %v3498_v5 = vpop.f32.mrf.mxu2 }
  0xed   :  { %4257 = vst [vmem:[#allocation9_spill] sm:$0xff] %v3498_v5 }
  0xee   :  { %v3500_v9 = vpop.f32.mrf.mxu1  ;;  %v3511_v27 = vpop.f32.mrf.mxu3 }
  0xf1   :  { %v3504_v24 = vpop.f32.mrf.mxu0  ;;  %1334 = vmatmul.bf16.gmra.mxu1 %v2106_v6  ;;  %1467 = vmatmul.bf16.gmra.mxu2 %v2110_v7 }
  0xf3   :  { %1615 = vmatmul.bf16.gmra.mxu3 %v2174_v33  ;;  %v2194_v33 = vor.u32 %v2683_v29, %v2191_v30  ;;  %v2158_v30 = vor.u32 %v2676_v53, %v2157_v50  ;;  %v2688_v53 = vld [vmem:[%s4248_s0 + $0x1c4] sm:$0xf] }
  0xf4   :  { %2613 = vmatmul.msk.bf16.gmra.mxu0 %vm1083_vm1, %v2118_v10  ;;  %v3507_v25 = vpop.f32.mrf.mxu2 }
  0xf5   :  { %4258 = vst [vmem:[#allocation10_spill] sm:$0xff] %v3507_v25 }
  0xf6   :  { %v3509_v26 = vpop.f32.mrf.mxu1  ;;  %v3543_v2 = vpop.f32.mrf.mxu3 }
  0xf9   :  { %v3513_v28 = vpop.f32.mrf.mxu0 }
  0xfc   :  { %v3539_v54 = vpop.f32.mrf.mxu2 }
  0xfd   :  { %4259 = vst [vmem:[#allocation11_spill] sm:$0xff] %v3539_v54 }
  0xfe   :  { %v3541_v0 = vpop.f32.mrf.mxu1  ;;  %v3552_v7 = vpop.f32.mrf.mxu3 }
 0x101   :  { %v3545_v3 = vpop.f32.mrf.mxu0  ;;  %1339 = vmatmul.bf16.gmra.mxu1 %v2126_v56  ;;  %1472 = vmatmul.bf16.gmra.mxu2 %v2130_v63  ;;  %v2146_v63 = vor.u32 %v2672_v31, %v2143_v36 }
 0x103   :  { %1620 = vmatmul.bf16.gmra.mxu3 %v2194_v33  ;;  %v1173_v33 = vadd.f32 %v3587_v13, %v3303_v19  ;;  %v2677_v19 = vld [vmem:[%s4248_s0 + $0x16c] sm:$0xf] }
 0x104   :  { %2614 = vmatmul.msk.bf16.gmra.mxu0 %vm1083_vm1, %v2138_v1  ;;  %v3548_v4 = vpop.f32.mrf.mxu2  ;;  %v2150_v1 = vor.u32 %v2675_v45, %v2149_v43 }
 0x105   :  { %4260 = vst [vmem:[#allocation12_spill] sm:$0xff] %v3548_v4 }
 0x106   :  { %v3550_v6 = vpop.f32.mrf.mxu1  ;;  %v3582_v46 = vpop.f32.mrf.mxu3 }
 0x109   :  { %v3554_v10 = vpop.f32.mrf.mxu0 }
 0x10c   :  { %v3580_v56 = vpop.f32.mrf.mxu2 }
 0x10d   :  { %4261 = vst [vmem:[#allocation13_spill] sm:$0xff] %v3580_v56 }
 0x10e   :  { %v1305_v29 = vpop.f32.mrf.mxu1  ;;  %v3592_v43 = vpop.f32.mrf.mxu3 }
 0x10f   :  { %v1306_v31 = vadd.f32 %v1305_v29, %v1173_v33  ;;  %v2680_v33 = vld [vmem:[%s4248_s0 + $0x180] sm:$0xf0] }
 0x111   :  { %v1704_v18 = vpop.f32.mrf.mxu0  ;;  %1344 = vmatmul.bf16.gmra.mxu1 %v2146_v63  ;;  %1477 = vmatmul.bf16.gmra.mxu2 %v2150_v1  ;;  %v2211_v63 = vld [vmem:[%s4248_s0 + $0x1d4] sm:$0xf0]  ;;  %v1175_v1 = vadd.f32 %v3587_v13, %v3310_v22 }
 0x112   :  { %v2214_v29 = vor.u32 %v2688_v53, %v2211_v63  ;;  %v2681_v53 = vld [vmem:[%s4248_s0 + $0x188] sm:$0xf0] }
 0x113   :  { %v2178_v54 = vor.u32 %v2681_v53, %v2177_v57  ;;  %v2197_v53 = vld [vmem:[%s4248_s0 + $0x1a0] sm:$0xf] }
 0x114   :  { %2615 = vmatmul.msk.bf16.gmra.mxu0 %vm1083_vm1, %v2158_v30  ;;  %v1438_v61 = vpop.f32.mrf.mxu2  ;;  %v2169_v30 = vld [vmem:[%s4248_s0 + $0x170] sm:$0xf]  ;;  %1625 = vmatmul.bf16.gmra.mxu3 %v2214_v29 }
 0x115   :  { %v1439_v45 = vadd.f32 %v1438_v61, %v1306_v31  ;;  %v2163_v61 = vld [vmem:[%s4248_s0 + $0x17c] sm:$0xf0]  ;;  %v2170_v56 = vor.u32 %v2680_v33, %v2169_v30 }
 0x116   :  { %v1307_v36 = vpop.f32.mrf.mxu1  ;;  %v2166_v37 = vor.u32 %v2677_v19, %v2163_v61  ;;  %v3621_v25 = vpop.f32.mrf.mxu3 }
 0x117   :  { %v1572_v31 = vadd.f32 %v3502_v12, %v1439_v45  ;;  %v1308_v22 = vadd.f32 %v1307_v36, %v1175_v1  ;;  %v1178_v1 = vadd.f32 %v3587_v13, %v3342_v38  ;;  %v2231_v38 = vld [vmem:[%s4248_s0 + $0x1fc] sm:$0xf0] }
 0x119   :  { %v1706_v50 = vpop.f32.mrf.mxu0  ;;  %v1705_v5 = vadd.f32 %v1704_v18, %v1572_v31  ;;  %v2693_v18 = vld [vmem:[%s4248_s0 + $0x1ec] sm:$0xf] }
 0x11b   :  { %v1828_v29 = vmax.f32 %v1705_v5, 0.0  ;;  %v1180_v5 = vadd.f32 %v3587_v13, %v3351_v42 }
 0x11c   :  { %v1440_v63 = vpop.f32.mrf.mxu2 }
 0x11d   :  { %v1441_v41 = vadd.f32 %v1440_v63, %v1308_v22  ;;  %v2686_v63 = vld [vmem:[%s4248_s0 + $0x1b0] sm:$0xf0] }
 0x11e   :  { %v1310_v4 = vpop.f32.mrf.mxu1  ;;  %v3627_v33 = vpop.f32.mrf.mxu3 }
 0x11f   :  { %v1574_v12 = vadd.f32 %v3511_v27, %v1441_v41  ;;  %v1311_v30 = vadd.f32 %v1310_v4, %v1178_v1  ;;  %v2682_v27 = vld [vmem:[%s4248_s0 + $0x194] sm:$0xf]  ;;  %v2183_v4 = vld [vmem:[%s4248_s0 + $0x1a4] sm:$0xf0] }
 0x120   :  { %v2186_v1 = vor.u32 %v2682_v27, %v2183_v4 }
 0x121   :  { %v1709_v36 = vpop.f32.mrf.mxu0  ;;  %v1707_v45 = vadd.f32 %v1706_v50, %v1574_v12  ;;  %1349 = vmatmul.bf16.gmra.mxu1 %v2166_v37  ;;  %1482 = vmatmul.bf16.gmra.mxu2 %v2170_v56  ;;  %v2189_v56 = vld [vmem:[%s4248_s0 + $0x198] sm:$0xf]  ;;  %v2685_v50 = vld [vmem:[%s4248_s0 + $0x1a8] sm:$0xf0] }
 0x123   :  { %v1829_v22 = vmax.f32 %v1707_v45, 0.0 }
 0x124   :  { %2616 = vmatmul.msk.bf16.gmra.mxu0 %vm1083_vm1, %v2178_v54  ;;  %v1443_v19 = vpop.f32.mrf.mxu2  ;;  %v2234_v54 = vor.u32 %v2693_v18, %v2231_v38  ;;  %v1183_v18 = vadd.f32 %v3587_v13, %v3383_v58  ;;  %v2251_v58 = vld [vmem:[%s4248_s0 + $0x224] sm:$0xf0] }
 0x125   :  { %v2792_v61 = vpack.c.bf16 %v1829_v22, %v1828_v29  ;;  %v1444_v41 = vadd.f32 %v1443_v19, %v1311_v30  ;;  %v2190_v29 = vor.u32 %v2685_v50, %v2189_v56  ;;  %v2198_v19 = vor.u32 %v2686_v63, %v2197_v53  ;;  %v2203_v63 = vld [vmem:[%s4248_s0 + $0x1cc] sm:$0xf0] }
 0x126   :  { %v1312_v57 = vpop.f32.mrf.mxu1  ;;  %1630 = vmatmul.bf16.gmra.mxu3 %v2234_v54 }
 0x127   :  { %2793 = vst [vmem:[%s4249_s3] sm:$0xff] %v2792_v61   ;;  %v1577_v31 = vadd.f32 %v3543_v2, %v1444_v41  ;;  %v1313_v42 = vadd.f32 %v1312_v57, %v1180_v5  ;;  %v3659_v61 = vpop.f32.mrf.mxu3 }
 0x129   :  { %v1711_v37 = vpop.f32.mrf.mxu0  ;;  %v1710_v30 = vadd.f32 %v1709_v36, %v1577_v31  ;;  %v1185_v31 = vadd.f32 %v3587_v13, %v3392_v62 }
 0x12b   :  { %v1830_v38 = vmax.f32 %v1710_v30, 0.0 }
 0x12c   :  { %v1445_v12 = vpop.f32.mrf.mxu2 }
 0x12d   :  { %v1446_v45 = vadd.f32 %v1445_v12, %v1313_v42  ;;  %v2687_v42 = vld [vmem:[%s4248_s0 + $0x1bc] sm:$0xf]  ;;  %v2209_v12 = vld [vmem:[%s4248_s0 + $0x1c0] sm:$0xf] }
 0x12e   :  { %v1315_v22 = vpop.f32.mrf.mxu1 }
 0x12f   :  { %v1579_v2 = vadd.f32 %v3552_v7, %v1446_v45  ;;  %v1316_v4 = vadd.f32 %v1315_v22, %v1183_v18  ;;  %v3665_v50 = vpop.f32.mrf.mxu3  ;;  %v2690_v45 = vld [vmem:[%s4248_s0 + $0x1d0] sm:$0xf0]  ;;  %v2691_v22 = vld [vmem:[%s4248_s0 + $0x1d8] sm:$0xf0] }
 0x131   :  { %v1714_v57 = vpop.f32.mrf.mxu0  ;;  %v1712_v41 = vadd.f32 %v1711_v37, %v1579_v2  ;;  %1354 = vmatmul.bf16.gmra.mxu1 %v2186_v1  ;;  %1487 = vmatmul.bf16.gmra.mxu2 %v2190_v29  ;;  %v2698_v37 = vld [vmem:[%s4248_s0 + $0x214] sm:$0xf]  ;;  %v2217_v29 = vld [vmem:[%s4248_s0 + $0x1c8] sm:$0xf]  ;;  %v2206_v2 = vor.u32 %v2687_v42, %v2203_v63 }
 0x132   :  { %v2254_v53 = vor.u32 %v2698_v37, %v2251_v58 }
 0x133   :  { %v1831_v5 = vmax.f32 %v1712_v41, 0.0  ;;  %v2210_v41 = vor.u32 %v2690_v45, %v2209_v12  ;;  %v1190_v12 = vadd.f32 %v3587_v13, %v3433_v23  ;;  %v2692_v45 = vld [vmem:[%s4248_s0 + $0x1e4] sm:$0xf] }
 0x134   :  { %2617 = vmatmul.msk.bf16.gmra.mxu0 %vm1083_vm1, %v2198_v19  ;;  %v1448_v27 = vpop.f32.mrf.mxu2 }
 0x135   :  { %v2797_v54 = vpack.c.bf16 %v1831_v5, %v1830_v38  ;;  %v1449_v7 = vadd.f32 %v1448_v27, %v1316_v4  ;;  %v2218_v38 = vor.u32 %v2691_v22, %v2217_v29  ;;  %v2229_v29 = vld [vmem:[%s4248_s0 + $0x1e8] sm:$0xf]  ;;  %v2695_v22 = vld [vmem:[%s4248_s0 + $0x1f8] sm:$0xf0] }
 0x136   :  { %v1317_v56 = vpop.f32.mrf.mxu1  ;;  %1635 = vmatmul.bf16.gmra.mxu3 %v2254_v53 }
 0x137   :  { %2909 = vst [vmem:[%s4249_s3 + $0x8] sm:$0xff] %v2797_v54   ;;  %v1582_v1 = vadd.f32 %v3582_v46, %v1449_v7  ;;  %v1318_v62 = vadd.f32 %v1317_v56, %v1185_v31  ;;  %v3697_v5 = vpop.f32.mrf.mxu3  ;;  %v1188_v56 = vadd.f32 %v3587_v13, %v3424_v14  ;;  %v2271_v14 = vld [vmem:[%s4248_s0 + $0x24c] sm:$0xf0] }
 0x139   :  { %v1716_v36 = vpop.f32.mrf.mxu0  ;;  %v1715_v27 = vadd.f32 %v1714_v57, %v1582_v1 }
 0x13b   :  { %v1832_v7 = vmax.f32 %v1715_v27, 0.0  ;;  %v2230_v27 = vor.u32 %v2695_v22, %v2229_v29  ;;  %v2243_v22 = vld [vmem:[%s4248_s0 + $0x21c] sm:$0xf0] }
 0x13c   :  { %v1450_v19 = vpop.f32.mrf.mxu2 }
 0x13d   :  { %v1451_v30 = vadd.f32 %v1450_v19, %v1318_v62  ;;  %v2223_v62 = vld [vmem:[%s4248_s0 + $0x1f4] sm:$0xf0] }
 0x13e   :  { %v1320_v18 = vpop.f32.mrf.mxu1 }
 0x13f   :  { %v1584_v46 = vadd.f32 %v3592_v43, %v1451_v30  ;;  %v1321_v42 = vadd.f32 %v1320_v18, %v1188_v56  ;;  %v3703_v63 = vpop.f32.mrf.mxu3  ;;  %v2237_v30 = vld [vmem:[%s4248_s0 + $0x1f0] sm:$0xf] }
 0x141   :  { %v1719_v54 = vpop.f32.mrf.mxu0  ;;  %v1717_v4 = vadd.f32 %v1716_v36, %v1584_v46  ;;  %1359 = vmatmul.bf16.gmra.mxu1 %v2206_v2  ;;  %1492 = vmatmul.bf16.gmra.mxu2 %v2210_v41  ;;  %v2703_v36 = vld [vmem:[%s4248_s0 + $0x23c] sm:$0xf]  ;;  %v2696_v2 = vld [vmem:[%s4248_s0 + $0x200] sm:$0xf0] }
 0x142   :  { %v2274_v1 = vor.u32 %v2703_v36, %v2271_v14 }
 0x143   :  { %v1833_v37 = vmax.f32 %v1717_v4, 0.0  ;;  %v2238_v4 = vor.u32 %v2696_v2, %v2237_v30  ;;  %v2257_v2 = vld [vmem:[%s4248_s0 + $0x218] sm:$0xf] }
 0x144   :  { %2618 = vmatmul.msk.bf16.gmra.mxu0 %vm1083_vm1, %v2218_v38  ;;  %v1453_v58 = vpop.f32.mrf.mxu2  ;;  %v2226_v38 = vor.u32 %v2692_v45, %v2223_v62  ;;  %v2697_v62 = vld [vmem:[%s4248_s0 + $0x20c] sm:$0xf] }
 0x145   :  { %v2802_v31 = vpack.c.bf16 %v1833_v37, %v1832_v7  ;;  %v1454_v43 = vadd.f32 %v1453_v58, %v1321_v42 }
 0x146   :  { %v1322_v53 = vpop.f32.mrf.mxu1  ;;  %1640 = vmatmul.bf16.gmra.mxu3 %v2274_v1  ;;  %v1195_v1 = vadd.f32 %v3587_v13, %v3472_v51 }
 0x147   :  { %2910 = vst [vmem:[%s4249_s3 + $0x10] sm:$0xff] %v2802_v31   ;;  %v1587_v19 = vadd.f32 %v3621_v25, %v1454_v43  ;;  %v1323_v23 = vadd.f32 %v1322_v53, %v1190_v12  ;;  %v3735_v56 = vpop.f32.mrf.mxu3  ;;  %v1193_v31 = vadd.f32 %v3587_v13, %v3465_v47  ;;  %v2291_v47 = vld [vmem:[%s4248_s0 + $0x274] sm:$0xf0] }
 0x149   :  { %v1721_v57 = vpop.f32.mrf.mxu0  ;;  %v1720_v7 = vadd.f32 %v1719_v54, %v1587_v19  ;;  %v2249_v19 = vld [vmem:[%s4248_s0 + $0x210] sm:$0xf] }
 0x14b   :  { %v1834_v42 = vmax.f32 %v1720_v7, 0.0 }
 0x14c   :  { %v1455_v41 = vpop.f32.mrf.mxu2 }
 0x14d   :  { %v1456_v18 = vadd.f32 %v1455_v41, %v1323_v23  ;;  %v2700_v23 = vld [vmem:[%s4248_s0 + $0x220] sm:$0xf0]  ;;  %v2701_v41 = vld [vmem:[%s4248_s0 + $0x228] sm:$0xf0] }
 0x14e   :  { %v1325_v46 = vpop.f32.mrf.mxu1  ;;  %v2258_v7 = vor.u32 %v2701_v41, %v2257_v2  ;;  %v2706_v2 = vld [vmem:[%s4248_s0 + $0x250] sm:$0xf0] }
 0x14f   :  { %v1589_v25 = vadd.f32 %v3627_v33, %v1456_v18  ;;  %v1326_v14 = vadd.f32 %v1325_v46, %v1193_v31  ;;  %v3741_v45 = vpop.f32.mrf.mxu3  ;;  %v2250_v46 = vor.u32 %v2700_v23, %v2249_v19  ;;  %v2269_v19 = vld [vmem:[%s4248_s0 + $0x238] sm:$0xf]  ;;  %v2705_v23 = vld [vmem:[%s4248_s0 + $0x248] sm:$0xf0] }
 0x151   :  { %v1724_v37 = vpop.f32.mrf.mxu0  ;;  %v1722_v58 = vadd.f32 %v1721_v57, %v1589_v25  ;;  %1364 = vmatmul.bf16.gmra.mxu1 %v2226_v38  ;;  %1497 = vmatmul.bf16.gmra.mxu2 %v2230_v27  ;;  %v2708_v57 = vld [vmem:[%s4248_s0 + $0x264] sm:$0xf]  ;;  %v2246_v27 = vor.u32 %v2697_v62, %v2243_v22  ;;  %v2702_v62 = vld [vmem:[%s4248_s0 + $0x234] sm:$0xf]  ;;  %v2263_v22 = vld [vmem:[%s4248_s0 + $0x244] sm:$0xf0] }
 0x152   :  { %v2294_v29 = vor.u32 %v2708_v57, %v2291_v47 }
 0x153   :  { %v1835_v53 = vmax.f32 %v1722_v58, 0.0 }
 0x154   :  { %2619 = vmatmul.msk.bf16.gmra.mxu0 %vm1083_vm1, %v2238_v4  ;;  %v1458_v43 = vpop.f32.mrf.mxu2 }
 0x155   :  { %v2807_v36 = vpack.c.bf16 %v1835_v53, %v1834_v42  ;;  %v1459_v33 = vadd.f32 %v1458_v43, %v1326_v14  ;;  %v1198_v53 = vadd.f32 %v3587_v13, %v3504_v24  ;;  %v2311_v24 = vld [vmem:[%s4248_s0 + $0x29c] sm:$0xf0] }
 0x156   :  { %v1327_v12 = vpop.f32.mrf.mxu1  ;;  %1645 = vmatmul.bf16.gmra.mxu3 %v2294_v29 }
 0x157   :  { %2911 = vst [vmem:[%s4249_s3 + $0x18] sm:$0xff] %v2807_v36   ;;  %v1592_v30 = vadd.f32 %v3659_v61, %v1459_v33  ;;  %v1328_v51 = vadd.f32 %v1327_v12, %v1195_v1  ;;  %v3773_v25 = vpop.f32.mrf.mxu3  ;;  %v1200_v1 = vadd.f32 %v3587_v13, %v3513_v28 }
 0x159   :  { %v1726_v54 = vpop.f32.mrf.mxu0  ;;  %v1725_v58 = vadd.f32 %v1724_v37, %v1592_v30 }
 0x15b   :  { %v1836_v43 = vmax.f32 %v1725_v58, 0.0 }
 0x15c   :  { %v1460_v18 = vpop.f32.mrf.mxu2 }
 0x15d   :  { %v1461_v38 = vadd.f32 %v1460_v18, %v1328_v51  ;;  %v2277_v51 = vld [vmem:[%s4248_s0 + $0x240] sm:$0xf] }
 0x15e   :  { %v1330_v4 = vpop.f32.mrf.mxu1 }
 0x15f   :  { %v1594_v61 = vadd.f32 %v3665_v50, %v1461_v38  ;;  %v1331_v33 = vadd.f32 %v1330_v4, %v1198_v53  ;;  %v3779_v47 = vpop.f32.mrf.mxu3  ;;  %v2266_v38 = vor.u32 %v2702_v62, %v2263_v22  ;;  %v2278_v4 = vor.u32 %v2706_v2, %v2277_v51  ;;  %v2283_v62 = vld [vmem:[%s4248_s0 + $0x26c] sm:$0xf0]  ;;  %v2710_v22 = vld [vmem:[%s4248_s0 + $0x270] sm:$0xf0] }
 0x160   :  { %v1203_v53 = vadd.f32 %v3587_v13, %v3545_v3  ;;  %v2331_v3 = vld [vmem:[%s4248_s0 + $0x2c4] sm:$0xf0] }
 0x161   :  { %v1729_v31 = vpop.f32.mrf.mxu0  ;;  %v1727_v42 = vadd.f32 %v1726_v54, %v1594_v61  ;;  %1369 = vmatmul.bf16.gmra.mxu1 %v2246_v27  ;;  %1502 = vmatmul.bf16.gmra.mxu2 %v2250_v46  ;;  %v2713_v54 = vld [vmem:[%s4248_s0 + $0x28c] sm:$0xf]  ;;  %v2270_v27 = vor.u32 %v2705_v23, %v2269_v19  ;;  %v2297_v23 = vld [vmem:[%s4248_s0 + $0x268] sm:$0xf] }
 0x162   :  { %v2314_v29 = vor.u32 %v2713_v54, %v2311_v24  ;;  %v1205_v54 = vadd.f32 %v3587_v13, %v3554_v10  ;;  %v2707_v24 = vld [vmem:[%s4248_s0 + $0x25c] sm:$0xf] }
 0x163   :  { %v1837_v36 = vmax.f32 %v1727_v42, 0.0  ;;  %v2286_v2 = vor.u32 %v2707_v24, %v2283_v62  ;;  %v2715_v24 = vld [vmem:[%s4248_s0 + $0x298] sm:$0xf0]  ;;  %v2317_v62 = vld [vmem:[%s4248_s0 + $0x290] sm:$0xf] }
 0x164   :  { %2620 = vmatmul.msk.bf16.gmra.mxu0 %vm1083_vm1, %v2258_v7  ;;  %v1463_v14 = vpop.f32.mrf.mxu2 }
 0x165   :  { %v2812_v12 = vpack.c.bf16 %v1837_v36, %v1836_v43  ;;  %v1464_v50 = vadd.f32 %v1463_v14, %v1331_v33 }
 0x166   :  { %v1332_v57 = vpop.f32.mrf.mxu1  ;;  %1650 = vmatmul.bf16.gmra.mxu3 %v2314_v29  ;;  %v2289_v29 = vld [vmem:[%s4248_s0 + $0x260] sm:$0xf] }
 0x167   :  { %2912 = vst [vmem:[%s4249_s3 + $0x20] sm:$0xff] %v2812_v12   ;;  %v1597_v30 = vadd.f32 %v3697_v5, %v1464_v50  ;;  %v1333_v28 = vadd.f32 %v1332_v57, %v1200_v1  ;;  %v3811_v7 = vpop.f32.mrf.mxu3 }
 0x169   :  { %v1731_v37 = vpop.f32.mrf.mxu0  ;;  %v1730_v58 = vadd.f32 %v1729_v31, %v1597_v30  ;;  %v2711_v30 = vld [vmem:[%s4248_s0 + $0x278] sm:$0xf0] }
 0x16b   :  { %v1838_v43 = vmax.f32 %v1730_v58, 0.0 }
 0x16c   :  { %v1465_v41 = vpop.f32.mrf.mxu2 }
 0x16d   :  { %v1466_v18 = vadd.f32 %v1465_v41, %v1333_v28  ;;  %v2290_v41 = vor.u32 %v2710_v22, %v2289_v29  ;;  %v2716_v29 = vld [vmem:[%s4248_s0 + $0x2a0] sm:$0xf0] }
 0x16e   :  { %v1335_v46 = vpop.f32.mrf.mxu1 }
 0x16f   :  { %v1599_v5 = vadd.f32 %v3703_v63, %v1466_v18  ;;  %v1336_v33 = vadd.f32 %v1335_v46, %v1203_v53  ;;  %v3817_v50 = vpop.f32.mrf.mxu3 }
 0x171   :  { %v1734_v61 = vpop.f32.mrf.mxu0  ;;  %v1732_v42 = vadd.f32 %v1731_v37, %v1599_v5  ;;  %1374 = vmatmul.bf16.gmra.mxu1 %v2266_v38  ;;  %1507 = vmatmul.bf16.gmra.mxu2 %v2270_v27  ;;  %v2718_v37 = vld [vmem:[%s4248_s0 + $0x2b4] sm:$0xf]  ;;  %v2298_v38 = vor.u32 %v2711_v30, %v2297_v23  ;;  %v1208_v5 = vadd.f32 %v3587_v13, %v3301_v17  ;;  %v2351_v17 = vld [vmem:[%s4248_s0 + $0x2ec] sm:$0xf0] }
 0x172   :  { %v2334_v1 = vor.u32 %v2718_v37, %v2331_v3  ;;  %v2303_v3 = vld [vmem:[%s4248_s0 + $0x294] sm:$0xf0] }
 0x173   :  { %v1839_v36 = vmax.f32 %v1732_v42, 0.0 }
 0x174   :  { %2621 = vmatmul.msk.bf16.gmra.mxu0 %vm1083_vm1, %v2278_v4  ;;  %v1468_v14 = vpop.f32.mrf.mxu2 }
 0x175   :  { %v2817_v12 = vpack.c.bf16 %v1839_v36, %v1838_v43  ;;  %v1469_v63 = vadd.f32 %v1468_v14, %v1336_v33 }
 0x176   :  { %v1337_v57 = vpop.f32.mrf.mxu1  ;;  %1655 = vmatmul.bf16.gmra.mxu3 %v2334_v1 }
 0x177   :  { %2913 = vst [vmem:[%s4249_s3 + $0x28] sm:$0xff] %v2817_v12   ;;  %v1602_v19 = vadd.f32 %v3735_v56, %v1469_v63  ;;  %v1338_v10 = vadd.f32 %v1337_v57, %v1205_v54  ;;  %v3849_v27 = vpop.f32.mrf.mxu3  ;;  %v2723_v57 = vld [vmem:[%s4248_s0 + $0x2dc] sm:$0xf]  ;;  %v1210_v63 = vadd.f32 %v3587_v13, %v3308_v21  ;;  %v2309_v54 = vld [vmem:[%s4248_s0 + $0x288] sm:$0xf] }
 0x178   :  { %v2354_v37 = vor.u32 %v2723_v57, %v2351_v17  ;;  %v2310_v23 = vor.u32 %v2715_v24, %v2309_v54  ;;  %v2329_v57 = vld [vmem:[%s4248_s0 + $0x2b0] sm:$0xf]  ;;  %v2720_v17 = vld [vmem:[%s4248_s0 + $0x2c0] sm:$0xf0] }
 0x179   :  { %v1736_v31 = vpop.f32.mrf.mxu0  ;;  %v1735_v46 = vadd.f32 %v1734_v61, %v1602_v19 }
 0x17b   :  { %v1840_v42 = vmax.f32 %v1735_v46, 0.0 }
 0x17c   :  { %v1470_v28 = vpop.f32.mrf.mxu2 }
 0x17d   :  { %v1471_v51 = vadd.f32 %v1470_v28, %v1338_v10  ;;  %v2318_v28 = vor.u32 %v2716_v29, %v2317_v62 }
 0x17e   :  { %v1340_v18 = vpop.f32.mrf.mxu1 }
 0x17f   :  { %v1604_v56 = vadd.f32 %v3741_v45, %v1471_v51  ;;  %v1341_v14 = vadd.f32 %v1340_v18, %v1208_v5  ;;  %v3855_v33 = vpop.f32.mrf.mxu3 }
 0x181   :  { %v1739_v4 = vpop.f32.mrf.mxu0  ;;  %v1737_v58 = vadd.f32 %v1736_v31, %v1604_v56  ;;  %1379 = vmatmul.bf16.gmra.mxu1 %v2286_v2  ;;  %1512 = vmatmul.bf16.gmra.mxu2 %v2290_v41  ;;  %v2712_v31 = vld [vmem:[%s4248_s0 + $0x284] sm:$0xf] }
 0x182   :  { %v2306_v10 = vor.u32 %v2712_v31, %v2303_v3  ;;  %v2337_v31 = vld [vmem:[%s4248_s0 + $0x2b8] sm:$0xf] }
 0x183   :  { %v1841_v53 = vmax.f32 %v1737_v58, 0.0 }
 0x184   :  { %2622 = vmatmul.msk.bf16.gmra.mxu0 %vm1083_vm1, %v2298_v38  ;;  %v1473_v43 = vpop.f32.mrf.mxu2  ;;  %v1213_v38 = vadd.f32 %v3587_v13, %v3338_v35  ;;  %v2371_v35 = vld [vmem:[%s4248_s0 + $0x314] sm:$0xf0] }
 0x185   :  { %v2822_v36 = vpack.c.bf16 %v1841_v53, %v1840_v42  ;;  %v1474_v45 = vadd.f32 %v1473_v43, %v1341_v14  ;;  %v1215_v14 = vadd.f32 %v3587_v13, %v3347_v40 }
 0x186   :  { %v1342_v12 = vpop.f32.mrf.mxu1  ;;  %1660 = vmatmul.bf16.gmra.mxu3 %v2354_v37  ;;  %v2721_v37 = vld [vmem:[%s4248_s0 + $0x2c8] sm:$0xf0] }
 0x187   :  { %2914 = vst [vmem:[%s4249_s3 + $0x30] sm:$0xff] %v2822_v36   ;;  %v1607_v1 = vadd.f32 %v3773_v25, %v1474_v45  ;;  %v1343_v21 = vadd.f32 %v1342_v12, %v1210_v63  ;;  %v3887_v51 = vpop.f32.mrf.mxu3  ;;  %v2728_v36 = vld [vmem:[%s4248_s0 + $0x304] sm:$0xf]  ;;  %v2717_v12 = vld [vmem:[%s4248_s0 + $0x2ac] sm:$0xf]  ;;  %v2338_v62 = vor.u32 %v2721_v37, %v2337_v31 }
 0x188   :  { %v2374_v45 = vor.u32 %v2728_v36, %v2371_v35  ;;  %v2357_v35 = vld [vmem:[%s4248_s0 + $0x2e0] sm:$0xf] }
 0x189   :  { %v1741_v61 = vpop.f32.mrf.mxu0  ;;  %v1740_v2 = vadd.f32 %v1739_v4, %v1607_v1  ;;  %v2330_v1 = vor.u32 %v2720_v17, %v2329_v57 }
 0x18b   :  { %v1842_v46 = vmax.f32 %v1740_v2, 0.0 }
 0x18c   :  { %v1475_v22 = vpop.f32.mrf.mxu2 }
 0x18d   :  { %v1476_v19 = vadd.f32 %v1475_v22, %v1343_v21 }
 0x18e   :  { %v1345_v30 = vpop.f32.mrf.mxu1 }
 0x18f   :  { %v1609_v25 = vadd.f32 %v3779_v47, %v1476_v19  ;;  %v1346_v42 = vadd.f32 %v1345_v30, %v1213_v38  ;;  %v3893_v43 = vpop.f32.mrf.mxu3 }
 0x191   :  { %v1744_v41 = vpop.f32.mrf.mxu0  ;;  %v1742_v18 = vadd.f32 %v1741_v61, %v1609_v25  ;;  %1384 = vmatmul.bf16.gmra.mxu1 %v2306_v10  ;;  %1517 = vmatmul.bf16.gmra.mxu2 %v2310_v23  ;;  %v2323_v61 = vld [vmem:[%s4248_s0 + $0x2bc] sm:$0xf0]  ;;  %v1218_v23 = vadd.f32 %v3587_v13, %v3379_v55 }
 0x192   :  { %v2326_v24 = vor.u32 %v2717_v12, %v2323_v61  ;;  %v2391_v55 = vld [vmem:[%s4248_s0 + $0x33c] sm:$0xf0] }
 0x193   :  { %v1843_v56 = vmax.f32 %v1742_v18, 0.0 }
 0x194   :  { %2623 = vmatmul.msk.bf16.gmra.mxu0 %vm1083_vm1, %v2318_v28  ;;  %v1478_v58 = vpop.f32.mrf.mxu2 }
 0x195   :  { %v2827_v5 = vpack.c.bf16 %v1843_v56, %v1842_v46  ;;  %v1479_v47 = vadd.f32 %v1478_v58, %v1346_v42  ;;  %v2733_v56 = vld [vmem:[%s4248_s0 + $0x32c] sm:$0xf]  ;;  %v1220_v58 = vadd.f32 %v3587_v13, %v3388_v60 }
 0x196   :  { %v1347_v53 = vpop.f32.mrf.mxu1  ;;  %1665 = vmatmul.bf16.gmra.mxu3 %v2374_v45  ;;  %v2394_v42 = vor.u32 %v2733_v56, %v2391_v55  ;;  %v2731_v56 = vld [vmem:[%s4248_s0 + $0x318] sm:$0xf0] }
 0x197   :  { %2915 = vst [vmem:[%s4249_s3 + $0x38] sm:$0xff] %v2827_v5   ;;  %v1612_v63 = vadd.f32 %v3811_v7, %v1479_v47  ;;  %v1348_v40 = vadd.f32 %v1347_v53, %v1215_v14  ;;  %v3925_v29 = vpop.f32.mrf.mxu3  ;;  %v2722_v5 = vld [vmem:[%s4248_s0 + $0x2d4] sm:$0xf]  ;;  %v2343_v53 = vld [vmem:[%s4248_s0 + $0x2e4] sm:$0xf0] }
 0x198   :  { %v2349_v47 = vld [vmem:[%s4248_s0 + $0x2d8] sm:$0xf]  ;;  %v2726_v14 = vld [vmem:[%s4248_s0 + $0x2f0] sm:$0xf0]  ;;  %v2346_v61 = vor.u32 %v2722_v5, %v2343_v53 }
 0x199   :  { %v1746_v4 = vpop.f32.mrf.mxu0  ;;  %v1745_v22 = vadd.f32 %v1744_v41, %v1612_v63  ;;  %v2358_v63 = vor.u32 %v2726_v14, %v2357_v35  ;;  %v1228_v14 = vadd.f32 %v3587_v13, %v3461_v44  ;;  %v2431_v44 = vld [vmem:[%s4248_s0 + $0x38c] sm:$0xf0] }
 0x19b   :  { %v1844_v30 = vmax.f32 %v1745_v22, 0.0 }
 0x19c   :  { %v1480_v3 = vpop.f32.mrf.mxu2 }
 0x19d   :  { %v1481_v54 = vadd.f32 %v1480_v3, %v1348_v40 }
 0x19e   :  { %v1350_v21 = vpop.f32.mrf.mxu1 }
 0x19f   :  { %v1614_v7 = vadd.f32 %v3817_v50, %v1481_v54  ;;  %v1351_v18 = vadd.f32 %v1350_v21, %v1218_v23  ;;  %v3931_v46 = vpop.f32.mrf.mxu3  ;;  %v1223_v54 = vadd.f32 %v3587_v13, %v3420_v11  ;;  %v2738_v23 = vld [vmem:[%s4248_s0 + $0x354] sm:$0xf]  ;;  %v2411_v11 = vld [vmem:[%s4248_s0 + $0x364] sm:$0xf0] }
 0x1a1   :  { %v1749_v19 = vpop.f32.mrf.mxu0  ;;  %v1747_v10 = vadd.f32 %v1746_v4, %v1614_v7  ;;  %1389 = vmatmul.bf16.gmra.mxu1 %v2326_v24  ;;  %1522 = vmatmul.bf16.gmra.mxu2 %v2330_v1  ;;  %v2725_v4 = vld [vmem:[%s4248_s0 + $0x2e8] sm:$0xf0] }
 0x1a2   :  { %v2350_v57 = vor.u32 %v2725_v4, %v2349_v47 }
 0x1a3   :  { %v1845_v28 = vmax.f32 %v1747_v10, 0.0 }
 0x1a4   :  { %2624 = vmatmul.msk.bf16.gmra.mxu0 %vm1083_vm1, %v2338_v62  ;;  %v1483_v2 = vpop.f32.mrf.mxu2 }
 0x1a5   :  { %v2832_v25 = vpack.c.bf16 %v1845_v28, %v1844_v30  ;;  %v1484_v50 = vadd.f32 %v1483_v2, %v1351_v18  ;;  %v1225_v30 = vadd.f32 %v3587_v13, %v3429_v16  ;;  %v2727_v28 = vld [vmem:[%s4248_s0 + $0x2fc] sm:$0xf]  ;;  %v2414_v2 = vor.u32 %v2738_v23, %v2411_v11  ;;  %v2369_v18 = vld [vmem:[%s4248_s0 + $0x300] sm:$0xf] }
 0x1a6   :  { %v1352_v38 = vpop.f32.mrf.mxu1  ;;  %1670 = vmatmul.bf16.gmra.mxu3 %v2394_v42 }
 0x1a7   :  { %2916 = vst [vmem:[%s4249_s3 + $0x40] sm:$0xff] %v2832_v25   ;;  %v1617_v36 = vadd.f32 %v3849_v27, %v1484_v50  ;;  %v1353_v60 = vadd.f32 %v1352_v38, %v1220_v58  ;;  %v2363_v25 = vld [vmem:[%s4248_s0 + $0x30c] sm:$0xf0]  ;;  %v2730_v38 = vld [vmem:[%s4248_s0 + $0x310] sm:$0xf0] }
 0x1a8   :  { %v2366_v5 = vor.u32 %v2727_v28, %v2363_v25  ;;  %v2370_v42 = vor.u32 %v2730_v38, %v2369_v18 }
 0x1a9   :  { %v1751_v41 = vpop.f32.mrf.mxu0  ;;  %v3963_v40 = vpop.f32.mrf.mxu3  ;;  %v1750_v31 = vadd.f32 %v1749_v19, %v1617_v36 }
 0x1ab   :  { %v1846_v24 = vmax.f32 %v1750_v31, 0.0 }
 0x1ac   :  { %v1485_v12 = vpop.f32.mrf.mxu2 }
 0x1ad   :  { %v1486_v45 = vadd.f32 %v1485_v12, %v1353_v60 }
 0x1ae   :  { %v1355_v17 = vpop.f32.mrf.mxu1 }
 0x1af   :  { %v1619_v27 = vadd.f32 %v3855_v33, %v1486_v45  ;;  %v1356_v22 = vadd.f32 %v1355_v17, %v1223_v54  ;;  %v2732_v54 = vld [vmem:[%s4248_s0 + $0x324] sm:$0xf] }
 0x1b1   :  { %v1754_v37 = vpop.f32.mrf.mxu0  ;;  %v1752_v3 = vadd.f32 %v1751_v41, %v1619_v27  ;;  %1394 = vmatmul.bf16.gmra.mxu1 %v2346_v61  ;;  %1527 = vmatmul.bf16.gmra.mxu2 %v2350_v57  ;;  %v3969_v10 = vpop.f32.mrf.mxu3  ;;  %v2377_v41 = vld [vmem:[%s4248_s0 + $0x308] sm:$0xf] }
 0x1b2   :  { %v2378_v47 = vor.u32 %v2731_v56, %v2377_v41 }
 0x1b3   :  { %v1847_v1 = vmax.f32 %v1752_v3, 0.0  ;;  %v1230_v3 = vadd.f32 %v3587_v13, %v3470_v49 }
 0x1b4   :  { %2625 = vmatmul.msk.bf16.gmra.mxu0 %vm1083_vm1, %v2358_v63  ;;  %v1488_v21 = vpop.f32.mrf.mxu2 }
 0x1b5   :  { %v2837_v62 = vpack.c.bf16 %v1847_v1, %v1846_v24  ;;  %v1489_v33 = vadd.f32 %v1488_v21, %v1356_v22  ;;  %v2383_v1 = vld [vmem:[%s4248_s0 + $0x334] sm:$0xf0]  ;;  %v2389_v21 = vld [vmem:[%s4248_s0 + $0x328] sm:$0xf] }
 0x1b6   :  { %v1357_v7 = vpop.f32.mrf.mxu1  ;;  %1675 = vmatmul.bf16.gmra.mxu3 %v2414_v2  ;;  %v2386_v11 = vor.u32 %v2732_v54, %v2383_v1 }
 0x1b7   :  { %2917 = vst [vmem:[%s4249_s3 + $0x48] sm:$0xff] %v2837_v62   ;;  %v1622_v50 = vadd.f32 %v3887_v51, %v1489_v33  ;;  %v1358_v16 = vadd.f32 %v1357_v7, %v1225_v30  ;;  %v2735_v62 = vld [vmem:[%s4248_s0 + $0x338] sm:$0xf0]  ;;  %v2397_v7 = vld [vmem:[%s4248_s0 + $0x330] sm:$0xf] }
 0x1b8   :  { %v2736_v33 = vld [vmem:[%s4248_s0 + $0x340] sm:$0xf0]  ;;  %v2390_v30 = vor.u32 %v2735_v62, %v2389_v21  ;;  %v1238_v62 = vadd.f32 %v3587_v13, %v3541_v0 }
 0x1b9   :  { %v1756_v19 = vpop.f32.mrf.mxu0  ;;  %v4001_v4 = vpop.f32.mrf.mxu3  ;;  %v1755_v36 = vadd.f32 %v1754_v37, %v1622_v50  ;;  %v2743_v37 = vld [vmem:[%s4248_s0 + $0x37c] sm:$0xf]  ;;  %v2398_v2 = vor.u32 %v2736_v33, %v2397_v7 }
 0x1ba   :  { %v2434_v24 = vor.u32 %v2743_v37, %v2431_v44 }
 0x1bb   :  { %v1848_v12 = vmax.f32 %v1755_v36, 0.0  ;;  %v2748_v36 = vld [vmem:[%s4248_s0 + $0x3a4] sm:$0xf] }
 0x1bc   :  { %v1490_v55 = vpop.f32.mrf.mxu2 }
 0x1bd   :  { %v1491_v58 = vadd.f32 %v1490_v55, %v1358_v16  ;;  %v1233_v16 = vadd.f32 %v3587_v13, %v3500_v9  ;;  %v2451_v9 = vld [vmem:[%s4248_s0 + $0x3b4] sm:$0xf0] }
 0x1be   :  { %v1360_v53 = vpop.f32.mrf.mxu1 }
 0x1bf   :  { %v1624_v51 = vadd.f32 %v3893_v43, %v1491_v58  ;;  %v1361_v17 = vadd.f32 %v1360_v53, %v1228_v14  ;;  %v2403_v14 = vld [vmem:[%s4248_s0 + $0x35c] sm:$0xf0] }
 0x1c1   :  { %v1759_v60 = vpop.f32.mrf.mxu0  ;;  %v1757_v35 = vadd.f32 %v1756_v19, %v1624_v51  ;;  %1399 = vmatmul.bf16.gmra.mxu1 %v2366_v5  ;;  %1532 = vmatmul.bf16.gmra.mxu2 %v2370_v42  ;;  %v4007_v31 = vpop.f32.mrf.mxu3  ;;  %v1235_v51 = vadd.f32 %v3587_v13, %v3509_v26 }
 0x1c3   :  { %v1849_v45 = vmax.f32 %v1757_v35, 0.0  ;;  %v2454_v35 = vor.u32 %v2748_v36, %v2451_v9 }
 0x1c4   :  { %2626 = vmatmul.msk.bf16.gmra.mxu0 %vm1083_vm1, %v2378_v47  ;;  %v1493_v61 = vpop.f32.mrf.mxu2 }
 0x1c5   :  { %v2842_v57 = vpack.c.bf16 %v1849_v45, %v1848_v12  ;;  %v1494_v43 = vadd.f32 %v1493_v61, %v1361_v17  ;;  %v2409_v12 = vld [vmem:[%s4248_s0 + $0x350] sm:$0xf]  ;;  %v2740_v45 = vld [vmem:[%s4248_s0 + $0x360] sm:$0xf0]  ;;  %v2741_v17 = vld [vmem:[%s4248_s0 + $0x368] sm:$0xf0] }
 0x1c6   :  { %v1362_v63 = vpop.f32.mrf.mxu1  ;;  %1680 = vmatmul.bf16.gmra.mxu3 %v2434_v24  ;;  %v2410_v37 = vor.u32 %v2740_v45, %v2409_v12 }
 0x1c7   :  { %2918 = vst [vmem:[%s4249_s3 + $0x50] sm:$0xff] %v2842_v57   ;;  %v1627_v22 = vadd.f32 %v3925_v29, %v1494_v43  ;;  %v1363_v49 = vadd.f32 %v1362_v63, %v1230_v3  ;;  %v2417_v57 = vld [vmem:[%s4248_s0 + $0x358] sm:$0xf] }
 0x1c8   :  { %v2418_v3 = vor.u32 %v2741_v17, %v2417_v57 }
 0x1c9   :  { %v1761_v27 = vpop.f32.mrf.mxu0  ;;  %v4039_v25 = vpop.f32.mrf.mxu3  ;;  %v1760_v18 = vadd.f32 %v1759_v60, %v1627_v22  ;;  %v2737_v60 = vld [vmem:[%s4248_s0 + $0x34c] sm:$0xf] }
 0x1cb   :  { %v1850_v41 = vmax.f32 %v1760_v18, 0.0  ;;  %v2742_v18 = vld [vmem:[%s4248_s0 + $0x374] sm:$0xf] }
 0x1cc   :  { %v1495_v19 = vpop.f32.mrf.mxu2 }
 0x1cd   :  { %v1496_v23 = vadd.f32 %v1495_v19, %v1363_v49 }
 0x1ce   :  { %v1365_v28 = vpop.f32.mrf.mxu1 }
 0x1cf   :  { %v1629_v29 = vadd.f32 %v3931_v46, %v1496_v23  ;;  %v1366_v5 = vadd.f32 %v1365_v28, %v1233_v16  ;;  %v2745_v16 = vld [vmem:[%s4248_s0 + $0x388] sm:$0xf0] }
 0x1d1   :  { %v1764_v38 = vpop.f32.mrf.mxu0  ;;  %v1762_v50 = vadd.f32 %v1761_v27, %v1629_v29  ;;  %1404 = vmatmul.bf16.gmra.mxu1 %v2386_v11  ;;  %1537 = vmatmul.bf16.gmra.mxu2 %v2390_v30  ;;  %v4045_v53 = vpop.f32.mrf.mxu3  ;;  %v2406_v27 = vor.u32 %v2737_v60, %v2403_v14 }
 0x1d3   :  { %v1851_v56 = vmax.f32 %v1762_v50, 0.0  ;;  %v2429_v50 = vld [vmem:[%s4248_s0 + $0x378] sm:$0xf] }
 0x1d4   :  { %2627 = vmatmul.msk.bf16.gmra.mxu0 %vm1083_vm1, %v2398_v2  ;;  %v1498_v55 = vpop.f32.mrf.mxu2  ;;  %v1240_v2 = vadd.f32 %v3587_v13, %v3550_v6  ;;  %v2437_v6 = vld [vmem:[%s4248_s0 + $0x380] sm:$0xf] }
 0x1d5   :  { %v2847_v58 = vpack.c.bf16 %v1851_v56, %v1850_v41  ;;  %v1499_v46 = vadd.f32 %v1498_v55, %v1366_v5  ;;  %v2746_v56 = vld [vmem:[%s4248_s0 + $0x390] sm:$0xf0] }
 0x1d6   :  { %v1367_v42 = vpop.f32.mrf.mxu1  ;;  %1685 = vmatmul.bf16.gmra.mxu3 %v2454_v35  ;;  %v4122_v35 = vld [vmem:[%s4247_s2] ss:$0 sm:$0xff] }
 0x1d7   :  { %2919 = vst [vmem:[%s4249_s3 + $0x58] sm:$0xff] %v2847_v58   ;;  %v1632_v61 = vadd.f32 %v3963_v40, %v1499_v46  ;;  %v1368_v26 = vadd.f32 %v1367_v42, %v1235_v51  ;;  %v2430_v42 = vor.u32 %v2745_v16, %v2429_v50  ;;  %v1243_v14 = vadd.f32 %v4122_v35, %v3306_v20  ;;  %v2747_v20 = vld [vmem:[%s4248_s0 + $0x39c] sm:$0xf] }
 0x1d9   :  { %v1766_v47 = vpop.f32.mrf.mxu0  ;;  %v4077_v54 = vpop.f32.mrf.mxu3  ;;  %v1765_v24 = vadd.f32 %v1764_v38, %v1632_v61  ;;  %v2423_v38 = vld [vmem:[%s4248_s0 + $0x384] sm:$0xf0] }
 0x1da   :  { %v2426_v5 = vor.u32 %v2742_v18, %v2423_v38 }
 0x1db   :  { %v1852_v22 = vmax.f32 %v1765_v24, 0.0 }
 0x1dc   :  { %v1500_v63 = vpop.f32.mrf.mxu2 }
 0x1dd   :  { %v1501_v43 = vadd.f32 %v1500_v63, %v1368_v26 }
 0x1de   :  { %v1370_v44 = vpop.f32.mrf.mxu1 }
 0x1df   :  { %v1634_v40 = vadd.f32 %v3969_v10, %v1501_v43  ;;  %v1371_v19 = vadd.f32 %v1370_v44, %v1238_v62  ;;  %v4088_v10 = vld [vmem:[%s4248_s0 + $0x3c8] sm:$0xff]  ;;  %v2449_v44 = vld [vmem:[%s4248_s0 + $0x3a0] sm:$0xf] }
 0x1e0   :  { %v631_v0 = vunpack.c.h.b16 %v4088_v10 }
 0x1e1   :  { %v1769_v1 = vpop.f32.mrf.mxu0  ;;  %v1767_v21 = vadd.f32 %v1766_v47, %v1634_v40  ;;  %1409 = vmatmul.bf16.gmra.mxu1 %v2406_v27  ;;  %1542 = vmatmul.bf16.gmra.mxu2 %v2410_v37  ;;  %v4083_v11 = vpop.f32.mrf.mxu3  ;;  %v2438_v47 = vor.u32 %v2746_v56, %v2437_v6  ;;  %v1245_v27 = vadd.f32 %v4122_v35, %v3336_v32  ;;  %v2443_v37 = vld [vmem:[%s4248_s0 + $0x3ac] sm:$0xf0]  ;;  %v2457_v32 = vld [vmem:[%s4248_s0 + $0x3a8] sm:$0xf] }
 0x1e2   :  { %v756_v29 = vpack.c.b16 %v631_v0, %v631_v0  ;;  %v1248_v0 = vadd.f32 %v4122_v35, %v3345_v39  ;;  %v161_v6 = vld [vmem:[%s4248_s0 + $0x3d0] sm:$0xf]  ;;  %v2958_v39 = vld [vmem:[%s4248_s0 + $0x3c0] sm:$0xff] }
 0x1e3   :  { %v1853_v49 = vmax.f32 %v1767_v21, 0.0  ;;  %v629_v56 = vunpack.c.h.b16 %v2958_v39 }
 0x1e4   :  { %2628 = vmatmul.msk.bf16.gmra.mxu0 %vm1083_vm1, %v2418_v3  ;;  %v1503_v7 = vpop.f32.mrf.mxu2  ;;  %v2750_v3 = vld [vmem:[%s4248_s0 + $0x3b0] sm:$0xf0] }
 0x1e5   :  { %v2852_v33 = vpack.c.bf16 %v1853_v49, %v1852_v22  ;;  %v1504_v30 = vadd.f32 %v1503_v7, %v1371_v19  ;;  %v2446_v22 = vor.u32 %v2747_v20, %v2443_v37  ;;  %v2450_v49 = vor.u32 %v2750_v3, %v2449_v44 }
 0x1e6   :  { %v1372_v23 = vpop.f32.mrf.mxu1  ;;  %1690 = vmatmul.bf16.gmra.mxu3 %v756_v29  ;;  %v1255_v44 = vadd.f32 %v4122_v35, %v3418_v8 }
 0x1e7   :  { %2920 = vst [vmem:[%s4249_s3 + $0x60] sm:$0xff] %v2852_v33   ;;  %v1637_v41 = vadd.f32 %v4001_v4, %v1504_v30  ;;  %v1373_v13 = vadd.f32 %v1372_v23, %v1240_v2 }
 0x1e9   :  { %v1771_v28 = vpop.f32.mrf.mxu0  ;;  %v4115_v36 = vpop.f32.mrf.mxu3  ;;  %v1770_v9 = vadd.f32 %v1769_v1, %v1637_v41  ;;  %v2751_v1 = vld [vmem:[%s4248_s0 + $0x3b8] sm:$0xf0] }
 0x1ea   :  { %v2458_v33 = vor.u32 %v2751_v1, %v2457_v32 }
 0x1eb   :  { %v1854_v12 = vmax.f32 %v1770_v9, 0.0 }
 0x1ec   :  { %v1505_v55 = vpop.f32.mrf.mxu2 }
 0x1ed   :  { %v1506_v58 = vadd.f32 %v1505_v55, %v1373_v13  ;;  %v1250_v55 = vadd.f32 %v4122_v35, %v3377_v52  ;;  %v1253_v52 = vadd.f32 %v4122_v35, %v3386_v59 }
 0x1ee   :  { %v1375_v46 = vpop.f32.mrf.mxu1 }
 0x1ef   :  { %v1639_v4 = vadd.f32 %v4007_v31, %v1506_v58  ;;  %v1376_v57 = vadd.f32 %v1375_v46, %v1243_v14  ;;  %v630_v58 = vunpack.c.l.b16 %v4088_v10 }
 0x1f1   :  { %v1774_v51 = vpop.f32.mrf.mxu0  ;;  %v1772_v60 = vadd.f32 %v1771_v28, %v1639_v4  ;;  %1414 = vmatmul.bf16.gmra.mxu1 %v2426_v5  ;;  %1547 = vmatmul.bf16.gmra.mxu2 %v2430_v42  ;;  %v4126_v17 = vpop.f32.mrf.mxu3  ;;  %v632_v5 = vunpack.c.l.b16 %v161_v6  ;;  %v754_v4 = vpack.c.b16 %v629_v56, %v629_v56  ;;  %v1263_v56 = vadd.f32 %v4122_v35, %v3468_v48 }
 0x1f3   :  { %v1855_v45 = vmax.f32 %v1772_v60, 0.0  ;;  %v757_v14 = vpack.c.b16 %v632_v5, %v632_v5 }
 0x1f4   :  { %2629 = vmatmul.msk.bf16.gmra.mxu0 %vm1083_vm1, %v2438_v47  ;;  %v1508_v61 = vpop.f32.mrf.mxu2 }
 0x1f5   :  { %v2857_v26 = vpack.c.bf16 %v1855_v45, %v1854_v12  ;;  %v1509_v63 = vadd.f32 %v1508_v61, %v1376_v57 }
 0x1f6   :  { %v1377_v31 = vpop.f32.mrf.mxu1 }
 0x1f7   :  { %2921 = vst [vmem:[%s4249_s3 + $0x68] sm:$0xff] %v2857_v26   ;;  %v1642_v24 = vadd.f32 %v4039_v25, %v1509_v63  ;;  %v1378_v40 = vadd.f32 %v1377_v31, %v1245_v27 }
 0x1f9   :  { %v1776_v43 = vpop.f32.mrf.mxu0  ;;  %v4152_v19 = vpop.f32.mrf.mxu3  ;;  %v1775_v23 = vadd.f32 %v1774_v51, %v1642_v24  ;;  %v755_v51 = vpack.c.b16 %v630_v58, %v630_v58 }
 0x1fb   :  { %v1856_v2 = vmax.f32 %v1775_v23, 0.0 }
 0x1fc   :  { %v1510_v21 = vpop.f32.mrf.mxu2 }
 0x1fd   :  { %v1511_v62 = vadd.f32 %v1510_v21, %v1378_v40 }
 0x1fe   :  { %v1380_v7 = vpop.f32.mrf.mxu1 }
 0x1ff   :  { %v1644_v25 = vadd.f32 %v4045_v53, %v1511_v62  ;;  %v1381_v50 = vadd.f32 %v1380_v7, %v1248_v0  ;;  %v1258_v7 = vadd.f32 %v4122_v35, %v3427_v15 }
 0x201   :  { %v1779_v30 = vpop.f32.mrf.mxu0  ;;  %v1777_v28 = vadd.f32 %v1776_v43, %v1644_v25  ;;  %1419 = vmatmul.bf16.gmra.mxu1 %v2446_v22  ;;  %1552 = vmatmul.bf16.gmra.mxu2 %v2450_v49  ;;  %v4158_v41 = vpop.f32.mrf.mxu3 }
 0x203   :  { %v1857_v18 = vmax.f32 %v1777_v28, 0.0 }
 0x204   :  { %2630 = vmatmul.msk.bf16.gmra.mxu0 %vm1083_vm1, %v2458_v33  ;;  %v1513_v29 = vpop.f32.mrf.mxu2 }
 0x205   :  { %v2862_v38 = vpack.c.bf16 %v1857_v18, %v1856_v2  ;;  %v1514_v53 = vadd.f32 %v1513_v29, %v1381_v50 }
 0x206   :  { %v1382_v16 = vpop.f32.mrf.mxu1 }
 0x207   :  { %2922 = vst [vmem:[%s4249_s3 + $0x70] sm:$0xff] %v2862_v38   ;;  %v1647_v42 = vadd.f32 %v4077_v54, %v1514_v53  ;;  %v1383_v46 = vadd.f32 %v1382_v16, %v1250_v55 }
 0x209   :  { %v1781_v13 = vpop.f32.mrf.mxu0  ;;  %v4173_v12 = vpop.f32.mrf.mxu3  ;;  %v1780_v45 = vadd.f32 %v1779_v30, %v1647_v42 }
 0x20b   :  { %v1858_v54 = vmax.f32 %v1780_v45, 0.0 }
 0x20c   :  { %v1515_v47 = vpop.f32.mrf.mxu2 }
 0x20d   :  { %v1516_v9 = vadd.f32 %v1515_v47, %v1383_v46 }
 0x20e   :  { %v1385_v60 = vpop.f32.mrf.mxu1 }
 0x20f   :  { %v1649_v61 = vadd.f32 %v4083_v11, %v1516_v9  ;;  %v1386_v43 = vadd.f32 %v1385_v60, %v1253_v52 }
 0x211   :  { %v1784_v26 = vpop.f32.mrf.mxu0  ;;  %v1782_v57 = vadd.f32 %v1781_v13, %v1649_v61  ;;  %1424 = vmatmul.bf16.gmra.mxu1 %v754_v4  ;;  %1557 = vmatmul.bf16.gmra.mxu2 %v755_v51  ;;  %v1663_v20 = vpop.f32.mrf.mxu3  ;;  %v4262_v4 = vld [vmem:[#allocation9_spill] sm:$0xff] }
 0x213   :  { %v1859_v10 = vmax.f32 %v1782_v57, 0.0 }
 0x214   :  { %2631 = vmatmul.msk.bf16.gmra.mxu0 %vm1083_vm1, %v757_v14  ;;  %v1518_v31 = vpop.f32.mrf.mxu2 }
 0x215   :  { %v2867_v63 = vpack.c.bf16 %v1859_v10, %v1858_v54  ;;  %v1519_v11 = vadd.f32 %v1518_v31, %v1386_v43  ;;  %v4263_v10 = vld [vmem:[#allocation10_spill] sm:$0xff] }
 0x216   :  { %v1387_v27 = vpop.f32.mrf.mxu1  ;;  %v1268_v31 = vadd.f32 %v4122_v35, %v4263_v10 }
 0x217   :  { %2923 = vst [vmem:[%s4249_s3 + $0x78] sm:$0xff] %v2867_v63   ;;  %v1652_v3 = vadd.f32 %v4115_v36, %v1519_v11  ;;  %v1388_v24 = vadd.f32 %v1387_v27, %v1255_v44 }
 0x219   :  { %v1786_v37 = vpop.f32.mrf.mxu0  ;;  %v1666_v1 = vpop.f32.mrf.mxu3  ;;  %v1785_v21 = vadd.f32 %v1784_v26, %v1652_v3 }
 0x21b   :  { %v1860_v33 = vmax.f32 %v1785_v21, 0.0 }
 0x21c   :  { %v1520_v59 = vpop.f32.mrf.mxu2 }
 0x21d   :  { %v1521_v40 = vadd.f32 %v1520_v59, %v1388_v24  ;;  %v4264_v59 = vld [vmem:[#allocation11_spill] sm:$0xff] }
 0x21e   :  { %v1390_v32 = vpop.f32.mrf.mxu1 }
 0x21f   :  { %v1654_v62 = vadd.f32 %v4126_v17, %v1521_v40  ;;  %v1391_v8 = vadd.f32 %v1390_v32, %v1258_v7  ;;  %v1260_v17 = vadd.f32 %v4122_v35, %v3459_v34 }
 0x221   :  { %v1789_v22 = vpop.f32.mrf.mxu0  ;;  %v1787_v49 = vadd.f32 %v1786_v37, %v1654_v62  ;;  %v1668_v36 = vpop.f32.mrf.mxu3 }
 0x223   :  { %v1861_v23 = vmax.f32 %v1787_v49, 0.0 }
 0x224   :  { %v1523_v25 = vpop.f32.mrf.mxu2 }
 0x225   :  { %v2872_v30 = vpack.c.bf16 %v1861_v23, %v1860_v33  ;;  %v1524_v0 = vadd.f32 %v1523_v25, %v1391_v8 }
 0x226   :  { %v1392_v28 = vpop.f32.mrf.mxu1 }
 0x227   :  { %2924 = vst [vmem:[%s4249_s3 + $0x80] sm:$0xff] %v2872_v30   ;;  %v1657_v18 = vadd.f32 %v4152_v19, %v1524_v0  ;;  %v1393_v29 = vadd.f32 %v1392_v28, %v1260_v17  ;;  %v4265_v30 = vld [vmem:[#allocation12_spill] sm:$0xff] }
 0x228   :  { %v1273_v8 = vadd.f32 %v4122_v35, %v4265_v30 }
 0x229   :  { %v1791_v2 = vpop.f32.mrf.mxu0  ;;  %v1671_v16 = vpop.f32.mrf.mxu3  ;;  %v1790_v53 = vadd.f32 %v1789_v22, %v1657_v18 }
 0x22b   :  { %v1862_v55 = vmax.f32 %v1790_v53, 0.0 }
 0x22c   :  { %v1525_v15 = vpop.f32.mrf.mxu2 }
 0x22d   :  { %v1526_v38 = vadd.f32 %v1525_v15, %v1393_v29 }
 0x22e   :  { %v1395_v50 = vpop.f32.mrf.mxu1 }
 0x22f   :  { %v1659_v13 = vadd.f32 %v4158_v41, %v1526_v38  ;;  %v1396_v34 = vadd.f32 %v1395_v50, %v1263_v56  ;;  %v1265_v41 = vadd.f32 %v4122_v35, %v4262_v4  ;;  %v4266_v50 = vld [vmem:[#allocation13_spill] sm:$0xff] }
 0x231   :  { %v1794_v6 = vpop.f32.mrf.mxu0  ;;  %v1792_v39 = vadd.f32 %v1791_v2, %v1659_v13  ;;  %v1673_v19 = vpop.f32.mrf.mxu3 }
 0x233   :  { %v1863_v58 = vmax.f32 %v1792_v39, 0.0 }
 0x234   :  { %v1528_v5 = vpop.f32.mrf.mxu2 }
 0x235   :  { %v2877_v42 = vpack.c.bf16 %v1863_v58, %v1862_v55  ;;  %v1529_v47 = vadd.f32 %v1528_v5, %v1396_v34 }
 0x236   :  { %v1397_v46 = vpop.f32.mrf.mxu1 }
 0x237   :  { %2925 = vst [vmem:[%s4249_s3 + $0x88] sm:$0xff] %v2877_v42   ;;  %v1662_v51 = vadd.f32 %v4173_v12, %v1529_v47  ;;  %v1398_v60 = vadd.f32 %v1397_v46, %v1265_v41  ;;  %v4267_v46 = vld [vmem:[#allocation2_spill] sm:$0xff] }
 0x238   :  { %v1278_v47 = vadd.f32 %v4122_v35, %v4267_v46 }
 0x239   :  { %v1796_v9 = vpop.f32.mrf.mxu0  ;;  %v1676_v61 = vpop.f32.mrf.mxu3  ;;  %v1795_v26 = vadd.f32 %v1794_v6, %v1662_v51 }
 0x23b   :  { %v1864_v63 = vmax.f32 %v1795_v26, 0.0  ;;  %v4268_v26 = vld [vmem:[#allocation3_spill] sm:$0xff] }
 0x23c   :  { %v1530_v48 = vpop.f32.mrf.mxu2 }
 0x23d   :  { %v1531_v14 = vadd.f32 %v1530_v48, %v1398_v60 }
 0x23e   :  { %v1400_v45 = vpop.f32.mrf.mxu1 }
 0x23f   :  { %v1664_v57 = vadd.f32 %v1663_v20, %v1531_v14  ;;  %v1401_v37 = vadd.f32 %v1400_v45, %v1268_v31  ;;  %v1270_v20 = vadd.f32 %v4122_v35, %v4264_v59 }
 0x241   :  { %v1799_v52 = vpop.f32.mrf.mxu0  ;;  %v1797_v54 = vadd.f32 %v1796_v9, %v1664_v57  ;;  %v1678_v3 = vpop.f32.mrf.mxu3 }
 0x243   :  { %v1865_v43 = vmax.f32 %v1797_v54, 0.0 }
 0x244   :  { %v1533_v27 = vpop.f32.mrf.mxu2 }
 0x245   :  { %v2882_v11 = vpack.c.bf16 %v1865_v43, %v1864_v63  ;;  %v1534_v12 = vadd.f32 %v1533_v27, %v1401_v37 }
 0x246   :  { %v1402_v44 = vpop.f32.mrf.mxu1 }
 0x247   :  { %2926 = vst [vmem:[%s4249_s3 + $0x90] sm:$0xff] %v2882_v11   ;;  %v1667_v40 = vadd.f32 %v1666_v1, %v1534_v12  ;;  %v1403_v32 = vadd.f32 %v1402_v44, %v1270_v20  ;;  %v4269_v44 = vld [vmem:[#allocation4_spill] sm:$0xff] }
 0x248   :  { %v1283_v12 = vadd.f32 %v4122_v35, %v4269_v44 }
 0x249   :  { %v1801_v24 = vpop.f32.mrf.mxu0  ;;  %v1681_v49 = vpop.f32.mrf.mxu3  ;;  %v1800_v7 = vadd.f32 %v1799_v52, %v1667_v40 }
 0x24b   :  { %v1866_v28 = vmax.f32 %v1800_v7, 0.0  ;;  %v4270_v7 = vld [vmem:[#allocation5_spill] sm:$0xff] }
 0x24c   :  { %v1535_v21 = vpop.f32.mrf.mxu2 }
 0x24d   :  { %v1536_v62 = vadd.f32 %v1535_v21, %v1403_v32 }
 0x24e   :  { %v1405_v22 = vpop.f32.mrf.mxu1 }
 0x24f   :  { %v1669_v33 = vadd.f32 %v1668_v36, %v1536_v62  ;;  %v1406_v18 = vadd.f32 %v1405_v22, %v1273_v8  ;;  %v1275_v36 = vadd.f32 %v4122_v35, %v4266_v50 }
 0x251   :  { %v1804_v23 = vpop.f32.mrf.mxu0  ;;  %v1802_v25 = vadd.f32 %v1801_v24, %v1669_v33  ;;  %v1683_v15 = vpop.f32.mrf.mxu3 }
 0x253   :  { %v1867_v0 = vmax.f32 %v1802_v25, 0.0 }
 0x254   :  { %v1538_v2 = vpop.f32.mrf.mxu2 }
 0x255   :  { %v2887_v17 = vpack.c.bf16 %v1867_v0, %v1866_v28  ;;  %v1539_v1 = vadd.f32 %v1538_v2, %v1406_v18  ;;  %v4271_v18 = vld [vmem:[#allocation6_spill] sm:$0xff] }
 0x256   :  { %v1407_v29 = vpop.f32.mrf.mxu1 }
 0x257   :  { %2927 = vst [vmem:[%s4249_s3 + $0x98] sm:$0xff] %v2887_v17   ;;  %v1672_v53 = vadd.f32 %v1671_v16, %v1539_v1  ;;  %v1408_v13 = vadd.f32 %v1407_v29, %v1275_v36  ;;  %v1288_v29 = vadd.f32 %v4122_v35, %v4271_v18 }
 0x259   :  { %v1806_v38 = vpop.f32.mrf.mxu0  ;;  %v1686_v55 = vpop.f32.mrf.mxu3  ;;  %v1805_v58 = vadd.f32 %v1804_v23, %v1672_v53 }
 0x25b   :  { %v1868_v9 = vmax.f32 %v1805_v58, 0.0 }
 0x25c   :  { %v1540_v6 = vpop.f32.mrf.mxu2 }
 0x25d   :  { %v1541_v39 = vadd.f32 %v1540_v6, %v1408_v13 }
 0x25e   :  { %v1410_v56 = vpop.f32.mrf.mxu1 }
 0x25f   :  { %v1674_v5 = vadd.f32 %v1673_v19, %v1541_v39  ;;  %v1411_v60 = vadd.f32 %v1410_v56, %v1278_v47  ;;  %v1280_v19 = vadd.f32 %v4122_v35, %v4268_v26  ;;  %v4272_v39 = vld [vmem:[#allocation7_spill] sm:$0xff] }
 0x261   :  { %v1809_v42 = vpop.f32.mrf.mxu0  ;;  %v1807_v34 = vadd.f32 %v1806_v38, %v1674_v5  ;;  %v1688_v14 = vpop.f32.mrf.mxu3 }
 0x263   :  { %v1869_v4 = vmax.f32 %v1807_v34, 0.0 }
 0x264   :  { %v1543_v41 = vpop.f32.mrf.mxu2 }
 0x265   :  { %v2892_v51 = vpack.c.bf16 %v1869_v4, %v1868_v9  ;;  %v1544_v16 = vadd.f32 %v1543_v41, %v1411_v60  ;;  %v4273_v4 = vld [vmem:[#allocation8_spill] sm:$0xff] }
 0x266   :  { %v1412_v48 = vpop.f32.mrf.mxu1  ;;  %v1293_v41 = vadd.f32 %v4122_v35, %v4273_v4 }
 0x267   :  { %2928 = vst [vmem:[%s4249_s3 + $0xa0] sm:$0xff] %v2892_v51   ;;  %v1677_v57 = vadd.f32 %v1676_v61, %v1544_v16  ;;  %v1413_v52 = vadd.f32 %v1412_v48, %v1280_v19 }
 0x269   :  { %v1811_v45 = vpop.f32.mrf.mxu0  ;;  %v1691_v63 = vpop.f32.mrf.mxu3  ;;  %v1810_v43 = vadd.f32 %v1809_v42, %v1677_v57 }
 0x26b   :  { %v1870_v24 = vmax.f32 %v1810_v43, 0.0 }
 0x26c   :  { %v1545_v54 = vpop.f32.mrf.mxu2 }
 0x26d   :  { %v1546_v10 = vadd.f32 %v1545_v54, %v1413_v52 }
 0x26e   :  { %v1415_v31 = vpop.f32.mrf.mxu1 }
 0x26f   :  { %v1679_v27 = vadd.f32 %v1678_v3, %v1546_v10  ;;  %v1416_v32 = vadd.f32 %v1415_v31, %v1283_v12  ;;  %v1285_v3 = vadd.f32 %v4122_v35, %v4270_v7 }
 0x271   :  { %v1814_v11 = vpop.f32.mrf.mxu0  ;;  %v1812_v37 = vadd.f32 %v1811_v45, %v1679_v27  ;;  %v1693_v62 = vpop.f32.mrf.mxu3 }
 0x273   :  { %v1871_v59 = vmax.f32 %v1812_v37, 0.0 }
 0x274   :  { %v1548_v20 = vpop.f32.mrf.mxu2 }
 0x275   :  { %v2897_v40 = vpack.c.bf16 %v1871_v59, %v1870_v24  ;;  %v1549_v61 = vadd.f32 %v1548_v20, %v1416_v32 }
 0x276   :  { %v1417_v21 = vpop.f32.mrf.mxu1 }
 0x277   :  { %2929 = vst [vmem:[%s4249_s3 + $0xa8] sm:$0xff] %v2897_v40   ;;  %v1682_v33 = vadd.f32 %v1681_v49, %v1549_v61  ;;  %v1418_v23 = vadd.f32 %v1417_v21, %v1285_v3 }
 0x279   :  { %v1816_v22 = vpop.f32.mrf.mxu0  ;;  %v1815_v28 = vadd.f32 %v1814_v11, %v1682_v33 }
 0x27b   :  { %v1872_v1 = vmax.f32 %v1815_v28, 0.0 }
 0x27c   :  { %v1550_v25 = vpop.f32.mrf.mxu2 }
 0x27d   :  { %v1551_v30 = vadd.f32 %v1550_v25, %v1418_v23 }
 0x27e   :  { %v1420_v8 = vpop.f32.mrf.mxu1 }
 0x27f   :  { %v1684_v0 = vadd.f32 %v1683_v15, %v1551_v30  ;;  %v1421_v53 = vadd.f32 %v1420_v8, %v1288_v29  ;;  %v1290_v15 = vadd.f32 %v4122_v35, %v4272_v39 }
 0x281   :  { %v1819_v2 = vpop.f32.mrf.mxu0  ;;  %v1817_v17 = vadd.f32 %v1816_v22, %v1684_v0 }
 0x283   :  { %v1873_v38 = vmax.f32 %v1817_v17, 0.0 }
 0x284   :  { %v1553_v50 = vpop.f32.mrf.mxu2 }
 0x285   :  { %v2902_v36 = vpack.c.bf16 %v1873_v38, %v1872_v1  ;;  %v1554_v49 = vadd.f32 %v1553_v50, %v1421_v53 }
 0x286   :  { %v1422_v13 = vpop.f32.mrf.mxu1 }
 0x287   :  { %2930 = vst [vmem:[%s4249_s3 + $0xb0] sm:$0xff] %v2902_v36   ;;  %v1687_v56 = vadd.f32 %v1686_v55, %v1554_v49  ;;  %v1423_v58 = vadd.f32 %v1422_v13, %v1290_v15 }
 0x289   :  { %v1821_v6 = vpop.f32.mrf.mxu0  ;;  %v1820_v46 = vadd.f32 %v1819_v2, %v1687_v56 }
 0x28b   :  { %v1874_v60 = vmax.f32 %v1820_v46, 0.0 }
 0x28c   :  { %v1555_v5 = vpop.f32.mrf.mxu2 }
 0x28d   :  { %v1556_v42 = vadd.f32 %v1555_v5, %v1423_v58 }
 0x28e   :  { %v1425_v34 = vpop.f32.mrf.mxu1 }
 0x28f   :  { %v1689_v47 = vadd.f32 %v1688_v14, %v1556_v42  ;;  %v1426_v16 = vadd.f32 %v1425_v34, %v1293_v41 }
 0x291   :  { %v1824_v9 = vpop.f32.mrf.mxu0  ;;  %v1822_v51 = vadd.f32 %v1821_v6, %v1689_v47 }
 0x293   :  { %v1875_v48 = vmax.f32 %v1822_v51, 0.0 }
 0x294   :  { %v1558_v45 = vpop.f32.mrf.mxu2 }
 0x295   :  { %v2907_v26 = vpack.c.bf16 %v1875_v48, %v1874_v60  ;;  %v1559_v19 = vadd.f32 %v1558_v45, %v1426_v16 }
 0x296   :  { %v1427_v57 = vpop.f32.mrf.mxu1 }
 0x297   :  { %2931 = vst [vmem:[%s4249_s3 + $0xb8] sm:$0xff] %v2907_v26   ;;  %v1692_v55 = vadd.f32 %v1691_v63, %v1559_v19 }
 0x299   :  { %v1826_v52 = vpop.f32.mrf.mxu0  ;;  %v1825_v54 = vadd.f32 %v1824_v9, %v1692_v55 }
 0x29b   :  { %v1876_v14 = vmax.f32 %v1825_v54, 0.0 }
 0x29c   :  { %v1560_v10 = vpop.f32.mrf.mxu2 }
 0x29d   :  { %v1925_v31 = vpack.c.bf16 %v1876_v14, %v1876_v14 }
 0x29f   :  { %1974 = vst [vmem:[%s4249_s3 + $0xc0] sm:$0xf] %v1925_v31 }

// kernel: cnn_driver_forward.8
= control target key start
LH: loop header
LB: loop body
LE: loop exit
PB: predicated region body
PF: predicated region fallthrough
CT: control target
= control target key end

     0   :  { %vm656_vm0 = vcmask 1041408   ;;  %vm643_vm1 = vcmask 31744   ;;  %s1721_s1 = inlined_call_operand.vmem [shape: bf16[900,128], index: 1, kind: input, shape index: {}]   ;;  %s1722_s2 = inlined_call_operand.vmem [shape: f32[1,128], index: 2, kind: input, shape index: {}]   ;;  %s1723_s0 = inlined_call_operand.vmem [shape: bf16[50,900], index: 0, kind: input, shape index: {}]   ;;  %s1724_s3 = inlined_call_operand.vmem [shape: bf16[50,128], index: 3, kind: output, shape index: {}]  }
   0x1   :  { %v1264_v0 = vld [vmem:[%s1721_s1 + $0x38] sm:$0xff]  ;;  %v1263_v4 = vld [vmem:[%s1721_s1 + $0x30] sm:$0xff]  ;;  %v1262_v8 = vld [vmem:[%s1721_s1 + $0x28] sm:$0xff] }
   0x2   :  { %v1272_v1 = vld [vmem:[%s1721_s1 + $0x78] sm:$0xff]  ;;  %660 = vmatpush.bf16.msra.mxu0 %v1264_v0  ;;  %v1271_v5 = vld [vmem:[%s1721_s1 + $0x70] sm:$0xff]  ;;  %v1270_v9 = vld [vmem:[%s1721_s1 + $0x68] sm:$0xff] }
   0x3   :  { %v1280_v2 = vld [vmem:[%s1721_s1 + $0xb8] sm:$0xff]  ;;  %688 = vmatpush.bf16.msra.mxu1 %v1272_v1  ;;  %v1279_v6 = vld [vmem:[%s1721_s1 + $0xb0] sm:$0xff]  ;;  %v1278_v10 = vld [vmem:[%s1721_s1 + $0xa8] sm:$0xff] }
   0x4   :  { %v1288_v3 = vld [vmem:[%s1721_s1 + $0xf8] sm:$0xff]  ;;  %716 = vmatpush.bf16.msra.mxu2 %v1280_v2  ;;  %v1287_v7 = vld [vmem:[%s1721_s1 + $0xf0] sm:$0xff]  ;;  %v1286_v11 = vld [vmem:[%s1721_s1 + $0xe8] sm:$0xff] }
   0x5   :  { %744 = vmatpush.bf16.msra.mxu3 %v1288_v3  ;;  %v1261_v12 = vld [vmem:[%s1721_s1 + $0x20] sm:$0xff]  ;;  %v1260_v16 = vld [vmem:[%s1721_s1 + $0x18] sm:$0xff]  ;;  %v1259_v20 = vld [vmem:[%s1721_s1 + $0x10] sm:$0xff] }
   0x6   :  { %661 = vmatpush.bf16.msra.mxu0 %v1263_v4  ;;  %v1269_v13 = vld [vmem:[%s1721_s1 + $0x60] sm:$0xff]  ;;  %v1268_v17 = vld [vmem:[%s1721_s1 + $0x58] sm:$0xff]  ;;  %v1267_v21 = vld [vmem:[%s1721_s1 + $0x50] sm:$0xff] }
   0x7   :  { %689 = vmatpush.bf16.msra.mxu1 %v1271_v5  ;;  %v1277_v14 = vld [vmem:[%s1721_s1 + $0xa0] sm:$0xff]  ;;  %v1276_v18 = vld [vmem:[%s1721_s1 + $0x98] sm:$0xff]  ;;  %v1275_v23 = vld [vmem:[%s1721_s1 + $0x90] sm:$0xff] }
   0x8   :  { %717 = vmatpush.bf16.msra.mxu2 %v1279_v6  ;;  %v1285_v15 = vld [vmem:[%s1721_s1 + $0xe0] sm:$0xff]  ;;  %v1284_v19 = vld [vmem:[%s1721_s1 + $0xd8] sm:$0xff]  ;;  %v1283_v24 = vld [vmem:[%s1721_s1 + $0xd0] sm:$0xff] }
   0x9   :  { %745 = vmatpush.bf16.msra.mxu3 %v1287_v7  ;;  %v155_v22 = vld [vmem:[%s1721_s1 + $0x1c0] sm:$0x3]  ;;  %v1258_v26 = vld [vmem:[%s1721_s1 + $0x8] sm:$0xff]  ;;  %v1233_v37 = vld [vmem:[%s1723_s0 + $0x4] sm:$0xf] }
   0xa   :  { %662 = vmatpush.bf16.msra.mxu0 %v1262_v8  ;;  %v529_v25 = vunpack.c.l.b16 %v155_v22  ;;  %v1266_v27 = vld [vmem:[%s1721_s1 + $0x48] sm:$0xff]  ;;  %v1257_v30 = vld [vmem:[%s1721_s1] sm:$0xff]  ;;  %v1312_v43 = vld [vmem:[%s1721_s1 + $0x1b8] sm:$0xff] }
   0xb   :  { %690 = vmatpush.bf16.msra.mxu1 %v1270_v9  ;;  %v1274_v28 = vld [vmem:[%s1721_s1 + $0x88] sm:$0xff]  ;;  %v1265_v31 = vld [vmem:[%s1721_s1 + $0x40] sm:$0xff]  ;;  %v1296_v49 = vld [vmem:[%s1721_s1 + $0x138] sm:$0xff] }
   0xc   :  { %718 = vmatpush.bf16.msra.mxu2 %v1278_v10  ;;  %v1282_v29 = vld [vmem:[%s1721_s1 + $0xc8] sm:$0xff]  ;;  %v1273_v32 = vld [vmem:[%s1721_s1 + $0x80] sm:$0xff]  ;;  %v586_v36 = vpack.c.b16 %v529_v25, %v529_v25  ;;  %v1304_v50 = vld [vmem:[%s1721_s1 + $0x178] sm:$0xff] }
   0xd   :  { %746 = vmatpush.bf16.msra.mxu3 %v1286_v11  ;;  %v1281_v33 = vld [vmem:[%s1721_s1 + $0xc0] sm:$0xff]  ;;  %v919_v39 = vld [vmem:[%s1723_s0 + $0x8] sm:$0xf]  ;;  %v1234_v41 = vld [vmem:[%s1723_s0 + $0xc] sm:$0xf] }
   0xe   :  { %663 = vmatpush.bf16.msra.mxu0 %v1261_v12  ;;  %v911_v34 = vld [vmem:[%s1723_s0] sm:$0xf]  ;;  %v913_v38 = vld [vmem:[%s1723_s0 + $0x20] sm:$0xf0]  ;;  %v1238_v40 = vld [vmem:[%s1723_s0 + $0x24] sm:$0xf0] }
   0xf   :  { %691 = vmatpush.bf16.msra.mxu1 %v1269_v13  ;;  %v1237_v35 = vld [vmem:[%s1723_s0 + $0x1c] sm:$0xf0]  ;;  %v921_v42 = vld [vmem:[%s1723_s0 + $0x28] sm:$0xf0]  ;;  %v916_v45 = vor.u32 %v1233_v37, %v913_v38  ;;  %v658_v46 = vsel %vm656_vm0, %v586_v36, 0  ;;  %v920_v47 = vor.u32 %v1238_v40, %v919_v39  ;;  %v1311_v51 = vld [vmem:[%s1721_s1 + $0x1b0] sm:$0xff] }
  0x10   :  { %719 = vmatpush.bf16.msra.mxu2 %v1277_v14  ;;  %v912_v44 = vor.u32 %v1237_v35, %v911_v34  ;;  %v924_v48 = vor.u32 %v1234_v41, %v921_v42  ;;  %v1295_v52 = vld [vmem:[%s1721_s1 + $0x130] sm:$0xff]  ;;  %v1310_v54 = vld [vmem:[%s1721_s1 + $0x1a8] sm:$0xff]  ;;  %v943_v57 = vld [vmem:[%s1723_s0 + $0x40] sm:$0xf] }
  0x11   :  { %747 = vmatpush.bf16.msra.mxu3 %v1285_v15  ;;  %v1303_v53 = vld [vmem:[%s1721_s1 + $0x170] sm:$0xff]  ;;  %v1294_v55 = vld [vmem:[%s1721_s1 + $0x128] sm:$0xff]  ;;  %v1309_v58 = vld [vmem:[%s1721_s1 + $0x1a0] sm:$0xff] }
  0x12   :  { %664 = vmatpush.bf16.msra.mxu0 %v1260_v16  ;;  %v1302_v56 = vld [vmem:[%s1721_s1 + $0x168] sm:$0xff]  ;;  %v1245_v59 = vld [vmem:[%s1723_s0 + $0x5c] sm:$0xf0]  ;;  %v1241_v60 = vld [vmem:[%s1723_s0 + $0x44] sm:$0xf] }
  0x13   :  { %692 = vmatpush.bf16.msra.mxu1 %v1268_v17  ;;  %v945_v61 = vld [vmem:[%s1723_s0 + $0x60] sm:$0xf0]  ;;  %v951_v62 = vld [vmem:[%s1723_s0 + $0x48] sm:$0xf]  ;;  %v1242_v0 = vld [vmem:[%s1723_s0 + $0x4c] sm:$0xf]  ;;  %v944_v5 = vor.u32 %v1245_v59, %v943_v57 }
  0x14   :  { %720 = vmatpush.bf16.msra.mxu2 %v1276_v18  ;;  %v1246_v63 = vld [vmem:[%s1723_s0 + $0x64] sm:$0xf0]  ;;  %v953_v1 = vld [vmem:[%s1723_s0 + $0x68] sm:$0xf0]  ;;  %v1293_v2 = vld [vmem:[%s1721_s1 + $0x120] sm:$0xff]  ;;  %v948_v6 = vor.u32 %v1241_v60, %v945_v61 }
  0x15   :  { %748 = vmatpush.bf16.msra.mxu3 %v1284_v19  ;;  %v1301_v3 = vld [vmem:[%s1721_s1 + $0x160] sm:$0xff]  ;;  %v1308_v4 = vld [vmem:[%s1721_s1 + $0x198] sm:$0xff]  ;;  %v952_v7 = vor.u32 %v1246_v63, %v951_v62  ;;  %v956_v8 = vor.u32 %v1242_v0, %v953_v1  ;;  %v1307_v11 = vld [vmem:[%s1721_s1 + $0x190] sm:$0xff] }
  0x16   :  { %665 = vmatpush.bf16.msra.mxu0 %v1259_v20  ;;  %v1292_v9 = vld [vmem:[%s1721_s1 + $0x118] sm:$0xff]  ;;  %v1291_v12 = vld [vmem:[%s1721_s1 + $0x110] sm:$0xff]  ;;  %v1306_v14 = vld [vmem:[%s1721_s1 + $0x188] sm:$0xff] }
  0x17   :  { %693 = vmatpush.bf16.msra.mxu1 %v1267_v21  ;;  %v1300_v10 = vld [vmem:[%s1721_s1 + $0x158] sm:$0xff]  ;;  %v1299_v13 = vld [vmem:[%s1721_s1 + $0x150] sm:$0xff]  ;;  %v1290_v15 = vld [vmem:[%s1721_s1 + $0x108] sm:$0xff] }
  0x18   :  { %721 = vmatpush.bf16.msra.mxu2 %v1275_v23  ;;  %v1298_v16 = vld [vmem:[%s1721_s1 + $0x148] sm:$0xff]  ;;  %v975_v17 = vld [vmem:[%s1723_s0 + $0x80] sm:$0xf]  ;;  %v1249_v20 = vld [vmem:[%s1723_s0 + $0x84] sm:$0xf] }
  0x19   :  { %749 = vmatpush.bf16.msra.mxu3 %v1283_v24  ;;  %v1305_v18 = vld [vmem:[%s1721_s1 + $0x180] sm:$0xff]  ;;  %v983_v22 = vld [vmem:[%s1723_s0 + $0x88] sm:$0xf]  ;;  %v1250_v24 = vld [vmem:[%s1723_s0 + $0x8c] sm:$0xf] }
  0x1a   :  { %666 = vmatpush.bf16.msra.mxu0 %v1258_v26  ;;  %v1253_v19 = vld [vmem:[%s1723_s0 + $0x9c] sm:$0xf0]  ;;  %v977_v21 = vld [vmem:[%s1723_s0 + $0xa0] sm:$0xf0]  ;;  %v1254_v23 = vld [vmem:[%s1723_s0 + $0xa4] sm:$0xf0] }
  0x1b   :  { %694 = vmatpush.bf16.msra.mxu1 %v1266_v27  ;;  %v985_v25 = vld [vmem:[%s1723_s0 + $0xa8] sm:$0xf0]  ;;  %v1289_v26 = vld [vmem:[%s1721_s1 + $0x100] sm:$0xff]  ;;  %v927_v42 = vld [vmem:[%s1723_s0 + $0x10] sm:$0xf] }
  0x1c   :  { %722 = vmatpush.bf16.msra.mxu2 %v1274_v28  ;;  %v1297_v27 = vld [vmem:[%s1721_s1 + $0x140] sm:$0xff]  ;;  %v976_v28 = vor.u32 %v1253_v19, %v975_v17  ;;  %v961_v57 = vld [vmem:[%s1723_s0 + $0x70] sm:$0xf0]  ;;  %v1248_v59 = vld [vmem:[%s1723_s0 + $0x74] sm:$0xf0] }
  0x1d   :  { %750 = vmatpush.bf16.msra.mxu3 %v1282_v29  ;;  %v980_v29 = vor.u32 %v1249_v20, %v977_v21  ;;  %v1244_v60 = vld [vmem:[%s1723_s0 + $0x5c] sm:$0xf] }
  0x1e   :  { %667 = vmatpush.bf16.msra.mxu0 %v1257_v30  ;;  %v984_v30 = vor.u32 %v1254_v23, %v983_v22  ;;  %v969_v61 = vld [vmem:[%s1723_s0 + $0x78] sm:$0xf0] }
  0x1f   :  { %695 = vmatpush.bf16.msra.mxu1 %v1265_v31  ;;  %v988_v31 = vor.u32 %v1250_v24, %v985_v25  ;;  %v972_v1 = vor.u32 %v1244_v60, %v969_v61  ;;  %v1685_v24 = vld [vmem:[%s1722_s2] ss:$0 sm:$0xff] }
  0x20   :  { %723 = vmatpush.bf16.msra.mxu2 %v1273_v32  ;;  %v39_v32 = vld [vmem:[%s1723_s0 + $0xc0] sm:$0x11] }
  0x21   :  { %751 = vmatpush.bf16.msra.mxu3 %v1281_v33  ;;  %668 = vmatmul.bf16.vlgmr.msra.gmra.mxu0 %v912_v44  ;;  %v40_v33 = vld [vmem:[%s1723_s0 + $0xc8] sm:$0x11]  ;;  %v236_v34 = vunpack.c.l.b16 %v39_v32  ;;  %v237_v35 = vunpack.c.h.b16 %v39_v32  ;;  %v1235_v44 = vld [vmem:[%s1723_s0 + $0x14] sm:$0xf] }
  0x22   :  { %696 = vmatmul.bf16.vlgmr.msra.gmra.mxu1 %v916_v45  ;;  %772 = vmatpush.bf16.msrb.mxu0 %v1296_v49  ;;  %v238_v36 = vunpack.c.l.b16 %v40_v33  ;;  %v239_v37 = vunpack.c.h.b16 %v40_v33  ;;  %v929_v45 = vld [vmem:[%s1723_s0 + $0x30] sm:$0xf0]  ;;  %v937_v49 = vld [vmem:[%s1723_s0 + $0x38] sm:$0xf0] }
  0x23   :  { %724 = vmatmul.bf16.vlgmr.msra.gmra.mxu2 %v920_v47  ;;  %800 = vmatpush.bf16.msrb.mxu1 %v1304_v50  ;;  %v268_v38 = vpack.c.b16 %v236_v34, %v236_v34  ;;  %v269_v39 = vpack.c.b16 %v237_v35, %v237_v35  ;;  %v1240_v47 = vld [vmem:[%s1723_s0 + $0x34] sm:$0xf0] }
  0x24   :  { %828 = vmatpush.bf16.msrb.mxu2 %v1312_v43  ;;  %752 = vmatmul.bf16.vlgmr.msra.gmra.mxu3 %v924_v48  ;;  %v270_v40 = vpack.c.b16 %v238_v36, %v238_v36  ;;  %v271_v41 = vpack.c.b16 %v239_v37, %v239_v37  ;;  %v1239_v43 = vld [vmem:[%s1723_s0 + $0x2c] sm:$0xf0]  ;;  %v1236_v48 = vld [vmem:[%s1723_s0 + $0x1c] sm:$0xf] }
  0x25   :  { %863 = vmatpush.bf16.msrb.mxu3 %v658_v46  ;;  %v935_v46 = vld [vmem:[%s1723_s0 + $0x18] sm:$0xf]  ;;  %v928_v50 = vor.u32 %v1239_v43, %v927_v42 }
  0x26   :  { %773 = vmatpush.bf16.msrb.mxu0 %v1295_v52  ;;  %v936_v52 = vor.u32 %v1240_v47, %v935_v46 }
  0x27   :  { %801 = vmatpush.bf16.msrb.mxu1 %v1303_v53  ;;  %v940_v53 = vor.u32 %v1236_v48, %v937_v49 }
  0x28   :  { %829 = vmatpush.bf16.msrb.mxu2 %v1311_v51  ;;  %v932_v51 = vor.u32 %v1235_v44, %v929_v45 }
  0x2a   :  { %774 = vmatpush.bf16.msrb.mxu0 %v1294_v55  ;;  %v1247_v55 = vld [vmem:[%s1723_s0 + $0x6c] sm:$0xf0] }
  0x2b   :  { %802 = vmatpush.bf16.msrb.mxu1 %v1302_v56  ;;  %v1243_v56 = vld [vmem:[%s1723_s0 + $0x54] sm:$0xf] }
  0x2c   :  { %830 = vmatpush.bf16.msrb.mxu2 %v1310_v54  ;;  %v959_v54 = vld [vmem:[%s1723_s0 + $0x50] sm:$0xf]  ;;  %v964_v63 = vor.u32 %v1243_v56, %v961_v57 }
  0x2d   :  { %v960_v62 = vor.u32 %v1247_v55, %v959_v54 }
  0x2e   :  { %775 = vmatpush.bf16.msrb.mxu0 %v1293_v2  ;;  %v991_v2 = vld [vmem:[%s1723_s0 + $0x90] sm:$0xf] }
  0x2f   :  { %803 = vmatpush.bf16.msrb.mxu1 %v1301_v3  ;;  %v1255_v3 = vld [vmem:[%s1723_s0 + $0xac] sm:$0xf0] }
  0x30   :  { %831 = vmatpush.bf16.msrb.mxu2 %v1309_v58  ;;  %v967_v58 = vld [vmem:[%s1723_s0 + $0x58] sm:$0xf] }
  0x31   :  { %673 = vmatmul.bf16.gmra.mxu0 %v944_v5  ;;  %v968_v0 = vor.u32 %v1248_v59, %v967_v58  ;;  %v993_v5 = vld [vmem:[%s1723_s0 + $0xb0] sm:$0xf0] }
  0x32   :  { %701 = vmatmul.bf16.gmra.mxu1 %v948_v6  ;;  %776 = vmatpush.bf16.msrb.mxu0 %v1292_v9  ;;  %v999_v6 = vld [vmem:[%s1723_s0 + $0x98] sm:$0xf]  ;;  %v1001_v9 = vld [vmem:[%s1723_s0 + $0xb8] sm:$0xf0] }
  0x33   :  { %729 = vmatmul.bf16.gmra.mxu2 %v952_v7  ;;  %804 = vmatpush.bf16.msrb.mxu1 %v1300_v10  ;;  %v1256_v7 = vld [vmem:[%s1723_s0 + $0xb4] sm:$0xf0]  ;;  %v992_v10 = vor.u32 %v1255_v3, %v991_v2 }
  0x34   :  { %832 = vmatpush.bf16.msrb.mxu2 %v1308_v4  ;;  %757 = vmatmul.bf16.gmra.mxu3 %v956_v8  ;;  %v1251_v4 = vld [vmem:[%s1723_s0 + $0x94] sm:$0xf]  ;;  %v1252_v8 = vld [vmem:[%s1723_s0 + $0x9c] sm:$0xf] }
  0x36   :  { %777 = vmatpush.bf16.msrb.mxu0 %v1291_v12  ;;  %v1000_v12 = vor.u32 %v1256_v7, %v999_v6 }
  0x37   :  { %805 = vmatpush.bf16.msrb.mxu1 %v1299_v13  ;;  %v1004_v13 = vor.u32 %v1252_v8, %v1001_v9 }
  0x38   :  { %833 = vmatpush.bf16.msrb.mxu2 %v1307_v11  ;;  %v996_v11 = vor.u32 %v1251_v4, %v993_v5 }
  0x3a   :  { %778 = vmatpush.bf16.msrb.mxu0 %v1290_v15  ;;  %v42_v15 = vld [vmem:[%s1723_s0 + $0xd8] sm:$0x11] }
  0x3b   :  { %806 = vmatpush.bf16.msrb.mxu1 %v1298_v16  ;;  %v243_v19 = vunpack.c.h.b16 %v42_v15 }
  0x3c   :  { %834 = vmatpush.bf16.msrb.mxu2 %v1306_v14  ;;  %v41_v14 = vld [vmem:[%s1723_s0 + $0xd0] sm:$0x11] }
  0x3d   :  { %v240_v16 = vunpack.c.l.b16 %v41_v14  ;;  %v241_v17 = vunpack.c.h.b16 %v41_v14  ;;  %v275_v23 = vpack.c.b16 %v243_v19, %v243_v19 }
  0x3e   :  { %779 = vmatpush.bf16.msrb.mxu0 %v1289_v26 }
  0x3f   :  { %807 = vmatpush.bf16.msrb.mxu1 %v1297_v27  ;;  %v272_v20 = vpack.c.b16 %v240_v16, %v240_v16  ;;  %v273_v21 = vpack.c.b16 %v241_v17, %v241_v17 }
  0x40   :  { %835 = vmatpush.bf16.msrb.mxu2 %v1305_v18  ;;  %v242_v18 = vunpack.c.l.b16 %v42_v15 }
  0x41   :  { %678 = vmatmul.bf16.gmra.mxu0 %v976_v28 }
  0x42   :  { %706 = vmatmul.bf16.gmra.mxu1 %v980_v29  ;;  %v274_v22 = vpack.c.b16 %v242_v18, %v242_v18 }
  0x43   :  { %734 = vmatmul.bf16.gmra.mxu2 %v984_v30 }
  0x44   :  { %762 = vmatmul.bf16.gmra.mxu3 %v988_v31 }
  0x51   :  { %683 = vmatmul.bf16.gmra.mxu0 %v268_v38 }
  0x52   :  { %711 = vmatmul.bf16.gmra.mxu1 %v269_v39 }
  0x53   :  { %739 = vmatmul.bf16.gmra.mxu2 %v270_v40 }
  0x54   :  { %767 = vmatmul.bf16.gmra.mxu3 %v271_v41 }
  0x61   :  { %780 = vmatmul.bf16.vlgmr.msrb.gmra.mxu0 %v928_v50 }
  0x62   :  { %808 = vmatmul.bf16.vlgmr.msrb.gmra.mxu1 %v932_v51 }
  0x63   :  { %836 = vmatmul.bf16.vlgmr.msrb.gmra.mxu2 %v936_v52 }
  0x64   :  { %1229 = vmatmul.msk.bf16.vlgmr.msrb.gmra.mxu3 %vm643_vm1, %v940_v53 }
  0x71   :  { %785 = vmatmul.bf16.gmra.mxu0 %v960_v62 }
  0x72   :  { %813 = vmatmul.bf16.gmra.mxu1 %v964_v63 }
  0x73   :  { %841 = vmatmul.bf16.gmra.mxu2 %v968_v0 }
  0x74   :  { %1230 = vmatmul.msk.bf16.gmra.mxu3 %vm643_vm1, %v972_v1 }
  0x81   :  { %790 = vmatmul.bf16.gmra.mxu0 %v992_v10 }
  0x82   :  { %818 = vmatmul.bf16.gmra.mxu1 %v996_v11 }
  0x83   :  { %846 = vmatmul.bf16.gmra.mxu2 %v1000_v12 }
  0x84   :  { %1231 = vmatmul.msk.bf16.gmra.mxu3 %vm643_vm1, %v1004_v13 }
  0x91   :  { %795 = vmatmul.bf16.gmra.mxu0 %v272_v20 }
  0x92   :  { %823 = vmatmul.bf16.gmra.mxu1 %v273_v21 }
  0x93   :  { %851 = vmatmul.bf16.gmra.mxu2 %v274_v22 }
  0x94   :  { %1232 = vmatmul.msk.bf16.gmra.mxu3 %vm643_vm1, %v275_v23 }
  0x9e   :  { %v669_v25 = vpop.f32.mrf.mxu0 }
  0x9f   :  { %v697_v26 = vpop.f32.mrf.mxu1  ;;  %v670_v27 = vadd.f32 %v1685_v24, %v669_v25 }
  0xa1   :  { %v698_v28 = vadd.f32 %v697_v26, %v670_v27 }
  0xa6   :  { %v725_v29 = vpop.f32.mrf.mxu2  ;;  %v671_v32 = vpop.f32.mrf.mxu0 }
  0xa7   :  { %v753_v30 = vpop.f32.mrf.mxu3  ;;  %v726_v31 = vadd.f32 %v725_v29, %v698_v28  ;;  %v699_v33 = vpop.f32.mrf.mxu1  ;;  %v672_v3 = vadd.f32 %v1685_v24, %v671_v32 }
  0xa9   :  { %v754_v34 = vadd.f32 %v753_v30, %v726_v31  ;;  %v700_v8 = vadd.f32 %v699_v33, %v672_v3 }
  0xae   :  { %v727_v35 = vpop.f32.mrf.mxu2  ;;  %v674_v37 = vpop.f32.mrf.mxu0 }
  0xaf   :  { %v755_v36 = vpop.f32.mrf.mxu3  ;;  %v702_v38 = vpop.f32.mrf.mxu1  ;;  %v675_v39 = vadd.f32 %v1685_v24, %v674_v37  ;;  %v728_v9 = vadd.f32 %v727_v35, %v700_v8 }
  0xb1   :  { %v703_v40 = vadd.f32 %v702_v38, %v675_v39  ;;  %v756_v13 = vadd.f32 %v755_v36, %v728_v9 }
  0xb6   :  { %v730_v41 = vpop.f32.mrf.mxu2  ;;  %v676_v44 = vpop.f32.mrf.mxu0 }
  0xb7   :  { %v758_v42 = vpop.f32.mrf.mxu3  ;;  %v731_v43 = vadd.f32 %v730_v41, %v703_v40  ;;  %v704_v45 = vpop.f32.mrf.mxu1  ;;  %v677_v19 = vadd.f32 %v1685_v24, %v676_v44 }
  0xb9   :  { %v759_v46 = vadd.f32 %v758_v42, %v731_v43  ;;  %v705_v28 = vadd.f32 %v704_v45, %v677_v19 }
  0xbe   :  { %v732_v47 = vpop.f32.mrf.mxu2  ;;  %v679_v49 = vpop.f32.mrf.mxu0 }
  0xbf   :  { %v760_v48 = vpop.f32.mrf.mxu3  ;;  %v707_v50 = vpop.f32.mrf.mxu1  ;;  %v680_v51 = vadd.f32 %v1685_v24, %v679_v49  ;;  %v733_v30 = vadd.f32 %v732_v47, %v705_v28 }
  0xc1   :  { %v708_v52 = vadd.f32 %v707_v50, %v680_v51  ;;  %v761_v37 = vadd.f32 %v760_v48, %v733_v30 }
  0xc6   :  { %v735_v53 = vpop.f32.mrf.mxu2  ;;  %v681_v56 = vpop.f32.mrf.mxu0 }
  0xc7   :  { %v763_v54 = vpop.f32.mrf.mxu3  ;;  %v736_v55 = vadd.f32 %v735_v53, %v708_v52  ;;  %v709_v57 = vpop.f32.mrf.mxu1  ;;  %v682_v43 = vadd.f32 %v1685_v24, %v681_v56 }
  0xc9   :  { %v1690_v58 = vadd.f32 %v763_v54, %v736_v55  ;;  %v710_v52 = vadd.f32 %v709_v57, %v682_v43 }
  0xce   :  { %v737_v59 = vpop.f32.mrf.mxu2  ;;  %v684_v61 = vpop.f32.mrf.mxu0 }
  0xcf   :  { %v1692_v60 = vpop.f32.mrf.mxu3  ;;  %v1694_v62 = vpop.f32.mrf.mxu1  ;;  %v738_v53 = vadd.f32 %v737_v59, %v710_v52  ;;  %v685_v54 = vadd.f32 %v1685_v24, %v684_v61 }
  0xd1   :  { %v766_v56 = vadd.f32 %v1692_v60, %v738_v53 }
  0xd6   :  { %v1696_v63 = vpop.f32.mrf.mxu2  ;;  %v686_v1 = vpop.f32.mrf.mxu0 }
  0xd7   :  { %v1698_v0 = vpop.f32.mrf.mxu3  ;;  %v714_v2 = vpop.f32.mrf.mxu1 }
  0xde   :  { %v742_v4 = vpop.f32.mrf.mxu2  ;;  %v781_v6 = vpop.f32.mrf.mxu0 }
  0xdf   :  { %v770_v5 = vpop.f32.mrf.mxu3  ;;  %v809_v7 = vpop.f32.mrf.mxu1  ;;  %v782_v10 = vadd.f32 %v781_v6, %v754_v34  ;;  %v713_v6 = vadd.f32 %v1694_v62, %v685_v54 }
  0xe1   :  { %v810_v16 = vadd.f32 %v809_v7, %v782_v10  ;;  %v741_v24 = vadd.f32 %v1696_v63, %v713_v6 }
  0xe6   :  { %v837_v11 = vpop.f32.mrf.mxu2  ;;  %v783_v14 = vpop.f32.mrf.mxu0 }
  0xe7   :  { %v865_v12 = vpop.f32.mrf.mxu3  ;;  %v811_v15 = vpop.f32.mrf.mxu1  ;;  %v784_v17 = vadd.f32 %v783_v14, %v756_v13  ;;  %v838_v18 = vadd.f32 %v837_v11, %v810_v16  ;;  %v769_v11 = vadd.f32 %v1698_v0, %v741_v24 }
  0xe9   :  { %v812_v20 = vadd.f32 %v811_v15, %v784_v17  ;;  %v866_v23 = vadd.f32 %v865_v12, %v838_v18 }
  0xeb   :  { %v884_v31 = vmax.f32 %v866_v23, 0.0 }
  0xee   :  { %v839_v21 = vpop.f32.mrf.mxu2  ;;  %v786_v26 = vpop.f32.mrf.mxu0 }
  0xef   :  { %v867_v22 = vpop.f32.mrf.mxu3  ;;  %v840_v25 = vadd.f32 %v839_v21, %v812_v20  ;;  %v814_v27 = vpop.f32.mrf.mxu1  ;;  %v787_v34 = vadd.f32 %v786_v26, %v759_v46 }
  0xf1   :  { %v868_v29 = vadd.f32 %v867_v22, %v840_v25  ;;  %v815_v40 = vadd.f32 %v814_v27, %v787_v34 }
  0xf3   :  { %v885_v32 = vmax.f32 %v868_v29, 0.0 }
  0xf5   :  { %v1316_v33 = vpack.c.bf16 %v885_v32, %v884_v31 }
  0xf6   :  { %v842_v35 = vpop.f32.mrf.mxu2  ;;  %v788_v38 = vpop.f32.mrf.mxu0 }
  0xf7   :  { %v870_v36 = vpop.f32.mrf.mxu3  ;;  %1317 = vst [vmem:[%s1724_s3] sm:$0xff] %v1316_v33   ;;  %v816_v39 = vpop.f32.mrf.mxu1  ;;  %v789_v41 = vadd.f32 %v788_v38, %v761_v37  ;;  %v843_v42 = vadd.f32 %v842_v35, %v815_v40 }
  0xf9   :  { %v817_v44 = vadd.f32 %v816_v39, %v789_v41  ;;  %v871_v49 = vadd.f32 %v870_v36, %v843_v42 }
  0xfb   :  { %v886_v55 = vmax.f32 %v871_v49, 0.0 }
  0xfe   :  { %v844_v45 = vpop.f32.mrf.mxu2  ;;  %v791_v46 = vpop.f32.mrf.mxu0 }
  0xff   :  { %v872_v47 = vpop.f32.mrf.mxu3  ;;  %v845_v50 = vadd.f32 %v844_v45, %v817_v44  ;;  %v819_v51 = vpop.f32.mrf.mxu1  ;;  %v792_v3 = vadd.f32 %v791_v46, %v1690_v58 }
 0x101   :  { %v873_v48 = vadd.f32 %v872_v47, %v845_v50  ;;  %v820_v59 = vadd.f32 %v819_v51, %v792_v3 }
 0x103   :  { %v887_v1 = vmax.f32 %v873_v48, 0.0 }
 0x105   :  { %v1321_v2 = vpack.c.bf16 %v887_v1, %v886_v55 }
 0x106   :  { %v847_v4 = vpop.f32.mrf.mxu2  ;;  %v793_v57 = vpop.f32.mrf.mxu0 }
 0x107   :  { %v875_v5 = vpop.f32.mrf.mxu3  ;;  %1328 = vst [vmem:[%s1724_s3 + $0x8] sm:$0xff] %v1321_v2   ;;  %v821_v7 = vpop.f32.mrf.mxu1  ;;  %v794_v8 = vadd.f32 %v793_v57, %v766_v56  ;;  %v848_v61 = vadd.f32 %v847_v4, %v820_v59 }
 0x109   :  { %v822_v9 = vadd.f32 %v821_v7, %v794_v8  ;;  %v876_v12 = vadd.f32 %v875_v5, %v848_v61 }
 0x10b   :  { %v888_v16 = vmax.f32 %v876_v12, 0.0 }
 0x10e   :  { %v849_v10 = vpop.f32.mrf.mxu2  ;;  %v796_v13 = vpop.f32.mrf.mxu0 }
 0x10f   :  { %v877_v58 = vpop.f32.mrf.mxu3  ;;  %v850_v60 = vadd.f32 %v849_v10, %v822_v9  ;;  %v824_v62 = vpop.f32.mrf.mxu1  ;;  %v797_v15 = vadd.f32 %v796_v13, %v769_v11 }
 0x111   :  { %v878_v14 = vadd.f32 %v877_v58, %v850_v60  ;;  %v825_v19 = vadd.f32 %v824_v62, %v797_v15 }
 0x113   :  { %v889_v17 = vmax.f32 %v878_v14, 0.0 }
 0x115   :  { %v1326_v18 = vpack.c.bf16 %v889_v17, %v888_v16 }
 0x116   :  { %v852_v20 = vpop.f32.mrf.mxu2  ;;  %v798_v22 = vpop.f32.mrf.mxu0 }
 0x117   :  { %v880_v21 = vpop.f32.mrf.mxu3  ;;  %1329 = vst [vmem:[%s1724_s3 + $0x10] sm:$0xff] %v1326_v18   ;;  %v853_v63 = vadd.f32 %v852_v20, %v825_v19  ;;  %v826_v23 = vpop.f32.mrf.mxu1 }
 0x119   :  { %v881_v0 = vadd.f32 %v880_v21, %v853_v63 }
 0x11b   :  { %v890_v25 = vmax.f32 %v881_v0, 0.0 }
 0x11d   :  { %v897_v26 = vpack.c.bf16 %v890_v25, %v890_v25 }
 0x11e   :  { %v854_v27 = vpop.f32.mrf.mxu2 }
 0x11f   :  { %v882_v28 = vpop.f32.mrf.mxu3  ;;  %904 = vst [vmem:[%s1724_s3 + $0x18] sm:$0x1] %v897_v26 }

// kernel: cnn_driver_forward.9
= control target key start
LH: loop header
LB: loop body
LE: loop exit
PB: predicated region body
PF: predicated region fallthrough
CT: control target
= control target key end

     0   :  { %vm273_vm0 = vcmask 392192   ;;  %s670_s1 = inlined_call_operand.vmem [shape: bf16[432,128], index: 1, kind: input, shape index: {}]   ;;  %s671_s0 = inlined_call_operand.vmem [shape: bf16[18,432], index: 0, kind: input, shape index: {}]   ;;  %s672_s2 = inlined_call_operand.vmem [shape: f32[1,128], index: 2, kind: input, shape index: {}]   ;;  %s673_s3 = inlined_call_operand.vmem [shape: bf16[18,128], index: 3, kind: output, shape index: {}]  }
   0x1   :  { %v502_v0 = vld [vmem:[%s670_s1 + $0x38] sm:$0xff]  ;;  %v501_v3 = vld [vmem:[%s670_s1 + $0x30] sm:$0xff]  ;;  %v500_v7 = vld [vmem:[%s670_s1 + $0x28] sm:$0xff] }
   0x2   :  { %v510_v1 = vld [vmem:[%s670_s1 + $0x78] sm:$0xff]  ;;  %280 = vmatpush.bf16.msra.mxu0 %v502_v0  ;;  %v509_v4 = vld [vmem:[%s670_s1 + $0x70] sm:$0xff]  ;;  %v508_v8 = vld [vmem:[%s670_s1 + $0x68] sm:$0xff] }
   0x3   :  { %v518_v2 = vld [vmem:[%s670_s1 + $0xb8] sm:$0xff]  ;;  %298 = vmatpush.bf16.msra.mxu1 %v510_v1  ;;  %v517_v5 = vld [vmem:[%s670_s1 + $0xb0] sm:$0xff]  ;;  %v516_v9 = vld [vmem:[%s670_s1 + $0xa8] sm:$0xff] }
   0x4   :  { %316 = vmatpush.bf16.msra.mxu2 %v518_v2  ;;  %v521_v6 = vld [vmem:[%s670_s1 + $0xd0] sm:$0xff]  ;;  %v520_v10 = vld [vmem:[%s670_s1 + $0xc8] sm:$0xff]  ;;  %v499_v11 = vld [vmem:[%s670_s1 + $0x20] sm:$0xff] }
   0x5   :  { %339 = vmatpush.bf16.msra.mxu3 %v521_v6  ;;  %v507_v12 = vld [vmem:[%s670_s1 + $0x60] sm:$0xff]  ;;  %v492_v15 = vld [vmem:[%s671_s0 + $0xc] sm:$0xf]  ;;  %v377_v16 = vld [vmem:[%s671_s0 + $0x18] sm:$0xf0] }
   0x6   :  { %281 = vmatpush.bf16.msra.mxu0 %v501_v3  ;;  %v515_v13 = vld [vmem:[%s670_s1 + $0xa0] sm:$0xff]  ;;  %v498_v17 = vld [vmem:[%s670_s1 + $0x18] sm:$0xff]  ;;  %v380_v20 = vor.u32 %v492_v15, %v377_v16  ;;  %v497_v21 = vld [vmem:[%s670_s1 + $0x10] sm:$0xff] }
   0x7   :  { %299 = vmatpush.bf16.msra.mxu1 %v509_v4  ;;  %v519_v14 = vld [vmem:[%s670_s1 + $0xc0] sm:$0xff]  ;;  %v506_v18 = vld [vmem:[%s670_s1 + $0x58] sm:$0xff]  ;;  %v505_v22 = vld [vmem:[%s670_s1 + $0x50] sm:$0xff] }
   0x8   :  { %317 = vmatpush.bf16.msra.mxu2 %v517_v5  ;;  %v514_v19 = vld [vmem:[%s670_s1 + $0x98] sm:$0xff]  ;;  %v513_v23 = vld [vmem:[%s670_s1 + $0x90] sm:$0xff]  ;;  %v496_v24 = vld [vmem:[%s670_s1 + $0x8] sm:$0xff] }
   0x9   :  { %340 = vmatpush.bf16.msra.mxu3 %v520_v10  ;;  %v504_v25 = vld [vmem:[%s670_s1 + $0x48] sm:$0xff]  ;;  %v495_v28 = vld [vmem:[%s670_s1] sm:$0xff]  ;;  %v493_v31 = vld [vmem:[%s671_s0 + $0xc] sm:$0xf0] }
   0xa   :  { %282 = vmatpush.bf16.msra.mxu0 %v500_v7  ;;  %v512_v26 = vld [vmem:[%s670_s1 + $0x88] sm:$0xff]  ;;  %v503_v29 = vld [vmem:[%s670_s1 + $0x40] sm:$0xff]  ;;  %v369_v33 = vld [vmem:[%s671_s0 + $0x10] sm:$0xf0] }
   0xb   :  { %300 = vmatpush.bf16.msra.mxu1 %v508_v8  ;;  %v20_v27 = vld [vmem:[%s671_s0 + $0x28] sm:$0x11]  ;;  %v367_v30 = vld [vmem:[%s671_s0] sm:$0xf]  ;;  %v491_v32 = vld [vmem:[%s671_s0 + $0x4] sm:$0xf] }
   0xc   :  { %318 = vmatpush.bf16.msra.mxu2 %v516_v9  ;;  %v511_v34 = vld [vmem:[%s670_s1 + $0x80] sm:$0xff]  ;;  %v375_v35 = vld [vmem:[%s671_s0 + $0x8] sm:$0xf]  ;;  %v494_v36 = vld [vmem:[%s671_s0 + $0x14] sm:$0xf0]  ;;  %v96_v37 = vunpack.c.h.b16 %v20_v27  ;;  %v368_v38 = vor.u32 %v493_v31, %v367_v30  ;;  %v372_v39 = vor.u32 %v491_v32, %v369_v33  ;;  %v95_v45 = vunpack.c.l.b16 %v20_v27 }
   0xd   :  { %341 = vmatpush.bf16.msra.mxu3 %v519_v14  ;;  %v376_v40 = vor.u32 %v494_v36, %v375_v35  ;;  %v19_v42 = vld [vmem:[%s671_s0 + $0x20] sm:$0x11] }
   0xe   :  { %283 = vmatpush.bf16.msra.mxu0 %v499_v11  ;;  %v104_v41 = vpack.c.b16 %v96_v37, %v96_v37  ;;  %v93_v43 = vunpack.c.l.b16 %v19_v42  ;;  %v94_v44 = vunpack.c.h.b16 %v19_v42  ;;  %v103_v48 = vpack.c.b16 %v95_v45, %v95_v45  ;;  %v527_v50 = vld [vmem:[%s672_s2] ss:$0 sm:$0xff] }
   0xf   :  { %301 = vmatpush.bf16.msra.mxu1 %v507_v12 }
  0x10   :  { %319 = vmatpush.bf16.msra.mxu2 %v515_v13  ;;  %489 = vmatmul.msk.bf16.vlgmr.msra.gmra.mxu3 %vm273_vm0, %v380_v20  ;;  %v101_v46 = vpack.c.b16 %v93_v43, %v93_v43  ;;  %v102_v47 = vpack.c.b16 %v94_v44, %v94_v44 }
  0x12   :  { %284 = vmatpush.bf16.msra.mxu0 %v498_v17 }
  0x13   :  { %302 = vmatpush.bf16.msra.mxu1 %v506_v18 }
  0x14   :  { %320 = vmatpush.bf16.msra.mxu2 %v514_v19 }
  0x16   :  { %285 = vmatpush.bf16.msra.mxu0 %v497_v21 }
  0x17   :  { %303 = vmatpush.bf16.msra.mxu1 %v505_v22 }
  0x18   :  { %321 = vmatpush.bf16.msra.mxu2 %v513_v23 }
  0x1a   :  { %286 = vmatpush.bf16.msra.mxu0 %v496_v24 }
  0x1b   :  { %304 = vmatpush.bf16.msra.mxu1 %v504_v25 }
  0x1c   :  { %322 = vmatpush.bf16.msra.mxu2 %v512_v26 }
  0x1e   :  { %287 = vmatpush.bf16.msra.mxu0 %v495_v28 }
  0x1f   :  { %305 = vmatpush.bf16.msra.mxu1 %v503_v29 }
  0x20   :  { %323 = vmatpush.bf16.msra.mxu2 %v511_v34  ;;  %490 = vmatmul.msk.bf16.gmra.mxu3 %vm273_vm0, %v104_v41 }
  0x21   :  { %288 = vmatmul.bf16.vlgmr.msra.gmra.mxu0 %v368_v38 }
  0x22   :  { %306 = vmatmul.bf16.vlgmr.msra.gmra.mxu1 %v372_v39 }
  0x23   :  { %324 = vmatmul.bf16.vlgmr.msra.gmra.mxu2 %v376_v40 }
  0x31   :  { %293 = vmatmul.bf16.gmra.mxu0 %v101_v46 }
  0x32   :  { %311 = vmatmul.bf16.gmra.mxu1 %v102_v47 }
  0x33   :  { %329 = vmatmul.bf16.gmra.mxu2 %v103_v48 }
  0x93   :  { %v343_v49 = vpop.f32.mrf.mxu3 }
  0x9b   :  { %v345_v53 = vpop.f32.mrf.mxu3 }
  0x9e   :  { %v289_v51 = vpop.f32.mrf.mxu0 }
  0x9f   :  { %v307_v52 = vpop.f32.mrf.mxu1  ;;  %v290_v54 = vadd.f32 %v527_v50, %v289_v51 }
  0xa1   :  { %v308_v56 = vadd.f32 %v307_v52, %v290_v54 }
  0xa3   :  { %v348_v59 = vpop.f32.mrf.mxu3 }
  0xa6   :  { %v325_v55 = vpop.f32.mrf.mxu2  ;;  %v291_v57 = vpop.f32.mrf.mxu0 }
  0xa7   :  { %v309_v58 = vpop.f32.mrf.mxu1  ;;  %v292_v60 = vadd.f32 %v527_v50, %v291_v57  ;;  %v326_v61 = vadd.f32 %v325_v55, %v308_v56 }
  0xa9   :  { %v310_v62 = vadd.f32 %v309_v58, %v292_v60  ;;  %v344_v0 = vadd.f32 %v343_v49, %v326_v61 }
  0xab   :  { %v350_v5 = vpop.f32.mrf.mxu3  ;;  %v352_v7 = vmax.f32 %v344_v0, 0.0 }
  0xae   :  { %v327_v63 = vpop.f32.mrf.mxu2  ;;  %v294_v2 = vpop.f32.mrf.mxu0 }
  0xaf   :  { %v328_v1 = vadd.f32 %v327_v63, %v310_v62  ;;  %v312_v3 = vpop.f32.mrf.mxu1  ;;  %v295_v4 = vadd.f32 %v527_v50, %v294_v2 }
  0xb1   :  { %v346_v6 = vadd.f32 %v345_v53, %v328_v1  ;;  %v313_v9 = vadd.f32 %v312_v3, %v295_v4 }
  0xb3   :  { %v353_v8 = vmax.f32 %v346_v6, 0.0 }
  0xb5   :  { %v525_v10 = vpack.c.bf16 %v353_v8, %v352_v7 }
  0xb6   :  { %v330_v11 = vpop.f32.mrf.mxu2  ;;  %v296_v13 = vpop.f32.mrf.mxu0 }
  0xb7   :  { %v331_v12 = vadd.f32 %v330_v11, %v313_v9  ;;  %526 = vst [vmem:[%s673_s3] sm:$0xff] %v525_v10   ;;  %v314_v14 = vpop.f32.mrf.mxu1 }
  0xb9   :  { %v349_v15 = vadd.f32 %v348_v59, %v331_v12 }
  0xbb   :  { %v354_v16 = vmax.f32 %v349_v15, 0.0 }
  0xbd   :  { %v357_v17 = vpack.c.bf16 %v354_v16, %v354_v16 }
  0xbe   :  { %v332_v18 = vpop.f32.mrf.mxu2 }
  0xbf   :  { %360 = vst [vmem:[%s673_s3 + $0x8] sm:$0x1] %v357_v17 }

// kernel: cnn_driver_forward.10
= control target key start
LH: loop header
LB: loop body
LE: loop exit
PB: predicated region body
PF: predicated region fallthrough
CT: control target
= control target key end

     0   :  { %vm319_vm0 = vcmask 523264   ;;  %s713_s1 = inlined_call_operand.vmem [shape: bf16[576,128], index: 1, kind: input, shape index: {}]   ;;  %s714_s0 = inlined_call_operand.vmem [shape: bf16[2,576], index: 0, kind: input, shape index: {}]   ;;  %s715_s2 = inlined_call_operand.vmem [shape: f32[1,128], index: 2, kind: input, shape index: {}]   ;;  %s716_s3 = inlined_call_operand.vmem [shape: bf16[2,128], index: 3, kind: output, shape index: {}]  }
   0x1   :  { %v546_v0 = vld [vmem:[%s713_s1 + $0x38] sm:$0xff]  ;;  %v545_v4 = vld [vmem:[%s713_s1 + $0x30] sm:$0xff]  ;;  %v544_v8 = vld [vmem:[%s713_s1 + $0x28] sm:$0xff] }
   0x2   :  { %v562_v1 = vld [vmem:[%s713_s1 + $0xb8] sm:$0xff]  ;;  %322 = vmatpush.bf16.msra.mxu0 %v546_v0  ;;  %v561_v5 = vld [vmem:[%s713_s1 + $0xb0] sm:$0xff]  ;;  %v560_v9 = vld [vmem:[%s713_s1 + $0xa8] sm:$0xff] }
   0x3   :  { %v570_v2 = vld [vmem:[%s713_s1 + $0xf8] sm:$0xff]  ;;  %348 = vmatpush.bf16.msra.mxu2 %v562_v1  ;;  %v569_v6 = vld [vmem:[%s713_s1 + $0xf0] sm:$0xff]  ;;  %v568_v10 = vld [vmem:[%s713_s1 + $0xe8] sm:$0xff] }
   0x4   :  { %v554_v3 = vld [vmem:[%s713_s1 + $0x78] sm:$0xff]  ;;  %361 = vmatpush.bf16.msra.mxu3 %v570_v2  ;;  %v553_v7 = vld [vmem:[%s713_s1 + $0x70] sm:$0xff]  ;;  %v552_v11 = vld [vmem:[%s713_s1 + $0x68] sm:$0xff] }
   0x5   :  { %335 = vmatpush.bf16.msra.mxu1 %v554_v3  ;;  %v543_v12 = vld [vmem:[%s713_s1 + $0x20] sm:$0xff]  ;;  %v542_v17 = vld [vmem:[%s713_s1 + $0x18] sm:$0xff]  ;;  %v541_v21 = vld [vmem:[%s713_s1 + $0x10] sm:$0xff] }
   0x6   :  { %323 = vmatpush.bf16.msra.mxu0 %v545_v4  ;;  %v559_v13 = vld [vmem:[%s713_s1 + $0xa0] sm:$0xff]  ;;  %v558_v18 = vld [vmem:[%s713_s1 + $0x98] sm:$0xff]  ;;  %v557_v22 = vld [vmem:[%s713_s1 + $0x90] sm:$0xff] }
   0x7   :  { %349 = vmatpush.bf16.msra.mxu2 %v561_v5  ;;  %v15_v14 = vld [vmem:[%s714_s0] sm:$0x1f]  ;;  %v566_v19 = vld [vmem:[%s713_s1 + $0xd8] sm:$0xff]  ;;  %v565_v23 = vld [vmem:[%s713_s1 + $0xd0] sm:$0xff] }
   0x8   :  { %362 = vmatpush.bf16.msra.mxu3 %v569_v6  ;;  %v567_v15 = vld [vmem:[%s713_s1 + $0xe0] sm:$0xff]  ;;  %93 = vst [vmem:[#allocation1] ss:$9 sm:$0xff] %v15_v14  ;;  %v550_v20 = vld [vmem:[%s713_s1 + $0x58] sm:$0xff]  ;;  %v549_v24 = vld [vmem:[%s713_s1 + $0x50] sm:$0xff] }
   0x9   :  { %336 = vmatpush.bf16.msra.mxu1 %v553_v7  ;;  %v551_v16 = vld [vmem:[%s713_s1 + $0x60] sm:$0xff]  ;;  %v540_v25 = vld [vmem:[%s713_s1 + $0x8] sm:$0xff]  ;;  %v574_v33 = vld [vmem:[%s713_s1 + $0x118] sm:$0xff] }
   0xa   :  { %324 = vmatpush.bf16.msra.mxu0 %v544_v8  ;;  %v556_v26 = vld [vmem:[%s713_s1 + $0x88] sm:$0xff]  ;;  %v539_v29 = vld [vmem:[%s713_s1] sm:$0xff]  ;;  %v573_v38 = vld [vmem:[%s713_s1 + $0x110] sm:$0xff] }
   0xb   :  { %350 = vmatpush.bf16.msra.mxu2 %v560_v9  ;;  %v564_v27 = vld [vmem:[%s713_s1 + $0xc8] sm:$0xff]  ;;  %v555_v30 = vld [vmem:[%s713_s1 + $0x80] sm:$0xff] }
   0xc   :  { %363 = vmatpush.bf16.msra.mxu3 %v568_v10  ;;  %v548_v28 = vld [vmem:[%s713_s1 + $0x48] sm:$0xff]  ;;  %v563_v31 = vld [vmem:[%s713_s1 + $0xc0] sm:$0xff] }
   0xd   :  { %337 = vmatpush.bf16.msra.mxu1 %v552_v11  ;;  %v547_v32 = vld [vmem:[%s713_s1 + $0x40] sm:$0xff]  ;;  %v572_v39 = vld [vmem:[%s713_s1 + $0x108] sm:$0xff] }
   0xe   :  { %325 = vmatpush.bf16.msra.mxu0 %v543_v12  ;;  %v571_v40 = vld [vmem:[%s713_s1 + $0x100] sm:$0xff] }
   0xf   :  { %351 = vmatpush.bf16.msra.mxu2 %v559_v13  ;;  %v94_v34 = vld [vmem:[#allocation1] sm:$0xff]  ;;  %v96_v35 = vld [vmem:[#allocation1 + $0x12] sm:$0xff]  ;;  %v95_v37 = vld [vmem:[#allocation1 + $0x9] sm:$0xff] }
  0x10   :  { %364 = vmatpush.bf16.msra.mxu3 %v567_v15  ;;  %v97_v36 = vld [vmem:[#allocation1 + $0x1b] sm:$0xff]  ;;  %v98_v41 = vld [vmem:[#allocation1 + $0x24] sm:$0xff] }
  0x11   :  { %338 = vmatpush.bf16.msra.mxu1 %v551_v16  ;;  %v575_v43 = vld [vmem:[%s715_s2] ss:$0 sm:$0xff] }
  0x12   :  { %326 = vmatpush.bf16.msra.mxu0 %v542_v17 }
  0x13   :  { %352 = vmatpush.bf16.msra.mxu2 %v558_v18 }
  0x14   :  { %365 = vmatpush.bf16.msra.mxu3 %v566_v19 }
  0x15   :  { %339 = vmatpush.bf16.msra.mxu1 %v550_v20 }
  0x16   :  { %327 = vmatpush.bf16.msra.mxu0 %v541_v21 }
  0x17   :  { %353 = vmatpush.bf16.msra.mxu2 %v557_v22 }
  0x18   :  { %366 = vmatpush.bf16.msra.mxu3 %v565_v23 }
  0x19   :  { %340 = vmatpush.bf16.msra.mxu1 %v549_v24 }
  0x1a   :  { %328 = vmatpush.bf16.msra.mxu0 %v540_v25 }
  0x1b   :  { %354 = vmatpush.bf16.msra.mxu2 %v556_v26 }
  0x1c   :  { %367 = vmatpush.bf16.msra.mxu3 %v564_v27 }
  0x1d   :  { %341 = vmatpush.bf16.msra.mxu1 %v548_v28 }
  0x1e   :  { %329 = vmatpush.bf16.msra.mxu0 %v539_v29 }
  0x1f   :  { %355 = vmatpush.bf16.msra.mxu2 %v555_v30 }
  0x20   :  { %368 = vmatpush.bf16.msra.mxu3 %v563_v31 }
  0x21   :  { %342 = vmatpush.bf16.msra.mxu1 %v547_v32  ;;  %330 = vmatmul.bf16.vlgmr.msra.gmra.mxu0 %v94_v34 }
  0x22   :  { %378 = vmatpush.bf16.msrb.mxu0 %v574_v33  ;;  %356 = vmatmul.bf16.vlgmr.msra.gmra.mxu2 %v96_v35 }
  0x23   :  { %369 = vmatmul.bf16.vlgmr.msra.gmra.mxu3 %v97_v36 }
  0x24   :  { %343 = vmatmul.bf16.vlgmr.msra.gmra.mxu1 %v95_v37 }
  0x26   :  { %379 = vmatpush.bf16.msrb.mxu0 %v573_v38 }
  0x2a   :  { %380 = vmatpush.bf16.msrb.mxu0 %v572_v39 }
  0x2e   :  { %381 = vmatpush.bf16.msrb.mxu0 %v571_v40 }
  0x31   :  { %538 = vmatmul.msk.bf16.vlgmr.msrb.gmra.mxu0 %vm319_vm0, %v98_v41 }
  0x9e   :  { %v331_v42 = vpop.f32.mrf.mxu0 }
  0x9f   :  { %v332_v45 = vadd.f32 %v575_v43, %v331_v42 }
  0xa1   :  { %v344_v44 = vpop.f32.mrf.mxu1 }
  0xa2   :  { %v345_v49 = vadd.f32 %v344_v44, %v332_v45 }
  0xa5   :  { %v357_v46 = vpop.f32.mrf.mxu2 }
  0xa6   :  { %v370_v47 = vpop.f32.mrf.mxu3  ;;  %v333_v48 = vpop.f32.mrf.mxu0  ;;  %v358_v51 = vadd.f32 %v357_v46, %v345_v49 }
  0xa8   :  { %v371_v53 = vadd.f32 %v370_v47, %v358_v51 }
  0xa9   :  { %v346_v50 = vpop.f32.mrf.mxu1 }
  0xad   :  { %v359_v52 = vpop.f32.mrf.mxu2 }
  0xae   :  { %v372_v54 = vpop.f32.mrf.mxu3  ;;  %v383_v55 = vpop.f32.mrf.mxu0 }
  0xaf   :  { %v384_v56 = vadd.f32 %v383_v55, %v371_v53 }
  0xb1   :  { %v387_v57 = vmax.f32 %v384_v56, 0.0 }
  0xb3   :  { %v388_v58 = vpack.c.bf16 %v387_v57, %v387_v57 }
  0xb5   :  { %389 = vst [vmem:[%s716_s3] sm:$0x1] %v388_v58 }
  0xb6   :  { %v385_v59 = vpop.f32.mrf.mxu0 }

// kernel: cnn_driver_forward.11
= control target key start
LH: loop header
LB: loop body
LE: loop exit
PB: predicated region body
PF: predicated region fallthrough
CT: control target
= control target key end

     0   :  { %vm306_vm0 = vcmask 523264   ;;  %vm1051_vm1 = vcmask 1045504   ;;  %vm1047_vm2 = vcmask 97280   ;;  %vm1247_vm3 = vcmask 1041408   ;;  %s2609_s1 = inlined_call_operand.vmem [shape: bf16[64,1164], index: 1, kind: input, shape index: {}]   ;;  %s2610_s0 = inlined_call_operand.vmem [shape: bf16[2,64], index: 0, kind: input, shape index: {}]   ;;  %s2611_s3 = inlined_call_operand.vmem [shape: bf16[1164,100], index: 3, kind: input, shape index: {}]   ;;  %s2612_s4 = inlined_call_operand.vmem [shape: f32[1,100], index: 4, kind: input, shape index: {}]   ;;  %s2613_s2 = inlined_call_operand.vmem [shape: f32[1,1164], index: 2, kind: input, shape index: {}]   ;;  %s2614_s6 = inlined_call_operand.vmem [shape: f32[1,50], index: 6, kind: input, shape index: {}]   ;;  %s2615_s5 = inlined_call_operand.vmem [shape: bf16[100,50], index: 5, kind: input, shape index: {}]   ;;  %s2616_s7 = inlined_call_operand.vmem [shape: bf16[50,10], index: 7, kind: input, shape index: {}]   ;;  %s2617_s8 = inlined_call_operand.vmem [shape: f32[1,10], index: 8, kind: input, shape index: {}]   ;;  %s2618_s9 = inlined_call_operand.vmem [shape: bf16[10,1], index: 9, kind: input, shape index: {}]   ;;  %s2619_s10 = inlined_call_operand.<no memory space> [shape: f32[1,1], index: 10, kind: input, shape index: {}]   ;;  %s2620_s11 = inlined_call_operand.vmem [shape: f32[2,1], index: 11, kind: output, shape index: {}]  }
   0x1   :  { %v1481_v0 = vld [vmem:[%s2609_s1 + $0xf0] sm:$0xf]  ;;  %v1900_v1 = vld [vmem:[%s2609_s1 + $0x114] sm:$0xf0]  ;;  %v1895_v2 = vld [vmem:[%s2609_s1 + $0xf4] sm:$0xf] }
   0x2   :  { %v1482_v3 = vor.u32 %v1900_v1, %v1481_v0  ;;  %v1483_v4 = vld [vmem:[%s2609_s1 + $0x118] sm:$0xf0]  ;;  %v1441_v5 = vld [vmem:[%s2609_s1 + $0xa0] sm:$0xf]  ;;  %v1890_v6 = vld [vmem:[%s2609_s1 + $0xc4] sm:$0xf0] }
   0x3   :  { %v1486_v7 = vor.u32 %v1895_v2, %v1483_v4  ;;  %v1885_v8 = vld [vmem:[%s2609_s1 + $0xa4] sm:$0xf]  ;;  %v1443_v9 = vld [vmem:[%s2609_s1 + $0xc8] sm:$0xf0]  ;;  %v1489_v10 = vld [vmem:[%s2609_s1 + $0xf8] sm:$0xf]  ;;  %v1442_v11 = vor.u32 %v1890_v6, %v1441_v5 }
   0x4   :  { %314 = vmatpush.bf16.msra.mxu0 %v1482_v3  ;;  %v1901_v12 = vld [vmem:[%s2609_s1 + $0x11c] sm:$0xf0]  ;;  %v1896_v13 = vld [vmem:[%s2609_s1 + $0xfc] sm:$0xf]  ;;  %v1491_v14 = vld [vmem:[%s2609_s1 + $0x120] sm:$0xf0]  ;;  %v1446_v15 = vor.u32 %v1885_v8, %v1443_v9 }
   0x5   :  { %327 = vmatpush.bf16.msra.mxu1 %v1486_v7  ;;  %v1490_v16 = vor.u32 %v1901_v12, %v1489_v10  ;;  %v1494_v17 = vor.u32 %v1896_v13, %v1491_v14  ;;  %v1401_v18 = vld [vmem:[%s2609_s1 + $0x50] sm:$0xf]  ;;  %v1880_v19 = vld [vmem:[%s2609_s1 + $0x74] sm:$0xf0]  ;;  %v1875_v20 = vld [vmem:[%s2609_s1 + $0x54] sm:$0xf] }
   0x6   :  { %v1403_v21 = vld [vmem:[%s2609_s1 + $0x78] sm:$0xf0]  ;;  %v1449_v22 = vld [vmem:[%s2609_s1 + $0xa8] sm:$0xf]  ;;  %v1891_v23 = vld [vmem:[%s2609_s1 + $0xcc] sm:$0xf0]  ;;  %v1402_v27 = vor.u32 %v1880_v19, %v1401_v18 }
   0x7   :  { %340 = vmatpush.bf16.msra.mxu2 %v1490_v16  ;;  %353 = vmatpush.bf16.msra.mxu3 %v1494_v17  ;;  %v1450_v24 = vor.u32 %v1891_v23, %v1449_v22  ;;  %v1886_v25 = vld [vmem:[%s2609_s1 + $0xac] sm:$0xf]  ;;  %v1451_v26 = vld [vmem:[%s2609_s1 + $0xd0] sm:$0xf0]  ;;  %v1361_v29 = vld [vmem:[%s2609_s1] sm:$0xf]  ;;  %v1406_v32 = vor.u32 %v1875_v20, %v1403_v21 }
   0x8   :  { %315 = vmatpush.bf16.msra.mxu0 %v1442_v11  ;;  %v1454_v28 = vor.u32 %v1886_v25, %v1451_v26  ;;  %v1870_v30 = vld [vmem:[%s2609_s1 + $0x24] sm:$0xf0]  ;;  %v1865_v31 = vld [vmem:[%s2609_s1 + $0x4] sm:$0xf]  ;;  %v1409_v33 = vld [vmem:[%s2609_s1 + $0x58] sm:$0xf] }
   0x9   :  { %328 = vmatpush.bf16.msra.mxu1 %v1446_v15  ;;  %v1881_v34 = vld [vmem:[%s2609_s1 + $0x7c] sm:$0xf0]  ;;  %v1876_v35 = vld [vmem:[%s2609_s1 + $0x5c] sm:$0xf]  ;;  %v1363_v36 = vld [vmem:[%s2609_s1 + $0x28] sm:$0xf0]  ;;  %v1362_v43 = vor.u32 %v1870_v30, %v1361_v29 }
   0xa   :  { %v1411_v37 = vld [vmem:[%s2609_s1 + $0x80] sm:$0xf0]  ;;  %v1497_v38 = vld [vmem:[%s2609_s1 + $0x100] sm:$0xf]  ;;  %v1410_v39 = vor.u32 %v1881_v34, %v1409_v33  ;;  %v1902_v41 = vld [vmem:[%s2609_s1 + $0x124] sm:$0xf0]  ;;  %v1366_v47 = vor.u32 %v1865_v31, %v1363_v36 }
   0xb   :  { %341 = vmatpush.bf16.msra.mxu2 %v1450_v24  ;;  %354 = vmatpush.bf16.msra.mxu3 %v1454_v28  ;;  %v1414_v40 = vor.u32 %v1876_v35, %v1411_v37  ;;  %v1369_v42 = vld [vmem:[%s2609_s1 + $0x8] sm:$0xf]  ;;  %v1871_v44 = vld [vmem:[%s2609_s1 + $0x2c] sm:$0xf0]  ;;  %v1897_v45 = vld [vmem:[%s2609_s1 + $0x104] sm:$0xf]  ;;  %v1498_v48 = vor.u32 %v1902_v41, %v1497_v38 }
   0xc   :  { %316 = vmatpush.bf16.msra.mxu0 %v1402_v27  ;;  %v1499_v46 = vld [vmem:[%s2609_s1 + $0x128] sm:$0xf0]  ;;  %v1371_v50 = vld [vmem:[%s2609_s1 + $0x30] sm:$0xf0]  ;;  %v1457_v52 = vld [vmem:[%s2609_s1 + $0xb0] sm:$0xf]  ;;  %v1370_v55 = vor.u32 %v1871_v44, %v1369_v42 }
   0xd   :  { %329 = vmatpush.bf16.msra.mxu1 %v1406_v32  ;;  %v1866_v49 = vld [vmem:[%s2609_s1 + $0xc] sm:$0xf]  ;;  %v1502_v51 = vor.u32 %v1897_v45, %v1499_v46  ;;  %v1892_v53 = vld [vmem:[%s2609_s1 + $0xd4] sm:$0xf0]  ;;  %v1505_v54 = vld [vmem:[%s2609_s1 + $0x108] sm:$0xf] }
   0xe   :  { %v1887_v56 = vld [vmem:[%s2609_s1 + $0xb4] sm:$0xf]  ;;  %v1459_v57 = vld [vmem:[%s2609_s1 + $0xd8] sm:$0xf0]  ;;  %v1903_v58 = vld [vmem:[%s2609_s1 + $0x12c] sm:$0xf0]  ;;  %v1374_v60 = vor.u32 %v1866_v49, %v1371_v50  ;;  %v1458_v61 = vor.u32 %v1892_v53, %v1457_v52 }
   0xf   :  { %342 = vmatpush.bf16.msra.mxu2 %v1410_v39  ;;  %355 = vmatpush.bf16.msra.mxu3 %v1414_v40  ;;  %v2181_v59 = vld [vmem:[%s2610_s0] sm:$0x1]  ;;  %v1506_v62 = vor.u32 %v1903_v58, %v1505_v54  ;;  %v1898_v63 = vld [vmem:[%s2609_s1 + $0x10c] sm:$0xf]  ;;  %v1507_v0 = vld [vmem:[%s2609_s1 + $0x130] sm:$0xf0]  ;;  %v1462_v2 = vor.u32 %v1887_v56, %v1459_v57 }
  0x10   :  { %317 = vmatpush.bf16.msra.mxu0 %v1362_v43  ;;  %v1417_v1 = vld [vmem:[%s2609_s1 + $0x60] sm:$0xf]  ;;  %v1882_v3 = vld [vmem:[%s2609_s1 + $0x84] sm:$0xf0]  ;;  %v1465_v4 = vld [vmem:[%s2609_s1 + $0xb8] sm:$0xf]  ;;  %v1510_v8 = vor.u32 %v1898_v63, %v1507_v0 }
  0x11   :  { %330 = vmatpush.bf16.msra.mxu1 %v1366_v47  ;;  %v1893_v5 = vld [vmem:[%s2609_s1 + $0xdc] sm:$0xf0]  ;;  %v1877_v6 = vld [vmem:[%s2609_s1 + $0x64] sm:$0xf]  ;;  %v1419_v7 = vld [vmem:[%s2609_s1 + $0x88] sm:$0xf0]  ;;  %v1418_v10 = vor.u32 %v1882_v3, %v1417_v1 }
  0x12   :  { %v1888_v9 = vld [vmem:[%s2609_s1 + $0xbc] sm:$0xf]  ;;  %v1466_v11 = vor.u32 %v1893_v5, %v1465_v4  ;;  %v1467_v12 = vld [vmem:[%s2609_s1 + $0xe0] sm:$0xf0]  ;;  %v1377_v13 = vld [vmem:[%s2609_s1 + $0x10] sm:$0xf]  ;;  %v1422_v15 = vor.u32 %v1877_v6, %v1419_v7 }
  0x13   :  { %1519 = vmatmul.msk.bf16.vlgmr.msra.gmra.mxu0 %vm306_vm0, %v2181_v59  ;;  %343 = vmatpush.bf16.msra.mxu2 %v1370_v55  ;;  %v1872_v14 = vld [vmem:[%s2609_s1 + $0x34] sm:$0xf0]  ;;  %v1867_v16 = vld [vmem:[%s2609_s1 + $0x14] sm:$0xf]  ;;  %v1425_v17 = vld [vmem:[%s2609_s1 + $0x68] sm:$0xf]  ;;  %v1470_v22 = vor.u32 %v1888_v9, %v1467_v12 }
  0x14   :  { %366 = vmatpush.bf16.msrb.mxu0 %v1498_v48  ;;  %1520 = vmatmul.msk.bf16.vlgmr.msra.gmra.mxu1 %vm306_vm0, %v2181_v59  ;;  %v1883_v18 = vld [vmem:[%s2609_s1 + $0x8c] sm:$0xf0]  ;;  %v1379_v19 = vld [vmem:[%s2609_s1 + $0x38] sm:$0xf0]  ;;  %v1904_v21 = vld [vmem:[%s2609_s1 + $0x134] sm:$0xf0]  ;;  %v1378_v25 = vor.u32 %v1872_v14, %v1377_v13 }
  0x15   :  { %379 = vmatpush.bf16.msrb.mxu1 %v1502_v51  ;;  %356 = vmatpush.bf16.msra.mxu3 %v1374_v60  ;;  %v1513_v20 = vld [vmem:[%s2609_s1 + $0x110] sm:$0xf]  ;;  %v1899_v23 = vld [vmem:[%s2609_s1 + $0x114] sm:$0xf]  ;;  %v1515_v24 = vld [vmem:[%s2609_s1 + $0x138] sm:$0xf0]  ;;  %v1426_v26 = vor.u32 %v1883_v18, %v1425_v17  ;;  %v1382_v29 = vor.u32 %v1867_v16, %v1379_v19 }
  0x16   :  { %1521 = vmatmul.msk.bf16.vlgmr.msra.gmra.mxu2 %vm306_vm0, %v2181_v59  ;;  %v1878_v27 = vld [vmem:[%s2609_s1 + $0x6c] sm:$0xf]  ;;  %v1427_v28 = vld [vmem:[%s2609_s1 + $0x90] sm:$0xf0]  ;;  %v1514_v30 = vor.u32 %v1904_v21, %v1513_v20  ;;  %v1385_v31 = vld [vmem:[%s2609_s1 + $0x18] sm:$0xf]  ;;  %v1518_v33 = vor.u32 %v1899_v23, %v1515_v24 }
  0x17   :  { %392 = vmatpush.bf16.msrb.mxu2 %v1506_v62  ;;  %v1873_v32 = vld [vmem:[%s2609_s1 + $0x3c] sm:$0xf0]  ;;  %v1894_v35 = vld [vmem:[%s2609_s1 + $0xe4] sm:$0xf0]  ;;  %v1430_v36 = vor.u32 %v1878_v27, %v1427_v28  ;;  %v1889_v37 = vld [vmem:[%s2609_s1 + $0xc4] sm:$0xf] }
  0x18   :  { %367 = vmatpush.bf16.msrb.mxu0 %v1458_v61  ;;  %1522 = vmatmul.msk.bf16.vlgmr.msra.gmra.mxu3 %vm306_vm0, %v2181_v59  ;;  %v1473_v34 = vld [vmem:[%s2609_s1 + $0xc0] sm:$0xf]  ;;  %v1475_v38 = vld [vmem:[%s2609_s1 + $0xe8] sm:$0xf0]  ;;  %v1386_v39 = vor.u32 %v1873_v32, %v1385_v31  ;;  %v1868_v40 = vld [vmem:[%s2609_s1 + $0x1c] sm:$0xf] }
  0x19   :  { %380 = vmatpush.bf16.msrb.mxu1 %v1462_v2  ;;  %405 = vmatpush.bf16.msrb.mxu3 %v1510_v8  ;;  %v1387_v41 = vld [vmem:[%s2609_s1 + $0x40] sm:$0xf0]  ;;  %v1474_v42 = vor.u32 %v1894_v35, %v1473_v34  ;;  %v1912_v43 = vld [vmem:[%s2611_s3 + $0x38] sm:$0xff]  ;;  %v1478_v44 = vor.u32 %v1889_v37, %v1475_v38  ;;  %v1433_v45 = vld [vmem:[%s2609_s1 + $0x70] sm:$0xf]  ;;  %vm1302_vm4 = vcmask 1040384  }
  0x1a   :  { %v1884_v46 = vld [vmem:[%s2609_s1 + $0x94] sm:$0xf0]  ;;  %v1390_v47 = vor.u32 %v1868_v40, %v1387_v41  ;;  %v1879_v48 = vld [vmem:[%s2609_s1 + $0x74] sm:$0xf]  ;;  %v1435_v49 = vld [vmem:[%s2609_s1 + $0x98] sm:$0xf0] }
  0x1b   :  { %393 = vmatpush.bf16.msrb.mxu2 %v1466_v11  ;;  %v1920_v50 = vld [vmem:[%s2611_s3 + $0x78] sm:$0xff]  ;;  %v1434_v51 = vor.u32 %v1884_v46, %v1433_v45  ;;  %v1438_v52 = vor.u32 %v1879_v48, %v1435_v49  ;;  %v1393_v53 = vld [vmem:[%s2609_s1 + $0x20] sm:$0xf]  ;;  %v1874_v54 = vld [vmem:[%s2609_s1 + $0x44] sm:$0xf0]  ;;  %vm1243_vm5 = vcmask 818176  }
  0x1c   :  { %368 = vmatpush.bf16.msrb.mxu0 %v1418_v10  ;;  %v1869_v55 = vld [vmem:[%s2609_s1 + $0x24] sm:$0xf]  ;;  %v1395_v56 = vld [vmem:[%s2609_s1 + $0x48] sm:$0xf0]  ;;  %v1911_v57 = vld [vmem:[%s2611_s3 + $0x30] sm:$0xff]  ;;  %v1394_v60 = vor.u32 %v1874_v54, %v1393_v53  ;;  %vm1336_vm6 = vcmask 1044480  }
  0x1d   :  { %381 = vmatpush.bf16.msrb.mxu1 %v1422_v15  ;;  %406 = vmatpush.bf16.msrb.mxu3 %v1470_v22  ;;  %v1919_v58 = vld [vmem:[%s2611_s3 + $0x70] sm:$0xff]  ;;  %v1398_v61 = vor.u32 %v1869_v55, %v1395_v56  ;;  %v1928_v62 = vld [vmem:[%s2611_s3 + $0xb8] sm:$0xff]  ;;  %v1910_v63 = vld [vmem:[%s2611_s3 + $0x28] sm:$0xff]  ;;  %vm1298_vm7 = vcmask 408576   ;;  %vm1332_vm8 = vcmask 80896   ;;  %vm1353_vm9 = vcmask 1024  }
  0x1e   :  { %v1936_v0 = vld [vmem:[%s2611_s3 + $0xf8] sm:$0xff]  ;;  %v1918_v1 = vld [vmem:[%s2611_s3 + $0x68] sm:$0xff]  ;;  %v1927_v2 = vld [vmem:[%s2611_s3 + $0xb0] sm:$0xff] }
  0x1f   :  { %394 = vmatpush.bf16.msrb.mxu2 %v1426_v26  ;;  %v1909_v3 = vld [vmem:[%s2611_s3 + $0x20] sm:$0xff]  ;;  %v1935_v4 = vld [vmem:[%s2611_s3 + $0xf0] sm:$0xff]  ;;  %v1908_v6 = vld [vmem:[%s2611_s3 + $0x18] sm:$0xff] }
  0x20   :  { %369 = vmatpush.bf16.msrb.mxu0 %v1378_v25  ;;  %v1917_v5 = vld [vmem:[%s2611_s3 + $0x60] sm:$0xff]  ;;  %v1916_v7 = vld [vmem:[%s2611_s3 + $0x58] sm:$0xff]  ;;  %v1926_v8 = vld [vmem:[%s2611_s3 + $0xa8] sm:$0xff] }
  0x21   :  { %382 = vmatpush.bf16.msrb.mxu1 %v1382_v29  ;;  %407 = vmatpush.bf16.msrb.mxu3 %v1430_v36  ;;  %v1934_v9 = vld [vmem:[%s2611_s3 + $0xe8] sm:$0xff]  ;;  %v1907_v10 = vld [vmem:[%s2611_s3 + $0x10] sm:$0xff]  ;;  %v1925_v12 = vld [vmem:[%s2611_s3 + $0xa0] sm:$0xff] }
  0x22   :  { %v1915_v11 = vld [vmem:[%s2611_s3 + $0x50] sm:$0xff]  ;;  %v1906_v13 = vld [vmem:[%s2611_s3 + $0x8] sm:$0xff]  ;;  %v1924_v15 = vld [vmem:[%s2611_s3 + $0x98] sm:$0xff] }
  0x23   :  { %395 = vmatpush.bf16.msrb.mxu2 %v1386_v39  ;;  %1523 = vmatmul.msk.bf16.vlgmr.msrb.gmra.mxu0 %vm306_vm0, %v2181_v59  ;;  %v1914_v14 = vld [vmem:[%s2611_s3 + $0x48] sm:$0xff]  ;;  %v1932_v16 = vld [vmem:[%s2611_s3 + $0xd8] sm:$0xff]  ;;  %v1905_v17 = vld [vmem:[%s2611_s3] sm:$0xff] }
  0x24   :  { %418 = vmatpush.bf16.msra.mxu0 %v1514_v30  ;;  %1524 = vmatmul.msk.bf16.vlgmr.msrb.gmra.mxu1 %vm306_vm0, %v2181_v59  ;;  %v1944_v18 = vld [vmem:[%s2611_s3 + $0x138] sm:$0xff]  ;;  %v1913_v19 = vld [vmem:[%s2611_s3 + $0x40] sm:$0xff]  ;;  %v1923_v21 = vld [vmem:[%s2611_s3 + $0x90] sm:$0xff] }
  0x25   :  { %431 = vmatpush.bf16.msra.mxu1 %v1518_v33  ;;  %408 = vmatpush.bf16.msrb.mxu3 %v1390_v47  ;;  %v1952_v20 = vld [vmem:[%s2611_s3 + $0x178] sm:$0xff]  ;;  %v1931_v22 = vld [vmem:[%s2611_s3 + $0xd0] sm:$0xff]  ;;  %v1922_v25 = vld [vmem:[%s2611_s3 + $0x88] sm:$0xff] }
  0x26   :  { %1525 = vmatmul.msk.bf16.vlgmr.msrb.gmra.mxu2 %vm306_vm0, %v2181_v59  ;;  %v1943_v23 = vld [vmem:[%s2611_s3 + $0x130] sm:$0xff]  ;;  %v1930_v26 = vld [vmem:[%s2611_s3 + $0xc8] sm:$0xff]  ;;  %v1941_v28 = vld [vmem:[%s2611_s3 + $0x120] sm:$0xff] }
  0x27   :  { %1055 = vmatpush.bf16.msra.mxu2 %v1912_v43  ;;  %v1951_v24 = vld [vmem:[%s2611_s3 + $0x170] sm:$0xff]  ;;  %v1942_v27 = vld [vmem:[%s2611_s3 + $0x128] sm:$0xff]  ;;  %v1940_v29 = vld [vmem:[%s2611_s3 + $0x118] sm:$0xff] }
  0x28   :  { %419 = vmatpush.bf16.msra.mxu0 %v1474_v42  ;;  %1526 = vmatmul.msk.bf16.vlgmr.msrb.gmra.mxu3 %vm306_vm0, %v2181_v59  ;;  %v1939_v30 = vld [vmem:[%s2611_s3 + $0x110] sm:$0xff]  ;;  %v1950_v31 = vld [vmem:[%s2611_s3 + $0x168] sm:$0xff]  ;;  %v1921_v32 = vld [vmem:[%s2611_s3 + $0x80] sm:$0xff] }
  0x29   :  { %432 = vmatpush.bf16.msra.mxu1 %v1478_v44  ;;  %1068 = vmatpush.bf16.msra.mxu3 %v1920_v50  ;;  %v1960_v33 = vld [vmem:[%s2611_s3 + $0x1b8] sm:$0xff]  ;;  %v1929_v34 = vld [vmem:[%s2611_s3 + $0xc0] sm:$0xff]  ;;  %v1938_v35 = vld [vmem:[%s2611_s3 + $0x108] sm:$0xff] }
  0x2a   :  { %v1949_v36 = vld [vmem:[%s2611_s3 + $0x160] sm:$0xff]  ;;  %v1968_v37 = vld [vmem:[%s2611_s3 + $0x1f8] sm:$0xff]  ;;  %v1959_v38 = vld [vmem:[%s2611_s3 + $0x1b0] sm:$0xff] }
  0x2b   :  { %1056 = vmatpush.bf16.msra.mxu2 %v1911_v57  ;;  %v1937_v39 = vld [vmem:[%s2611_s3 + $0x100] sm:$0xff]  ;;  %v1948_v40 = vld [vmem:[%s2611_s3 + $0x158] sm:$0xff]  ;;  %v1967_v41 = vld [vmem:[%s2611_s3 + $0x1f0] sm:$0xff] }
  0x2c   :  { %420 = vmatpush.bf16.msra.mxu0 %v1434_v51  ;;  %v1958_v42 = vld [vmem:[%s2611_s3 + $0x1a8] sm:$0xff]  ;;  %v1947_v43 = vld [vmem:[%s2611_s3 + $0x150] sm:$0xff]  ;;  %v1957_v45 = vld [vmem:[%s2611_s3 + $0x1a0] sm:$0xff] }
  0x2d   :  { %433 = vmatpush.bf16.msra.mxu1 %v1438_v52  ;;  %1069 = vmatpush.bf16.msra.mxu3 %v1919_v58  ;;  %v1966_v44 = vld [vmem:[%s2611_s3 + $0x1e8] sm:$0xff]  ;;  %v1965_v47 = vld [vmem:[%s2611_s3 + $0x1e0] sm:$0xff]  ;;  %v1956_v48 = vld [vmem:[%s2611_s3 + $0x198] sm:$0xff] }
  0x2e   :  { %v1946_v46 = vld [vmem:[%s2611_s3 + $0x148] sm:$0xff]  ;;  %v1945_v49 = vld [vmem:[%s2611_s3 + $0x140] sm:$0xff]  ;;  %v1964_v50 = vld [vmem:[%s2611_s3 + $0x1d8] sm:$0xff] }
  0x2f   :  { %1057 = vmatpush.bf16.msra.mxu2 %v1910_v63  ;;  %v1955_v51 = vld [vmem:[%s2611_s3 + $0x190] sm:$0xff]  ;;  %v2500_v53 = vld [vmem:[%s2613_s2] sm:$0xff]  ;;  %v1954_v54 = vld [vmem:[%s2611_s3 + $0x188] sm:$0xff] }
  0x30   :  { %421 = vmatpush.bf16.msra.mxu0 %v1394_v60  ;;  %v1963_v52 = vld [vmem:[%s2611_s3 + $0x1d0] sm:$0xff]  ;;  %v1962_v55 = vld [vmem:[%s2611_s3 + $0x1c8] sm:$0xff]  ;;  %v86_v56 = vperm.slane %v2500_v53, 0  ;;  %v1953_v57 = vld [vmem:[%s2611_s3 + $0x180] sm:$0xff]  ;;  %v87_v58 = vperm.slane %v2500_v53, 1 }
  0x31   :  { %434 = vmatpush.bf16.msra.mxu1 %v1398_v61  ;;  %1070 = vmatpush.bf16.msra.mxu3 %v1918_v1  ;;  %v1819_v60 = vld [vmem:[%s2611_s3 + $0x240] sm:$0xf]  ;;  %v1977_v61 = vld [vmem:[%s2611_s3 + $0x240] sm:$0x30] }
  0x33   :  { %1058 = vmatpush.bf16.msra.mxu2 %v1909_v3  ;;  %1527 = vmatmul.msk.bf16.vlgmr.msra.gmra.mxu0 %vm306_vm0, %v2181_v59  ;;  %v1820_v3 = vor.u32 %v1977_v61, %v1819_v60 }
  0x34   :  { %1081 = vmatpush.bf16.msrb.mxu0 %v1928_v62  ;;  %1528 = vmatmul.msk.bf16.vlgmr.msra.gmra.mxu1 %vm306_vm0, %v2181_v59  ;;  %v1933_v59 = vld [vmem:[%s2611_s3 + $0xe0] sm:$0xff] }
  0x35   :  { %1094 = vmatpush.bf16.msrb.mxu1 %v1936_v0  ;;  %1071 = vmatpush.bf16.msra.mxu3 %v1917_v5  ;;  %v1961_v62 = vld [vmem:[%s2611_s3 + $0x1c0] sm:$0xff] }
  0x37   :  { %1059 = vmatpush.bf16.msra.mxu2 %v1908_v6  ;;  %v1976_v6 = vld [vmem:[%s2611_s3 + $0x238] sm:$0xff] }
  0x38   :  { %1082 = vmatpush.bf16.msrb.mxu0 %v1927_v2 }
  0x39   :  { %1095 = vmatpush.bf16.msrb.mxu1 %v1935_v4  ;;  %1072 = vmatpush.bf16.msra.mxu3 %v1916_v7 }
  0x3b   :  { %1060 = vmatpush.bf16.msra.mxu2 %v1907_v10  ;;  %v1053_v10 = vsel %vm1051_vm1, %v1820_v3, 0 }
  0x3c   :  { %1083 = vmatpush.bf16.msrb.mxu0 %v1926_v8 }
  0x3d   :  { %1096 = vmatpush.bf16.msrb.mxu1 %v1934_v9  ;;  %1073 = vmatpush.bf16.msra.mxu3 %v1915_v11  ;;  %v88_v9 = vperm.slane %v2500_v53, 2  ;;  %v89_v11 = vperm.slane %v2500_v53, 3 }
  0x3f   :  { %1061 = vmatpush.bf16.msra.mxu2 %v1906_v13 }
  0x40   :  { %1084 = vmatpush.bf16.msrb.mxu0 %v1925_v12 }
  0x41   :  { %1097 = vmatpush.bf16.msrb.mxu1 %v1933_v59  ;;  %1074 = vmatpush.bf16.msra.mxu3 %v1914_v14  ;;  %v1975_v59 = vld [vmem:[%s2611_s3 + $0x230] sm:$0xff] }
  0x43   :  { %1062 = vmatpush.bf16.msra.mxu2 %v1905_v17 }
  0x44   :  { %1085 = vmatpush.bf16.msrb.mxu0 %v1924_v15 }
  0x45   :  { %1098 = vmatpush.bf16.msrb.mxu1 %v1932_v16  ;;  %1075 = vmatpush.bf16.msra.mxu3 %v1913_v19  ;;  %v1974_v19 = vld [vmem:[%s2611_s3 + $0x228] sm:$0xff] }
  0x47   :  { %1107 = vmatpush.bf16.msrb.mxu2 %v1944_v18 }
  0x48   :  { %1086 = vmatpush.bf16.msrb.mxu0 %v1923_v21  ;;  %v90_v21 = vperm.slane %v2500_v53, 4 }
  0x49   :  { %1120 = vmatpush.bf16.msrb.mxu3 %v1952_v20  ;;  %1099 = vmatpush.bf16.msrb.mxu1 %v1931_v22 }
  0x4b   :  { %1108 = vmatpush.bf16.msrb.mxu2 %v1943_v23  ;;  %v91_v23 = vperm.slane %v2500_v53, 5 }
  0x4c   :  { %1087 = vmatpush.bf16.msrb.mxu0 %v1922_v25 }
  0x4d   :  { %1121 = vmatpush.bf16.msrb.mxu3 %v1951_v24  ;;  %1100 = vmatpush.bf16.msrb.mxu1 %v1930_v26  ;;  %v1973_v26 = vld [vmem:[%s2611_s3 + $0x220] sm:$0xff] }
  0x4f   :  { %1109 = vmatpush.bf16.msrb.mxu2 %v1942_v27 }
  0x50   :  { %1088 = vmatpush.bf16.msrb.mxu0 %v1921_v32 }
  0x51   :  { %1122 = vmatpush.bf16.msrb.mxu3 %v1950_v31  ;;  %1101 = vmatpush.bf16.msrb.mxu1 %v1929_v34  ;;  %v1972_v34 = vld [vmem:[%s2611_s3 + $0x218] sm:$0xff] }
  0x53   :  { %1110 = vmatpush.bf16.msrb.mxu2 %v1941_v28 }
  0x54   :  { %1133 = vmatpush.bf16.msra.mxu0 %v1960_v33 }
  0x55   :  { %1123 = vmatpush.bf16.msrb.mxu3 %v1949_v36  ;;  %1146 = vmatpush.bf16.msra.mxu1 %v1968_v37  ;;  %v92_v37 = vperm.slane %v2500_v53, 6 }
  0x57   :  { %1111 = vmatpush.bf16.msrb.mxu2 %v1940_v29 }
  0x58   :  { %1134 = vmatpush.bf16.msra.mxu0 %v1959_v38  ;;  %v93_v38 = vperm.slane %v2500_v53, 7 }
  0x59   :  { %1124 = vmatpush.bf16.msrb.mxu3 %v1948_v40  ;;  %1147 = vmatpush.bf16.msra.mxu1 %v1967_v41  ;;  %v1971_v40 = vld [vmem:[%s2611_s3 + $0x210] sm:$0xff] }
  0x5b   :  { %1112 = vmatpush.bf16.msrb.mxu2 %v1939_v30 }
  0x5c   :  { %1135 = vmatpush.bf16.msra.mxu0 %v1958_v42 }
  0x5d   :  { %1125 = vmatpush.bf16.msrb.mxu3 %v1947_v43  ;;  %1148 = vmatpush.bf16.msra.mxu1 %v1966_v44 }
  0x5f   :  { %1113 = vmatpush.bf16.msrb.mxu2 %v1938_v35 }
  0x60   :  { %1136 = vmatpush.bf16.msra.mxu0 %v1957_v45  ;;  %v83_v45 = vld [vmem:[%s2613_s2 + $0x8] sm:$0x3] }
  0x61   :  { %1126 = vmatpush.bf16.msrb.mxu3 %v1946_v46  ;;  %1149 = vmatpush.bf16.msra.mxu1 %v1965_v47 }
  0x63   :  { %1114 = vmatpush.bf16.msrb.mxu2 %v1937_v39 }
  0x64   :  { %1137 = vmatpush.bf16.msra.mxu0 %v1956_v48  ;;  %v1970_v48 = vld [vmem:[%s2611_s3 + $0x208] sm:$0xff] }
  0x65   :  { %1127 = vmatpush.bf16.msrb.mxu3 %v1945_v49  ;;  %1150 = vmatpush.bf16.msra.mxu1 %v1964_v50  ;;  %v94_v50 = vperm.slane %v83_v45, 0 }
  0x68   :  { %1138 = vmatpush.bf16.msra.mxu0 %v1955_v51 }
  0x69   :  { %1151 = vmatpush.bf16.msra.mxu1 %v1963_v52  ;;  %v95_v52 = vperm.slane %v83_v45, 1 }
  0x6c   :  { %1139 = vmatpush.bf16.msra.mxu0 %v1954_v54 }
  0x6d   :  { %1152 = vmatpush.bf16.msra.mxu1 %v1962_v55  ;;  %v1969_v55 = vld [vmem:[%s2611_s3 + $0x200] sm:$0xff] }
  0x70   :  { %1140 = vmatpush.bf16.msra.mxu0 %v1953_v57 }
  0x71   :  { %1153 = vmatpush.bf16.msra.mxu1 %v1961_v62 }
  0x90   :  { %v319_v63 = vpop.f32.mrf.mxu0 }
  0x91   :  { %v320_v0 = vadd.f32 %v319_v63, %v86_v56  ;;  %v332_v1 = vpop.f32.mrf.mxu1 }
  0x92   :  { %v333_v2 = vadd.f32 %v332_v1, %v87_v58 }
  0x93   :  { %v440_v4 = vmax.f32 %v320_v0, 0.0 }
  0x94   :  { %v441_v5 = vmax.f32 %v333_v2, 0.0 }
  0x95   :  { %v450_v7 = vpack.c.bf16 %v440_v4, %v440_v4  ;;  %v1199_v4 = vld [vmem:[%s2615_s5 + $0x30] sm:$0x3] }
  0x96   :  { %v451_v8 = vpack.c.bf16 %v441_v5, %v441_v5  ;;  %v1229_v5 = vunpack.c.l.b16 %v1199_v4 }
  0x97   :  { %1063 = vmatmul.bf16.vlgmr.msra.gmra.mxu2 %v450_v7 }
  0x98   :  { %1076 = vmatmul.bf16.vlgmr.msra.gmra.mxu3 %v451_v8  ;;  %v321_v12 = vpop.f32.mrf.mxu0  ;;  %1159 = vmatpush.bf16.msra.mxu2 %v1976_v6  ;;  %v1236_v6 = vpack.c.b16 %v1229_v5, %v1229_v5  ;;  %v1983_v8 = vld [vmem:[%s2615_s5 + $0x28] sm:$0xff] }
  0x99   :  { %v334_v13 = vpop.f32.mrf.mxu1  ;;  %v345_v14 = vpop.f32.mrf.mxu2  ;;  %1179 = vmatpush.bf16.msra.mxu3 %v1053_v10  ;;  %v1981_v10 = vld [vmem:[%s2615_s5 + $0x18] sm:$0xff] }
  0x9a   :  { %v346_v15 = vadd.f32 %v345_v14, %v88_v9  ;;  %v1249_v7 = vsel %vm1247_vm3, %v1236_v6, 0  ;;  %v1982_v9 = vld [vmem:[%s2615_s5 + $0x20] sm:$0xff]  ;;  %v1979_v14 = vld [vmem:[%s2615_s5 + $0x8] sm:$0xff] }
  0x9b   :  { %v358_v16 = vpop.f32.mrf.mxu3 }
  0x9c   :  { %v359_v17 = vadd.f32 %v358_v16, %v89_v11  ;;  %v442_v18 = vmax.f32 %v346_v15, 0.0  ;;  %1160 = vmatpush.bf16.msra.mxu2 %v1975_v59  ;;  %v1980_v11 = vld [vmem:[%s2615_s5 + $0x10] sm:$0xff]  ;;  %v1988_v59 = vld [vmem:[%s2612_s4] ss:$0 sm:$0xff] }
  0x9e   :  { %v443_v20 = vmax.f32 %v359_v17, 0.0  ;;  %v452_v22 = vpack.c.bf16 %v442_v18, %v442_v18  ;;  %v1978_v18 = vld [vmem:[%s2615_s5] sm:$0xff] }
  0xa0   :  { %v453_v24 = vpack.c.bf16 %v443_v20, %v443_v20  ;;  %v371_v25 = vpop.f32.mrf.mxu0  ;;  %1161 = vmatpush.bf16.msra.mxu2 %v1974_v19  ;;  %1089 = vmatmul.bf16.vlgmr.msrb.gmra.mxu0 %v452_v22  ;;  %v1272_v22 = vld [vmem:[%s2616_s7 + $0x18] sm:$0x1] }
  0xa1   :  { %v372_v27 = vadd.f32 %v371_v25, %v90_v21  ;;  %v384_v28 = vpop.f32.mrf.mxu1  ;;  %v347_v29 = vpop.f32.mrf.mxu2  ;;  %1252 = vmatpush.bf16.msrb.mxu0 %v1249_v7 }
  0xa2   :  { %1102 = vmatmul.bf16.vlgmr.msrb.gmra.mxu1 %v453_v24  ;;  %v385_v30 = vadd.f32 %v384_v28, %v91_v23  ;;  %v1290_v23 = vunpack.c.l.b16 %v1272_v22  ;;  %v1986_v29 = vld [vmem:[%s2616_s7 + $0x10] sm:$0xff] }
  0xa3   :  { %v360_v31 = vpop.f32.mrf.mxu3  ;;  %v444_v32 = vmax.f32 %v372_v27, 0.0 }
  0xa4   :  { %v445_v33 = vmax.f32 %v385_v30, 0.0  ;;  %1162 = vmatpush.bf16.msra.mxu2 %v1973_v26  ;;  %v1294_v26 = vpack.c.b16 %v1290_v23, %v1290_v23 }
  0xa5   :  { %v454_v35 = vpack.c.bf16 %v444_v32, %v444_v32  ;;  %1253 = vmatpush.bf16.msrb.mxu0 %v1983_v8 }
  0xa6   :  { %v455_v36 = vpack.c.bf16 %v445_v33, %v445_v33  ;;  %v1304_v28 = vsel %vm1302_vm4, %v1294_v26, 0 }
  0xa7   :  { %1115 = vmatmul.bf16.vlgmr.msrb.gmra.mxu2 %v454_v35  ;;  %1310 = vmatpush.bf16.msrb.mxu1 %v1304_v28  ;;  %v1985_v35 = vld [vmem:[%s2616_s7 + $0x8] sm:$0xff] }
  0xa8   :  { %1128 = vmatmul.bf16.vlgmr.msrb.gmra.mxu3 %v455_v36  ;;  %v373_v39 = vpop.f32.mrf.mxu0  ;;  %1163 = vmatpush.bf16.msra.mxu2 %v1972_v34 }
  0xa9   :  { %v386_v41 = vpop.f32.mrf.mxu1  ;;  %v397_v42 = vpop.f32.mrf.mxu2  ;;  %1254 = vmatpush.bf16.msrb.mxu0 %v1982_v9 }
  0xaa   :  { %v398_v43 = vadd.f32 %v397_v42, %v92_v37 }
  0xab   :  { %v410_v44 = vpop.f32.mrf.mxu3  ;;  %1311 = vmatpush.bf16.msrb.mxu1 %v1986_v29 }
  0xac   :  { %v411_v46 = vadd.f32 %v410_v44, %v93_v38  ;;  %v446_v47 = vmax.f32 %v398_v43, 0.0  ;;  %1164 = vmatpush.bf16.msra.mxu2 %v1971_v40 }
  0xad   :  { %1255 = vmatpush.bf16.msrb.mxu0 %v1981_v10 }
  0xae   :  { %v447_v49 = vmax.f32 %v411_v46, 0.0  ;;  %v456_v51 = vpack.c.bf16 %v446_v47, %v446_v47 }
  0xaf   :  { %1312 = vmatpush.bf16.msrb.mxu1 %v1985_v35 }
  0xb0   :  { %v457_v53 = vpack.c.bf16 %v447_v49, %v447_v49  ;;  %v423_v54 = vpop.f32.mrf.mxu0  ;;  %1165 = vmatpush.bf16.msra.mxu2 %v1970_v48  ;;  %1141 = vmatmul.bf16.vlgmr.msra.gmra.mxu0 %v456_v51 }
  0xb1   :  { %v424_v56 = vadd.f32 %v423_v54, %v94_v50  ;;  %v436_v57 = vpop.f32.mrf.mxu1  ;;  %v399_v58 = vpop.f32.mrf.mxu2  ;;  %1256 = vmatpush.bf16.msrb.mxu0 %v1980_v11  ;;  %v1987_v54 = vld [vmem:[%s2618_s9] sm:$0x10] }
  0xb2   :  { %1154 = vmatmul.bf16.vlgmr.msra.gmra.mxu1 %v457_v53  ;;  %v437_v60 = vadd.f32 %v436_v57, %v95_v52  ;;  %v1984_v52 = vld [vmem:[%s2616_s7] sm:$0xff] }
  0xb3   :  { %v412_v61 = vpop.f32.mrf.mxu3  ;;  %v448_v62 = vmax.f32 %v424_v56, 0.0  ;;  %1313 = vmatpush.bf16.msrb.mxu1 %v1984_v52  ;;  %v1862_v53 = vld [vmem:[%s2618_s9] sm:$0xf] }
  0xb4   :  { %v449_v63 = vmax.f32 %v437_v60, 0.0  ;;  %1166 = vmatpush.bf16.msra.mxu2 %v1969_v55  ;;  %v1863_v55 = vor.u32 %v1987_v54, %v1862_v53  ;;  %v1989_v57 = vld [vmem:[%s2614_s6] ss:$0 sm:$0xff] }
  0xb5   :  { %v458_v0 = vpack.c.bf16 %v448_v62, %v448_v62  ;;  %1257 = vmatpush.bf16.msrb.mxu0 %v1979_v14 }
  0xb6   :  { %v459_v1 = vpack.c.bf16 %v449_v63, %v449_v63  ;;  %v1338_v56 = vsel %vm1336_vm6, %v1863_v55, 0 }
  0xb7   :  { %1167 = vmatmul.bf16.vlgmr.msra.gmra.mxu2 %v458_v0  ;;  %1347 = vmatpush.bf16.msrb.mxu3 %v1338_v56  ;;  %v16_v0 = vstv %s2619_s10 }
  0xb8   :  { %1821 = vmatmul.msk.bf16.vlgmr.msra.gmra.mxu3 %vm1047_vm2, %v459_v1  ;;  %v425_v2 = vpop.f32.mrf.mxu0  ;;  %17 = vst [vmem:[#allocation2] sm:$0x1] %v16_v0  ;;  %v1990_v1 = vld [vmem:[%s2617_s8] ss:$0 sm:$0xff] }
  0xb9   :  { %v438_v3 = vpop.f32.mrf.mxu1  ;;  %1258 = vmatpush.bf16.msrb.mxu0 %v1978_v18 }
  0xbf   :  { %v1991_v7 = vld [vmem:[#allocation2] ss:$0 sm:$0xff] }
 0x11a   :  { %v1064_v12 = vpop.f32.mrf.mxu2 }
 0x11b   :  { %v1077_v13 = vpop.f32.mrf.mxu3  ;;  %v1065_v17 = vadd.f32 %v1988_v59, %v1064_v12 }
 0x11d   :  { %v1090_v15 = vpop.f32.mrf.mxu0  ;;  %v1078_v20 = vadd.f32 %v1077_v13, %v1065_v17 }
 0x11f   :  { %v1103_v16 = vpop.f32.mrf.mxu1  ;;  %v1091_v27 = vadd.f32 %v1090_v15, %v1078_v20 }
 0x121   :  { %v1104_v31 = vadd.f32 %v1103_v16, %v1091_v27 }
 0x122   :  { %v1066_v19 = vpop.f32.mrf.mxu2 }
 0x123   :  { %v1079_v21 = vpop.f32.mrf.mxu3 }
 0x125   :  { %v1092_v24 = vpop.f32.mrf.mxu0 }
 0x127   :  { %v1105_v25 = vpop.f32.mrf.mxu1 }
 0x12a   :  { %v1116_v30 = vpop.f32.mrf.mxu2 }
 0x12b   :  { %v1129_v32 = vpop.f32.mrf.mxu3  ;;  %v1117_v33 = vadd.f32 %v1116_v30, %v1104_v31 }
 0x12d   :  { %v1142_v34 = vpop.f32.mrf.mxu0  ;;  %v1130_v37 = vadd.f32 %v1129_v32, %v1117_v33 }
 0x12f   :  { %v1155_v36 = vpop.f32.mrf.mxu1  ;;  %v1143_v40 = vadd.f32 %v1142_v34, %v1130_v37 }
 0x131   :  { %v1156_v43 = vadd.f32 %v1155_v36, %v1143_v40 }
 0x132   :  { %v1118_v38 = vpop.f32.mrf.mxu2 }
 0x133   :  { %v1131_v39 = vpop.f32.mrf.mxu3 }
 0x135   :  { %v1144_v41 = vpop.f32.mrf.mxu0 }
 0x137   :  { %v1157_v42 = vpop.f32.mrf.mxu1 }
 0x13a   :  { %v1168_v44 = vpop.f32.mrf.mxu2 }
 0x13b   :  { %v1169_v45 = vadd.f32 %v1168_v44, %v1156_v43  ;;  %v1181_v46 = vpop.f32.mrf.mxu3 }
 0x13d   :  { %v1182_v47 = vadd.f32 %v1181_v46, %v1169_v45 }
 0x13f   :  { %v1185_v48 = vmax.f32 %v1182_v47, 0.0 }
 0x141   :  { %v1186_v49 = vpack.c.bf16 %v1185_v48, %v1185_v48 }
 0x142   :  { %v1170_v50 = vpop.f32.mrf.mxu2 }
 0x143   :  { %v1183_v51 = vpop.f32.mrf.mxu3  ;;  %1846 = vmatmul.msk.bf16.vlgmr.msrb.gmra.mxu0 %vm1243_vm5, %v1186_v49 }
 0x1c0   :  { %v1260_v58 = vpop.f32.mrf.mxu0 }
 0x1c1   :  { %v1261_v60 = vadd.f32 %v1989_v57, %v1260_v58 }
 0x1c3   :  { %v1264_v61 = vmax.f32 %v1261_v60, 0.0 }
 0x1c5   :  { %v1265_v62 = vpack.c.bf16 %v1264_v61, %v1264_v61 }
 0x1c7   :  { %1859 = vmatmul.msk.bf16.vlgmr.msrb.gmra.mxu1 %vm1298_vm7, %v1265_v62 }
 0x1c8   :  { %v1262_v63 = vpop.f32.mrf.mxu0 }
 0x244   :  { %v1315_v2 = vpop.f32.mrf.mxu1 }
 0x245   :  { %v1316_v3 = vadd.f32 %v1990_v1, %v1315_v2 }
 0x247   :  { %v1319_v4 = vmax.f32 %v1316_v3, 0.0 }
 0x249   :  { %v1320_v5 = vpack.c.bf16 %v1319_v4, %v1319_v4 }
 0x24b   :  { %1864 = vmatmul.msk.bf16.vlgmr.msrb.gmra.mxu3 %vm1332_vm8, %v1320_v5 }
 0x24c   :  { %v1317_v6 = vpop.f32.mrf.mxu1 }
 0x2ce   :  { %v1349_v8 = vpop.f32.mrf.mxu3 }
 0x2cf   :  { %v1350_v9 = vadd.f32 %v1991_v7, %v1349_v8 }
 0x2d1   :  { %1354 = vst.msk [vmem:[%s2620_s11] sm:$0x3] %vm1353_vm9, %v1350_v9 }
 0x2d6   :  { %v1351_v10 = vpop.f32.mrf.mxu3 }

</bundles_post_ra>
